<compile_context>
chip_gen: v7x
topology: tpu7x:2x2x1
jax: 0.10.0
libtpu: 0.0.40
codegen_flags: <defaults>
</compile_context>

<pallas_src>
import functools

import numpy as np
import jax
import jax.numpy as jnp
from jax.experimental import pallas as pl
from jax.experimental.pallas import tpu as pltpu

# ----------------------------- config (small) -----------------------------
NUM_TEXT_TOKENS = 16
V = NUM_TEXT_TOKENS + 1        # vocab (num_text_tokens + 1)
D = 32                         # model dim
T_MAX = 32                     # text_max_seq_len
DEPTH = 2                      # decoder_depth
H = 2                          # attn_heads
DH = 16                        # attn_dim_head
INNER = H * DH                 # = D
FF = 4 * D                     # feed-forward inner dim
B = 2                          # batch
SCALE = DH ** -0.5

LK = 1 + T_MAX                       # self-attn cache rows: mem-kv + T_MAX positions
LK_PAD = ((LK + 7) // 8) * 8         # 8-aligned block per (layer, batch)


# ----------------------------- fused generate kernel -----------------------------

def _make_kernel(seq_len, lc):
    """Single pallas_call; whole decode loop is an in-kernel fori_loop."""
    lck = 1 + lc
    lck_pad = ((lck + 7) // 8) * 8

    def kernel(plen_ref,                                   # scalar prefetch (SMEM)
               prompt_oh_ref, cos_ref, sin_ref, rot_ref, wsum_ref, wexp_ref, ctx_ref,
               emb_ref, fg_ref, fb_ref, wl_ref,
               sa_g, sa_b, sa_wq, sa_wk, sa_wv, sa_wo, sa_mk, sa_mv,
               ca_g, ca_b, ca_wq, ca_wk, ca_wv, ca_wo, ca_mk, ca_mv,
               ff_g, ff_b, ff_w1, ff_b1, ff_w2, ff_b2,
               out_ref,                                    # (B, T_MAX) int32
               sa_kc, sa_vc, ca_kc, ca_vc):                # persistent VMEM caches

        def ln(x, g, b):
            mu = jnp.mean(x, axis=-1, keepdims=True)
            var = jnp.mean((x - mu) ** 2, axis=-1, keepdims=True)
            return (x - mu) * jax.lax.rsqrt(var + 1e-5) * g + b

        def attend(qb, kc, vc, base, nrows, limit):
            # qb: (1, INNER); cache block rows [base, base+nrows).
            kblk = kc[base:base + nrows, :]
            vblk = vc[base:base + nrows, :]
            # per-head scores via constant head-sum matmul: (nrows, H)
            s = jnp.dot(kblk * qb, wsum_ref[...],
                        preferred_element_type=jnp.float32) * SCALE
            if limit is not None:
                rows = jax.lax.broadcasted_iota(jnp.int32, s.shape, 0)
                s = jnp.where(rows <= limit, s, -1e30)
            m = jnp.max(s, axis=0, keepdims=True)
            p = jnp.exp(s - m)
            p = p / jnp.sum(p, axis=0, keepdims=True)
            pf = jnp.dot(p, wexp_ref[...], preferred_element_type=jnp.float32)
            return jnp.sum(pf * vblk, axis=0, keepdims=True)           # (1, INNER)

        # ---------------- one-time init (runs once; grid has a single step) ----------------
        out_ref[...] = jnp.zeros_like(out_ref)
        sa_kc[...] = jnp.zeros_like(sa_kc)
        sa_vc[...] = jnp.zeros_like(sa_vc)
        ca_kc[...] = jnp.zeros_like(ca_kc)
        ca_vc[...] = jnp.zeros_like(ca_vc)

        for l in range(DEPTH):
            for b in range(B):
                sb = (l * B + b) * LK_PAD
                sa_kc[sb:sb + 1, :] = sa_mk[l]              # mem-kv in row 0 (written once)
                sa_vc[sb:sb + 1, :] = sa_mv[l]
                cbv = ctx_ref[b]                            # (lc, D)
                kb = jnp.dot(cbv, ca_wk[l], preferred_element_type=jnp.float32)
                vb = jnp.dot(cbv, ca_wv[l], preferred_element_type=jnp.float32)
                cb = (l * B + b) * lck_pad
                ca_kc[cb:cb + lck, :] = jnp.concatenate([ca_mk[l], kb], axis=0)
                ca_vc[cb:cb + lck, :] = jnp.concatenate([ca_mv[l], vb], axis=0)

        # initial carry: one-hot of the token at position 0 (prompt start), per batch
        oh0 = jnp.concatenate(
            [prompt_oh_ref[b * T_MAX:b * T_MAX + 1, :] for b in range(B)], axis=0)

        p_len = plen_ref[0]

        # ---------------- incremental decode loop (prompt prefill + generation) ----------------
        def step(pos, oh):
            # oh is the one-hot of the token at position `pos`; process that single row.
            x = jnp.dot(oh, emb_ref[...], preferred_element_type=jnp.float32)   # (B, D)
            cos_row = cos_ref[pl.ds(pos, 1), :]                                 # (1, INNER)
            sin_row = sin_ref[pl.ds(pos, 1), :]
            rot = rot_ref[...]

            for l in range(DEPTH):
                # ---- self attention (causal, rotary, 1 mem-kv, incremental KV cache) ----
                xn = ln(x, sa_g[l], sa_b[l])
                q = jnp.dot(xn, sa_wq[l], preferred_element_type=jnp.float32)
                k = jnp.dot(xn, sa_wk[l], preferred_element_type=jnp.float32)
                v = jnp.dot(xn, sa_wv[l], preferred_element_type=jnp.float32)
                q = q * cos_row + jnp.dot(q, rot, preferred_element_type=jnp.float32) * sin_row
                k = k * cos_row + jnp.dot(k, rot, preferred_element_type=jnp.float32) * sin_row
                outs = []
                for b in range(B):
                    sb = (l * B + b) * LK_PAD
                    sa_kc[pl.ds(sb + 1 + pos, 1), :] = k[b:b + 1, :]
                    sa_vc[pl.ds(sb + 1 + pos, 1), :] = v[b:b + 1, :]
                    outs.append(attend(q[b:b + 1, :], sa_kc, sa_vc, sb, LK, 1 + pos))
                o = jnp.concatenate(outs, axis=0)
                x = x + jnp.dot(o, sa_wo[l], preferred_element_type=jnp.float32)

                # ---- cross attention to context (K/V hoisted before the loop) ----
                xn = ln(x, ca_g[l], ca_b[l])
                q = jnp.dot(xn, ca_wq[l], preferred_element_type=jnp.float32)
                outs = []
                for b in range(B):
                    cb = (l * B + b) * lck_pad
                    outs.append(attend(q[b:b + 1, :], ca_kc, ca_vc, cb, lck, None))
                o = jnp.concatenate(outs, axis=0)
                x = x + jnp.dot(o, ca_wo[l], preferred_element_type=jnp.float32)

                # ---- feed forward (GELU) ----
                xn = ln(x, ff_g[l], ff_b[l])
                h1 = jax.nn.gelu(
                    jnp.dot(xn, ff_w1[l], preferred_element_type=jnp.float32) + ff_b1[l],
                    approximate=True)
                x = x + jnp.dot(h1, ff_w2[l], preferred_element_type=jnp.float32) + ff_b2[l]

            # ---- final LN + logits + greedy argmax (single row per batch) ----
            xl = ln(x, fg_ref[...], fb_ref[...])
            logits = jnp.dot(xl, wl_ref[...], preferred_element_type=jnp.float32)  # (B, V)
            mx = jnp.max(logits, axis=-1, keepdims=True)
            vid = jax.lax.broadcasted_iota(jnp.int32, (B, V), 1)
            gen_id = jnp.min(jnp.where(logits >= mx, vid.astype(jnp.float32), float(V)),
                             axis=-1, keepdims=True).astype(jnp.int32)             # (B, 1)
            gen_oh = (vid == gen_id).astype(jnp.float32)                            # (B, V)

            # write generated id at column pos+1 (columns < prompt_len are never returned)
            col = jax.lax.broadcasted_iota(jnp.int32, (B, T_MAX), 1)
            out_ref[...] = jnp.where(col == pos + 1, gen_id, out_ref[...])

            # next step's token: still inside the prompt -> prompt token, else generated
            oh_prompt = jnp.concatenate(
                [prompt_oh_ref[pl.ds(b * T_MAX + pos + 1, 1), :] for b in range(B)],
                axis=0)
            w = (pos + 1 < p_len).astype(jnp.float32)
            return w * oh_prompt + (1.0 - w) * gen_oh

        jax.lax.fori_loop(0, p_len - 1 + seq_len, step, oh0)

    return kernel


# ----------------------------- constant helper matrices -----------------------------

def _rotate_half_matrix():
    # x @ R == per-head rotate_half(x)  (sign included)
    r = np.zeros((INNER, INNER), np.float32)
    half = DH // 2
    for h in range(H):
        base = h * DH
        for j in range(half):
            r[base + half + j, base + j] = -1.0
            r[base + j, base + half + j] = 1.0
    return r


def _head_sum_matrix():
    w = np.zeros((INNER, H), np.float32)
    for h in range(H):
        w[h * DH:(h + 1) * DH, h] = 1.0
    return w


# ----------------------------- generate wrapper -----------------------------

@functools.partial(jax.jit, static_argnames=("seq_len",))
def generate(params, prompt, seq_len, context):
    """Greedy autoregressive generation; returns the seq_len newly generated tokens."""
    Bp, P = prompt.shape
    assert Bp == B and P >= 1
    assert P + seq_len <= T_MAX
    Lc = context.shape[1]
    lck = 1 + Lc
    lck_pad = ((lck + 7) // 8) * 8

    # prompt one-hots, batch-major blocks of T_MAX rows each: (B*T_MAX, V)
    toks = jnp.zeros((B, T_MAX), jnp.int32).at[:, :P].set(prompt.astype(jnp.int32))
    prompt_oh = (toks[..., None] == jnp.arange(V, dtype=jnp.int32)
                 ).astype(jnp.float32).reshape(B * T_MAX, V)

    # rotary tables (per-head freqs tiled across the packed H*DH lane layout)
    inv = 1.0 / (10000.0 ** (jnp.arange(0, DH, 2, dtype=jnp.float32) / DH))
    t = jnp.arange(T_MAX, dtype=jnp.float32)
    freqs = t[:, None] * inv[None, :]
    freqs = jnp.concatenate([freqs, freqs], axis=-1)                 # (T, DH)
    cos = jnp.tile(jnp.cos(freqs), (1, H)).astype(jnp.float32)       # (T, INNER)
    sin = jnp.tile(jnp.sin(freqs), (1, H)).astype(jnp.float32)

    rot = jnp.asarray(_rotate_half_matrix())                         # (INNER, INNER)
    wsum = jnp.asarray(_head_sum_matrix())                           # (INNER, H)
    wexp = wsum.T                                                    # (H, INNER)

    sa, ca, ff = params["sa"], params["ca"], params["ff"]
    mk_sa = sa["mk"].reshape(DEPTH, 1, INNER)
    mv_sa = sa["mv"].reshape(DEPTH, 1, INNER)
    mk_ca = ca["mk"].reshape(DEPTH, 1, INNER)
    mv_ca = ca["mv"].reshape(DEPTH, 1, INNER)

    inputs = [
        prompt_oh, cos, sin, rot, wsum, wexp, context.astype(jnp.float32),
        params["tok_emb"], params["final_g"], params["final_b"], params["to_logits"],
        sa["g"], sa["b"], sa["wq"], sa["wk"], sa["wv"], sa["wo"], mk_sa, mv_sa,
        ca["g"], ca["b"], ca["wq"], ca["wk"], ca["wv"], ca["wo"], mk_ca, mv_ca,
        ff["g"], ff["b"], ff["w1"], ff["b1"], ff["w2"], ff["b2"],
    ]

    def const_spec(a):
        zeros = (0,) * a.ndim
        return pl.BlockSpec(a.shape, lambda *args: zeros)   # full block, VMEM-resident

    plen = jnp.array([P], dtype=jnp.int32)                   # scalar prefetch (SMEM)

    tokens_out = pl.pallas_call(
        _make_kernel(seq_len, Lc),
        out_shape=jax.ShapeDtypeStruct((B, T_MAX), jnp.int32),
        grid_spec=pltpu.PrefetchScalarGridSpec(
            num_scalar_prefetch=1,
            grid=(1,),
            in_specs=[const_spec(a) for a in inputs],
            out_specs=pl.BlockSpec((B, T_MAX), lambda *args: (0, 0)),
            scratch_shapes=[
                pltpu.VMEM((DEPTH * B * LK_PAD, INNER), jnp.float32),   # self K cache
                pltpu.VMEM((DEPTH * B * LK_PAD, INNER), jnp.float32),   # self V cache
                pltpu.VMEM((DEPTH * B * lck_pad, INNER), jnp.float32),  # cross K cache
                pltpu.VMEM((DEPTH * B * lck_pad, INNER), jnp.float32),  # cross V cache
            ]),
        compiler_params=pltpu.CompilerParams(
            dimension_semantics=("arbitrary",)),
    )(plen, *inputs)

    return tokens_out[:, P:P + seq_len]                              # (B, seq_len)


# ----------------------------- deterministic params -----------------------------

def init_params(key):
    keys = iter(jax.random.split(key, 64))

    def nrm(shape, scale=0.02):
        return (scale * jax.random.normal(next(keys), shape)).astype(jnp.float32)

    def attn_stack():
        return dict(
            g=jnp.ones((DEPTH, 1, D), jnp.float32),
            b=jnp.zeros((DEPTH, 1, D), jnp.float32),
            wq=nrm((DEPTH, D, INNER)), wk=nrm((DEPTH, D, INNER)),
            wv=nrm((DEPTH, D, INNER)), wo=nrm((DEPTH, INNER, D)),
            mk=nrm((DEPTH, H, DH)), mv=nrm((DEPTH, H, DH)),
        )

    return dict(
        tok_emb=nrm((V, D)),
        final_g=jnp.ones((1, D), jnp.float32),
        final_b=jnp.zeros((1, D), jnp.float32),
        to_logits=nrm((D, V)),
        sa=attn_stack(),
        ca=attn_stack(),
        ff=dict(
            g=jnp.ones((DEPTH, 1, D), jnp.float32),
            b=jnp.zeros((DEPTH, 1, D), jnp.float32),
            w1=nrm((DEPTH, D, FF)), b1=jnp.zeros((DEPTH, 1, FF), jnp.float32),
            w2=nrm((DEPTH, FF, D)), b2=jnp.zeros((DEPTH, 1, D), jnp.float32),
        ),
    )


# ----------------------------- main -----------------------------

if __name__ == "__main__":
    key = jax.random.PRNGKey(0)
    k_param, k_prompt, k_ctx = jax.random.split(key, 3)

    params = init_params(k_param)

    P = 4            # prompt length
    SEQ_LEN = 6      # number of tokens to generate (P + SEQ_LEN <= T_MAX)
    LC = 8           # context (encoder output) length

    prompt = jax.random.randint(k_prompt, (B, P), 0, V, dtype=jnp.int32)
    context = (0.02 * jax.random.normal(k_ctx, (B, LC, D))).astype(jnp.float32)

    out = generate(params, prompt, seq_len=SEQ_LEN, context=context)
    out = jax.block_until_ready(out)

    assert out.shape == (B, SEQ_LEN)
    assert out.dtype == jnp.int32
    print("KERNEL_OK")
</pallas_src>

<mosaic_0001>
module attributes {stable_mosaic.version = 11 : i64} {
  func.func @kernel(%arg0: i32, %arg1: memref<1xi32, #tpu.memory_space<smem>>, %arg2: memref<64x17xf32, #tpu.memory_space<vmem>>, %arg3: memref<32x32xf32, #tpu.memory_space<vmem>>, %arg4: memref<32x32xf32, #tpu.memory_space<vmem>>, %arg5: memref<32x32xf32, #tpu.memory_space<vmem>>, %arg6: memref<32x2xf32, #tpu.memory_space<vmem>>, %arg7: memref<2x32xf32, #tpu.memory_space<vmem>>, %arg8: memref<2x8x32xf32, #tpu.memory_space<vmem>>, %arg9: memref<17x32xf32, #tpu.memory_space<vmem>>, %arg10: memref<1x32xf32, #tpu.memory_space<vmem>>, %arg11: memref<1x32xf32, #tpu.memory_space<vmem>>, %arg12: memref<32x17xf32, #tpu.memory_space<vmem>>, %arg13: memref<2x1x32xf32, #tpu.memory_space<vmem>>, %arg14: memref<2x1x32xf32, #tpu.memory_space<vmem>>, %arg15: memref<2x32x32xf32, #tpu.memory_space<vmem>>, %arg16: memref<2x32x32xf32, #tpu.memory_space<vmem>>, %arg17: memref<2x32x32xf32, #tpu.memory_space<vmem>>, %arg18: memref<2x32x32xf32, #tpu.memory_space<vmem>>, %arg19: memref<2x1x32xf32, #tpu.memory_space<vmem>>, %arg20: memref<2x1x32xf32, #tpu.memory_space<vmem>>, %arg21: memref<2x1x32xf32, #tpu.memory_space<vmem>>, %arg22: memref<2x1x32xf32, #tpu.memory_space<vmem>>, %arg23: memref<2x32x32xf32, #tpu.memory_space<vmem>>, %arg24: memref<2x32x32xf32, #tpu.memory_space<vmem>>, %arg25: memref<2x32x32xf32, #tpu.memory_space<vmem>>, %arg26: memref<2x32x32xf32, #tpu.memory_space<vmem>>, %arg27: memref<2x1x32xf32, #tpu.memory_space<vmem>>, %arg28: memref<2x1x32xf32, #tpu.memory_space<vmem>>, %arg29: memref<2x1x32xf32, #tpu.memory_space<vmem>>, %arg30: memref<2x1x32xf32, #tpu.memory_space<vmem>>, %arg31: memref<2x32x128xf32, #tpu.memory_space<vmem>>, %arg32: memref<2x1x128xf32, #tpu.memory_space<vmem>>, %arg33: memref<2x128x32xf32, #tpu.memory_space<vmem>>, %arg34: memref<2x1x32xf32, #tpu.memory_space<vmem>>, %arg35: memref<2x32xi32, #tpu.memory_space<vmem>>, %arg36: memref<160x32xf32, #tpu.memory_space<vmem>>, %arg37: memref<160x32xf32, #tpu.memory_space<vmem>>, %arg38: memref<64x32xf32, #tpu.memory_space<vmem>>, %arg39: memref<64x32xf32, #tpu.memory_space<vmem>>) attributes {dimension_semantics = [#tpu.dimension_semantics<arbitrary>], iteration_bounds = array<i64: 1>, scalar_prefetch = 1 : i64, scratch_operands = 4 : i64, tpu.core_type = #tpu.core_type<tc>, window_params = [{pipeline_mode = #tpu.pipeline_mode<synchronous>, transform_indices = @transform_0, window_bounds = array<i64: 64, 17>}, {pipeline_mode = #tpu.pipeline_mode<synchronous>, transform_indices = @transform_1, window_bounds = array<i64: 32, 32>}, {pipeline_mode = #tpu.pipeline_mode<synchronous>, transform_indices = @transform_2, window_bounds = array<i64: 32, 32>}, {pipeline_mode = #tpu.pipeline_mode<synchronous>, transform_indices = @transform_3, window_bounds = array<i64: 32, 32>}, {pipeline_mode = #tpu.pipeline_mode<synchronous>, transform_indices = @transform_4, window_bounds = array<i64: 32, 2>}, {pipeline_mode = #tpu.pipeline_mode<synchronous>, transform_indices = @transform_5, window_bounds = array<i64: 2, 32>}, {pipeline_mode = #tpu.pipeline_mode<synchronous>, transform_indices = @transform_6, window_bounds = array<i64: 2, 8, 32>}, {pipeline_mode = #tpu.pipeline_mode<synchronous>, transform_indices = @transform_7, window_bounds = array<i64: 17, 32>}, {pipeline_mode = #tpu.pipeline_mode<synchronous>, transform_indices = @transform_8, window_bounds = array<i64: 1, 32>}, {pipeline_mode = #tpu.pipeline_mode<synchronous>, transform_indices = @transform_9, window_bounds = array<i64: 1, 32>}, {pipeline_mode = #tpu.pipeline_mode<synchronous>, transform_indices = @transform_10, window_bounds = array<i64: 32, 17>}, {pipeline_mode = #tpu.pipeline_mode<synchronous>, transform_indices = @transform_11, window_bounds = array<i64: 2, 1, 32>}, {pipeline_mode = #tpu.pipeline_mode<synchronous>, transform_indices = @transform_12, window_bounds = array<i64: 2, 1, 32>}, {pipeline_mode = #tpu.pipeline_mode<synchronous>, transform_indices = @transform_13, window_bounds = array<i64: 2, 32, 32>}, {pipeline_mode = #tpu.pipeline_mode<synchronous>, transform_indices = @transform_14, window_bounds = array<i64: 2, 32, 32>}, {pipeline_mode = #tpu.pipeline_mode<synchronous>, transform_indices = @transform_15, window_bounds = array<i64: 2, 32, 32>}, {pipeline_mode = #tpu.pipeline_mode<synchronous>, transform_indices = @transform_16, window_bounds = array<i64: 2, 32, 32>}, {pipeline_mode = #tpu.pipeline_mode<synchronous>, transform_indices = @transform_17, window_bounds = array<i64: 2, 1, 32>}, {pipeline_mode = #tpu.pipeline_mode<synchronous>, transform_indices = @transform_18, window_bounds = array<i64: 2, 1, 32>}, {pipeline_mode = #tpu.pipeline_mode<synchronous>, transform_indices = @transform_19, window_bounds = array<i64: 2, 1, 32>}, {pipeline_mode = #tpu.pipeline_mode<synchronous>, transform_indices = @transform_20, window_bounds = array<i64: 2, 1, 32>}, {pipeline_mode = #tpu.pipeline_mode<synchronous>, transform_indices = @transform_21, window_bounds = array<i64: 2, 32, 32>}, {pipeline_mode = #tpu.pipeline_mode<synchronous>, transform_indices = @transform_22, window_bounds = array<i64: 2, 32, 32>}, {pipeline_mode = #tpu.pipeline_mode<synchronous>, transform_indices = @transform_23, window_bounds = array<i64: 2, 32, 32>}, {pipeline_mode = #tpu.pipeline_mode<synchronous>, transform_indices = @transform_24, window_bounds = array<i64: 2, 32, 32>}, {pipeline_mode = #tpu.pipeline_mode<synchronous>, transform_indices = @transform_25, window_bounds = array<i64: 2, 1, 32>}, {pipeline_mode = #tpu.pipeline_mode<synchronous>, transform_indices = @transform_26, window_bounds = array<i64: 2, 1, 32>}, {pipeline_mode = #tpu.pipeline_mode<synchronous>, transform_indices = @transform_27, window_bounds = array<i64: 2, 1, 32>}, {pipeline_mode = #tpu.pipeline_mode<synchronous>, transform_indices = @transform_28, window_bounds = array<i64: 2, 1, 32>}, {pipeline_mode = #tpu.pipeline_mode<synchronous>, transform_indices = @transform_29, window_bounds = array<i64: 2, 32, 128>}, {pipeline_mode = #tpu.pipeline_mode<synchronous>, transform_indices = @transform_30, window_bounds = array<i64: 2, 1, 128>}, {pipeline_mode = #tpu.pipeline_mode<synchronous>, transform_indices = @transform_31, window_bounds = array<i64: 2, 128, 32>}, {pipeline_mode = #tpu.pipeline_mode<synchronous>, transform_indices = @transform_32, window_bounds = array<i64: 2, 1, 32>}, {pipeline_mode = #tpu.pipeline_mode<synchronous>, transform_indices = @transform_33, window_bounds = array<i64: 2, 32>}]} {
    %c0_i32 = arith.constant 0 : i32
    %0 = vector.broadcast %c0_i32 : i32 to vector<2x32xi32>
    %c0 = arith.constant 0 : index
    %c0_0 = arith.constant 0 : index
    %1 = vector.load %arg35[%c0, %c0_0] : memref<2x32xi32, #tpu.memory_space<vmem>>, vector<2x32xi32>
    tpu.vector_store %arg35[%c0, %c0_0], %0 {strides = array<i32>} : memref<2x32xi32, #tpu.memory_space<vmem>>, vector<2x32xi32>,
    %cst = arith.constant 0.000000e+00 : f32
    %2 = vector.broadcast %cst : f32 to vector<160x32xf32>
    %c0_1 = arith.constant 0 : index
    %c0_2 = arith.constant 0 : index
    %3 = vector.load %arg36[%c0_1, %c0_2] : memref<160x32xf32, #tpu.memory_space<vmem>>, vector<160x32xf32>
    tpu.vector_store %arg36[%c0_1, %c0_2], %2 {strides = array<i32>} : memref<160x32xf32, #tpu.memory_space<vmem>>, vector<160x32xf32>,
    %cst_3 = arith.constant 0.000000e+00 : f32
    %4 = vector.broadcast %cst_3 : f32 to vector<160x32xf32>
    %c0_4 = arith.constant 0 : index
    %c0_5 = arith.constant 0 : index
    %5 = vector.load %arg37[%c0_4, %c0_5] : memref<160x32xf32, #tpu.memory_space<vmem>>, vector<160x32xf32>
    tpu.vector_store %arg37[%c0_4, %c0_5], %4 {strides = array<i32>} : memref<160x32xf32, #tpu.memory_space<vmem>>, vector<160x32xf32>,
    %cst_6 = arith.constant 0.000000e+00 : f32
    %6 = vector.broadcast %cst_6 : f32 to vector<64x32xf32>
    %c0_7 = arith.constant 0 : index
    %c0_8 = arith.constant 0 : index
    %7 = vector.load %arg38[%c0_7, %c0_8] : memref<64x32xf32, #tpu.memory_space<vmem>>, vector<64x32xf32>
    tpu.vector_store %arg38[%c0_7, %c0_8], %6 {strides = array<i32>} : memref<64x32xf32, #tpu.memory_space<vmem>>, vector<64x32xf32>,
    %cst_9 = arith.constant 0.000000e+00 : f32
    %8 = vector.broadcast %cst_9 : f32 to vector<64x32xf32>
    %c0_10 = arith.constant 0 : index
    %c0_11 = arith.constant 0 : index
    %9 = vector.load %arg39[%c0_10, %c0_11] : memref<64x32xf32, #tpu.memory_space<vmem>>, vector<64x32xf32>
    tpu.vector_store %arg39[%c0_10, %c0_11], %8 {strides = array<i32>} : memref<64x32xf32, #tpu.memory_space<vmem>>, vector<64x32xf32>,
    %c0_12 = arith.constant 0 : index
    %c0_13 = arith.constant 0 : index
    %c0_14 = arith.constant 0 : index
    %10 = vector.load %arg19[%c0_12, %c0_13, %c0_14] : memref<2x1x32xf32, #tpu.memory_space<vmem>>, vector<1x1x32xf32>
    %11 = vector.shape_cast %10 : vector<1x1x32xf32> to vector<1x32xf32>
    %c0_15 = arith.constant 0 : index
    %c0_16 = arith.constant 0 : index
    %12 = vector.load %arg36[%c0_15, %c0_16] : memref<160x32xf32, #tpu.memory_space<vmem>>, vector<1x32xf32>
    tpu.vector_store %arg36[%c0_15, %c0_16], %11 {strides = array<i32>} : memref<160x32xf32, #tpu.memory_space<vmem>>, vector<1x32xf32>,
    %c0_17 = arith.constant 0 : index
    %c0_18 = arith.constant 0 : index
    %c0_19 = arith.constant 0 : index
    %13 = vector.load %arg20[%c0_17, %c0_18, %c0_19] : memref<2x1x32xf32, #tpu.memory_space<vmem>>, vector<1x1x32xf32>
    %14 = vector.shape_cast %13 : vector<1x1x32xf32> to vector<1x32xf32>
    %c0_20 = arith.constant 0 : index
    %c0_21 = arith.constant 0 : index
    %15 = vector.load %arg37[%c0_20, %c0_21] : memref<160x32xf32, #tpu.memory_space<vmem>>, vector<1x32xf32>
    tpu.vector_store %arg37[%c0_20, %c0_21], %14 {strides = array<i32>} : memref<160x32xf32, #tpu.memory_space<vmem>>, vector<1x32xf32>,
    %c0_22 = arith.constant 0 : index
    %c0_23 = arith.constant 0 : index
    %c0_24 = arith.constant 0 : index
    %16 = vector.load %arg8[%c0_22, %c0_23, %c0_24] : memref<2x8x32xf32, #tpu.memory_space<vmem>>, vector<1x8x32xf32>
    %17 = vector.shape_cast %16 : vector<1x8x32xf32> to vector<8x32xf32>
    %c0_25 = arith.constant 0 : index
    %c0_26 = arith.constant 0 : index
    %c0_27 = arith.constant 0 : index
    %18 = vector.load %arg24[%c0_25, %c0_26, %c0_27] : memref<2x32x32xf32, #tpu.memory_space<vmem>>, vector<1x32x32xf32>
    %19 = vector.shape_cast %18 : vector<1x32x32xf32> to vector<32x32xf32>
    %cst_28 = arith.constant dense<0.000000e+00> : vector<8x32xf32>
    %20 = tpu.matmul %17, %19, %cst_28 {dimension_numbers = #tpu.dot_dimension_numbers<[1], [0], [0], [1], [0, 0, 1, 1], [], []>} : vector<8x32xf32>, vector<32x32xf32>, vector<8x32xf32> -> vector<8x32xf32>
    %c0_29 = arith.constant 0 : index
    %c0_30 = arith.constant 0 : index
    %c0_31 = arith.constant 0 : index
    %21 = vector.load %arg25[%c0_29, %c0_30, %c0_31] : memref<2x32x32xf32, #tpu.memory_space<vmem>>, vector<1x32x32xf32>
    %22 = vector.shape_cast %21 : vector<1x32x32xf32> to vector<32x32xf32>
    %cst_32 = arith.constant dense<0.000000e+00> : vector<8x32xf32>
    %23 = tpu.matmul %17, %22, %cst_32 {dimension_numbers = #tpu.dot_dimension_numbers<[1], [0], [0], [1], [0, 0, 1, 1], [], []>} : vector<8x32xf32>, vector<32x32xf32>, vector<8x32xf32> -> vector<8x32xf32>
    %c0_33 = arith.constant 0 : index
    %c0_34 = arith.constant 0 : index
    %c0_35 = arith.constant 0 : index
    %24 = vector.load %arg27[%c0_33, %c0_34, %c0_35] : memref<2x1x32xf32, #tpu.memory_space<vmem>>, vector<1x1x32xf32>
    %25 = vector.shape_cast %24 : vector<1x1x32xf32> to vector<1x32xf32>
    %26 = tpu.concatenate %25, %20 in 0 : vector<1x32xf32>, vector<8x32xf32> -> vector<9x32xf32>
    %c0_36 = arith.constant 0 : index
    %c0_37 = arith.constant 0 : index
    %27 = vector.load %arg38[%c0_36, %c0_37] : memref<64x32xf32, #tpu.memory_space<vmem>>, vector<9x32xf32>
    tpu.vector_store %arg38[%c0_36, %c0_37], %26 {strides = array<i32>} : memref<64x32xf32, #tpu.memory_space<vmem>>, vector<9x32xf32>,
    %c0_38 = arith.constant 0 : index
    %c0_39 = arith.constant 0 : index
    %c0_40 = arith.constant 0 : index
    %28 = vector.load %arg28[%c0_38, %c0_39, %c0_40] : memref<2x1x32xf32, #tpu.memory_space<vmem>>, vector<1x1x32xf32>
    %29 = vector.shape_cast %28 : vector<1x1x32xf32> to vector<1x32xf32>
    %30 = tpu.concatenate %29, %23 in 0 : vector<1x32xf32>, vector<8x32xf32> -> vector<9x32xf32>
    %c0_41 = arith.constant 0 : index
    %c0_42 = arith.constant 0 : index
    %31 = vector.load %arg39[%c0_41, %c0_42] : memref<64x32xf32, #tpu.memory_space<vmem>>, vector<9x32xf32>
    tpu.vector_store %arg39[%c0_41, %c0_42], %30 {strides = array<i32>} : memref<64x32xf32, #tpu.memory_space<vmem>>, vector<9x32xf32>,
    %c0_43 = arith.constant 0 : index
    %c0_44 = arith.constant 0 : index
    %c0_45 = arith.constant 0 : index
    %32 = vector.load %arg19[%c0_43, %c0_44, %c0_45] : memref<2x1x32xf32, #tpu.memory_space<vmem>>, vector<1x1x32xf32>
    %33 = vector.shape_cast %32 : vector<1x1x32xf32> to vector<1x32xf32>
    %c40 = arith.constant 40 : index
    %c0_46 = arith.constant 0 : index
    %34 = vector.load %arg36[%c40, %c0_46] : memref<160x32xf32, #tpu.memory_space<vmem>>, vector<1x32xf32>
    tpu.vector_store %arg36[%c40, %c0_46], %33 {strides = array<i32>} : memref<160x32xf32, #tpu.memory_space<vmem>>, vector<1x32xf32>,
    %c0_47 = arith.constant 0 : index
    %c0_48 = arith.constant 0 : index
    %c0_49 = arith.constant 0 : index
    %35 = vector.load %arg20[%c0_47, %c0_48, %c0_49] : memref<2x1x32xf32, #tpu.memory_space<vmem>>, vector<1x1x32xf32>
    %36 = vector.shape_cast %35 : vector<1x1x32xf32> to vector<1x32xf32>
    %c40_50 = arith.constant 40 : index
    %c0_51 = arith.constant 0 : index
    %37 = vector.load %arg37[%c40_50, %c0_51] : memref<160x32xf32, #tpu.memory_space<vmem>>, vector<1x32xf32>
    tpu.vector_store %arg37[%c40_50, %c0_51], %36 {strides = array<i32>} : memref<160x32xf32, #tpu.memory_space<vmem>>, vector<1x32xf32>,
    %c1 = arith.constant 1 : index
    %c0_52 = arith.constant 0 : index
    %c0_53 = arith.constant 0 : index
    %38 = vector.load %arg8[%c1, %c0_52, %c0_53] : memref<2x8x32xf32, #tpu.memory_space<vmem>>, vector<1x8x32xf32>
    %39 = vector.shape_cast %38 : vector<1x8x32xf32> to vector<8x32xf32>
    %c0_54 = arith.constant 0 : index
    %c0_55 = arith.constant 0 : index
    %c0_56 = arith.constant 0 : index
    %40 = vector.load %arg24[%c0_54, %c0_55, %c0_56] : memref<2x32x32xf32, #tpu.memory_space<vmem>>, vector<1x32x32xf32>
    %41 = vector.shape_cast %40 : vector<1x32x32xf32> to vector<32x32xf32>
    %cst_57 = arith.constant dense<0.000000e+00> : vector<8x32xf32>
    %42 = tpu.matmul %39, %41, %cst_57 {dimension_numbers = #tpu.dot_dimension_numbers<[1], [0], [0], [1], [0, 0, 1, 1], [], []>} : vector<8x32xf32>, vector<32x32xf32>, vector<8x32xf32> -> vector<8x32xf32>
    %c0_58 = arith.constant 0 : index
    %c0_59 = arith.constant 0 : index
    %c0_60 = arith.constant 0 : index
    %43 = vector.load %arg25[%c0_58, %c0_59, %c0_60] : memref<2x32x32xf32, #tpu.memory_space<vmem>>, vector<1x32x32xf32>
    %44 = vector.shape_cast %43 : vector<1x32x32xf32> to vector<32x32xf32>
    %cst_61 = arith.constant dense<0.000000e+00> : vector<8x32xf32>
    %45 = tpu.matmul %39, %44, %cst_61 {dimension_numbers = #tpu.dot_dimension_numbers<[1], [0], [0], [1], [0, 0, 1, 1], [], []>} : vector<8x32xf32>, vector<32x32xf32>, vector<8x32xf32> -> vector<8x32xf32>
    %c0_62 = arith.constant 0 : index
    %c0_63 = arith.constant 0 : index
    %c0_64 = arith.constant 0 : index
    %46 = vector.load %arg27[%c0_62, %c0_63, %c0_64] : memref<2x1x32xf32, #tpu.memory_space<vmem>>, vector<1x1x32xf32>
    %47 = vector.shape_cast %46 : vector<1x1x32xf32> to vector<1x32xf32>
    %48 = tpu.concatenate %47, %42 in 0 : vector<1x32xf32>, vector<8x32xf32> -> vector<9x32xf32>
    %c16 = arith.constant 16 : index
    %c0_65 = arith.constant 0 : index
    %49 = vector.load %arg38[%c16, %c0_65] : memref<64x32xf32, #tpu.memory_space<vmem>>, vector<9x32xf32>
    tpu.vector_store %arg38[%c16, %c0_65], %48 {strides = array<i32>} : memref<64x32xf32, #tpu.memory_space<vmem>>, vector<9x32xf32>,
    %c0_66 = arith.constant 0 : index
    %c0_67 = arith.constant 0 : index
    %c0_68 = arith.constant 0 : index
    %50 = vector.load %arg28[%c0_66, %c0_67, %c0_68] : memref<2x1x32xf32, #tpu.memory_space<vmem>>, vector<1x1x32xf32>
    %51 = vector.shape_cast %50 : vector<1x1x32xf32> to vector<1x32xf32>
    %52 = tpu.concatenate %51, %45 in 0 : vector<1x32xf32>, vector<8x32xf32> -> vector<9x32xf32>
    %c16_69 = arith.constant 16 : index
    %c0_70 = arith.constant 0 : index
    %53 = vector.load %arg39[%c16_69, %c0_70] : memref<64x32xf32, #tpu.memory_space<vmem>>, vector<9x32xf32>
    tpu.vector_store %arg39[%c16_69, %c0_70], %52 {strides = array<i32>} : memref<64x32xf32, #tpu.memory_space<vmem>>, vector<9x32xf32>,
    %c1_71 = arith.constant 1 : index
    %c0_72 = arith.constant 0 : index
    %c0_73 = arith.constant 0 : index
    %54 = vector.load %arg19[%c1_71, %c0_72, %c0_73] : memref<2x1x32xf32, #tpu.memory_space<vmem>>, vector<1x1x32xf32>
    %55 = vector.shape_cast %54 : vector<1x1x32xf32> to vector<1x32xf32>
    %c80 = arith.constant 80 : index
    %c0_74 = arith.constant 0 : index
    %56 = vector.load %arg36[%c80, %c0_74] : memref<160x32xf32, #tpu.memory_space<vmem>>, vector<1x32xf32>
    tpu.vector_store %arg36[%c80, %c0_74], %55 {strides = array<i32>} : memref<160x32xf32, #tpu.memory_space<vmem>>, vector<1x32xf32>,
    %c1_75 = arith.constant 1 : index
    %c0_76 = arith.constant 0 : index
    %c0_77 = arith.constant 0 : index
    %57 = vector.load %arg20[%c1_75, %c0_76, %c0_77] : memref<2x1x32xf32, #tpu.memory_space<vmem>>, vector<1x1x32xf32>
    %58 = vector.shape_cast %57 : vector<1x1x32xf32> to vector<1x32xf32>
    %c80_78 = arith.constant 80 : index
    %c0_79 = arith.constant 0 : index
    %59 = vector.load %arg37[%c80_78, %c0_79] : memref<160x32xf32, #tpu.memory_space<vmem>>, vector<1x32xf32>
    tpu.vector_store %arg37[%c80_78, %c0_79], %58 {strides = array<i32>} : memref<160x32xf32, #tpu.memory_space<vmem>>, vector<1x32xf32>,
    %c0_80 = arith.constant 0 : index
    %c0_81 = arith.constant 0 : index
    %c0_82 = arith.constant 0 : index
    %60 = vector.load %arg8[%c0_80, %c0_81, %c0_82] : memref<2x8x32xf32, #tpu.memory_space<vmem>>, vector<1x8x32xf32>
    %61 = vector.shape_cast %60 : vector<1x8x32xf32> to vector<8x32xf32>
    %c1_83 = arith.constant 1 : index
    %c0_84 = arith.constant 0 : index
    %c0_85 = arith.constant 0 : index
    %62 = vector.load %arg24[%c1_83, %c0_84, %c0_85] : memref<2x32x32xf32, #tpu.memory_space<vmem>>, vector<1x32x32xf32>
    %63 = vector.shape_cast %62 : vector<1x32x32xf32> to vector<32x32xf32>
    %cst_86 = arith.constant dense<0.000000e+00> : vector<8x32xf32>
    %64 = tpu.matmul %61, %63, %cst_86 {dimension_numbers = #tpu.dot_dimension_numbers<[1], [0], [0], [1], [0, 0, 1, 1], [], []>} : vector<8x32xf32>, vector<32x32xf32>, vector<8x32xf32> -> vector<8x32xf32>
    %c1_87 = arith.constant 1 : index
    %c0_88 = arith.constant 0 : index
    %c0_89 = arith.constant 0 : index
    %65 = vector.load %arg25[%c1_87, %c0_88, %c0_89] : memref<2x32x32xf32, #tpu.memory_space<vmem>>, vector<1x32x32xf32>
    %66 = vector.shape_cast %65 : vector<1x32x32xf32> to vector<32x32xf32>
    %cst_90 = arith.constant dense<0.000000e+00> : vector<8x32xf32>
    %67 = tpu.matmul %61, %66, %cst_90 {dimension_numbers = #tpu.dot_dimension_numbers<[1], [0], [0], [1], [0, 0, 1, 1], [], []>} : vector<8x32xf32>, vector<32x32xf32>, vector<8x32xf32> -> vector<8x32xf32>
    %c1_91 = arith.constant 1 : index
    %c0_92 = arith.constant 0 : index
    %c0_93 = arith.constant 0 : index
    %68 = vector.load %arg27[%c1_91, %c0_92, %c0_93] : memref<2x1x32xf32, #tpu.memory_space<vmem>>, vector<1x1x32xf32>
    %69 = vector.shape_cast %68 : vector<1x1x32xf32> to vector<1x32xf32>
    %70 = tpu.concatenate %69, %64 in 0 : vector<1x32xf32>, vector<8x32xf32> -> vector<9x32xf32>
    %c32 = arith.constant 32 : index
    %c0_94 = arith.constant 0 : index
    %71 = vector.load %arg38[%c32, %c0_94] : memref<64x32xf32, #tpu.memory_space<vmem>>, vector<9x32xf32>
    tpu.vector_store %arg38[%c32, %c0_94], %70 {strides = array<i32>} : memref<64x32xf32, #tpu.memory_space<vmem>>, vector<9x32xf32>,
    %c1_95 = arith.constant 1 : index
    %c0_96 = arith.constant 0 : index
    %c0_97 = arith.constant 0 : index
    %72 = vector.load %arg28[%c1_95, %c0_96, %c0_97] : memref<2x1x32xf32, #tpu.memory_space<vmem>>, vector<1x1x32xf32>
    %73 = vector.shape_cast %72 : vector<1x1x32xf32> to vector<1x32xf32>
    %74 = tpu.concatenate %73, %67 in 0 : vector<1x32xf32>, vector<8x32xf32> -> vector<9x32xf32>
    %c32_98 = arith.constant 32 : index
    %c0_99 = arith.constant 0 : index
    %75 = vector.load %arg39[%c32_98, %c0_99] : memref<64x32xf32, #tpu.memory_space<vmem>>, vector<9x32xf32>
    tpu.vector_store %arg39[%c32_98, %c0_99], %74 {strides = array<i32>} : memref<64x32xf32, #tpu.memory_space<vmem>>, vector<9x32xf32>,
    %c1_100 = arith.constant 1 : index
    %c0_101 = arith.constant 0 : index
    %c0_102 = arith.constant 0 : index
    %76 = vector.load %arg19[%c1_100, %c0_101, %c0_102] : memref<2x1x32xf32, #tpu.memory_space<vmem>>, vector<1x1x32xf32>
    %77 = vector.shape_cast %76 : vector<1x1x32xf32> to vector<1x32xf32>
    %c120 = arith.constant 120 : index
    %c0_103 = arith.constant 0 : index
    %78 = vector.load %arg36[%c120, %c0_103] : memref<160x32xf32, #tpu.memory_space<vmem>>, vector<1x32xf32>
    tpu.vector_store %arg36[%c120, %c0_103], %77 {strides = array<i32>} : memref<160x32xf32, #tpu.memory_space<vmem>>, vector<1x32xf32>,
    %c1_104 = arith.constant 1 : index
    %c0_105 = arith.constant 0 : index
    %c0_106 = arith.constant 0 : index
    %79 = vector.load %arg20[%c1_104, %c0_105, %c0_106] : memref<2x1x32xf32, #tpu.memory_space<vmem>>, vector<1x1x32xf32>
    %80 = vector.shape_cast %79 : vector<1x1x32xf32> to vector<1x32xf32>
    %c120_107 = arith.constant 120 : index
    %c0_108 = arith.constant 0 : index
    %81 = vector.load %arg37[%c120_107, %c0_108] : memref<160x32xf32, #tpu.memory_space<vmem>>, vector<1x32xf32>
    tpu.vector_store %arg37[%c120_107, %c0_108], %80 {strides = array<i32>} : memref<160x32xf32, #tpu.memory_space<vmem>>, vector<1x32xf32>,
    %c1_109 = arith.constant 1 : index
    %c0_110 = arith.constant 0 : index
    %c0_111 = arith.constant 0 : index
    %82 = vector.load %arg8[%c1_109, %c0_110, %c0_111] : memref<2x8x32xf32, #tpu.memory_space<vmem>>, vector<1x8x32xf32>
    %83 = vector.shape_cast %82 : vector<1x8x32xf32> to vector<8x32xf32>
    %c1_112 = arith.constant 1 : index
    %c0_113 = arith.constant 0 : index
    %c0_114 = arith.constant 0 : index
    %84 = vector.load %arg24[%c1_112, %c0_113, %c0_114] : memref<2x32x32xf32, #tpu.memory_space<vmem>>, vector<1x32x32xf32>
    %85 = vector.shape_cast %84 : vector<1x32x32xf32> to vector<32x32xf32>
    %cst_115 = arith.constant dense<0.000000e+00> : vector<8x32xf32>
    %86 = tpu.matmul %83, %85, %cst_115 {dimension_numbers = #tpu.dot_dimension_numbers<[1], [0], [0], [1], [0, 0, 1, 1], [], []>} : vector<8x32xf32>, vector<32x32xf32>, vector<8x32xf32> -> vector<8x32xf32>
    %c1_116 = arith.constant 1 : index
    %c0_117 = arith.constant 0 : index
    %c0_118 = arith.constant 0 : index
    %87 = vector.load %arg25[%c1_116, %c0_117, %c0_118] : memref<2x32x32xf32, #tpu.memory_space<vmem>>, vector<1x32x32xf32>
    %88 = vector.shape_cast %87 : vector<1x32x32xf32> to vector<32x32xf32>
    %cst_119 = arith.constant dense<0.000000e+00> : vector<8x32xf32>
    %89 = tpu.matmul %83, %88, %cst_119 {dimension_numbers = #tpu.dot_dimension_numbers<[1], [0], [0], [1], [0, 0, 1, 1], [], []>} : vector<8x32xf32>, vector<32x32xf32>, vector<8x32xf32> -> vector<8x32xf32>
    %c1_120 = arith.constant 1 : index
    %c0_121 = arith.constant 0 : index
    %c0_122 = arith.constant 0 : index
    %90 = vector.load %arg27[%c1_120, %c0_121, %c0_122] : memref<2x1x32xf32, #tpu.memory_space<vmem>>, vector<1x1x32xf32>
    %91 = vector.shape_cast %90 : vector<1x1x32xf32> to vector<1x32xf32>
    %92 = tpu.concatenate %91, %86 in 0 : vector<1x32xf32>, vector<8x32xf32> -> vector<9x32xf32>
    %c48 = arith.constant 48 : index
    %c0_123 = arith.constant 0 : index
    %93 = vector.load %arg38[%c48, %c0_123] : memref<64x32xf32, #tpu.memory_space<vmem>>, vector<9x32xf32>
    tpu.vector_store %arg38[%c48, %c0_123], %92 {strides = array<i32>} : memref<64x32xf32, #tpu.memory_space<vmem>>, vector<9x32xf32>,
    %c1_124 = arith.constant 1 : index
    %c0_125 = arith.constant 0 : index
    %c0_126 = arith.constant 0 : index
    %94 = vector.load %arg28[%c1_124, %c0_125, %c0_126] : memref<2x1x32xf32, #tpu.memory_space<vmem>>, vector<1x1x32xf32>
    %95 = vector.shape_cast %94 : vector<1x1x32xf32> to vector<1x32xf32>
    %96 = tpu.concatenate %95, %89 in 0 : vector<1x32xf32>, vector<8x32xf32> -> vector<9x32xf32>
    %c48_127 = arith.constant 48 : index
    %c0_128 = arith.constant 0 : index
    %97 = vector.load %arg39[%c48_127, %c0_128] : memref<64x32xf32, #tpu.memory_space<vmem>>, vector<9x32xf32>
    tpu.vector_store %arg39[%c48_127, %c0_128], %96 {strides = array<i32>} : memref<64x32xf32, #tpu.memory_space<vmem>>, vector<9x32xf32>,
    %c0_129 = arith.constant 0 : index
    %c0_130 = arith.constant 0 : index
    %98 = vector.load %arg2[%c0_129, %c0_130] : memref<64x17xf32, #tpu.memory_space<vmem>>, vector<1x17xf32>
    %c32_131 = arith.constant 32 : index
    %c0_132 = arith.constant 0 : index
    %99 = vector.load %arg2[%c32_131, %c0_132] : memref<64x17xf32, #tpu.memory_space<vmem>>, vector<1x17xf32>
    %100 = tpu.concatenate %98, %99 in 0 : vector<1x17xf32>, vector<1x17xf32> -> vector<2x17xf32>
    %c0_133 = arith.constant 0 : index
    %101 = memref.load %arg1[%c0_133] : memref<1xi32, #tpu.memory_space<smem>>
    %c1_i32 = arith.constant 1 : i32
    %102 = arith.subi %101, %c1_i32 : i32
    %c6_i32 = arith.constant 6 : i32
    %103 = arith.addi %102, %c6_i32 : i32
    %c0_i32_134 = arith.constant 0 : i32
    %104 = arith.subi %103, %c0_i32_134 : i32
    %105 = arith.addi %c0_i32_134, %104 : i32
    %c1_i32_135 = arith.constant 1 : i32
    %106 = scf.for %arg40 = %c0_i32_134 to %105 step %c1_i32_135 iter_args(%arg41 = %100) -> (vector<2x17xf32>)  : i32 {
      %c0_136 = arith.constant 0 : index
      %c0_137 = arith.constant 0 : index
      %107 = vector.load %arg9[%c0_136, %c0_137] : memref<17x32xf32, #tpu.memory_space<vmem>>, vector<17x32xf32>
      %cst_138 = arith.constant dense<0.000000e+00> : vector<2x32xf32>
      %108 = tpu.matmul %arg41, %107, %cst_138 {dimension_numbers = #tpu.dot_dimension_numbers<[1], [0], [0], [1], [0, 0, 1, 1], [], []>} : vector<2x17xf32>, vector<17x32xf32>, vector<2x32xf32> -> vector<2x32xf32>
      %109 = arith.index_cast %arg40 : i32 to index
      %c0_139 = arith.constant 0 : index
      %110 = vector.load %arg3[%109, %c0_139] : memref<32x32xf32, #tpu.memory_space<vmem>>, vector<1x32xf32>
      %111 = arith.index_cast %arg40 : i32 to index
      %c0_140 = arith.constant 0 : index
      %112 = vector.load %arg4[%111, %c0_140] : memref<32x32xf32, #tpu.memory_space<vmem>>, vector<1x32xf32>
      %c0_141 = arith.constant 0 : index
      %c0_142 = arith.constant 0 : index
      %113 = vector.load %arg5[%c0_141, %c0_142] : memref<32x32xf32, #tpu.memory_space<vmem>>, vector<32x32xf32>
      %c0_143 = arith.constant 0 : index
      %c0_144 = arith.constant 0 : index
      %c0_145 = arith.constant 0 : index
      %114 = vector.load %arg13[%c0_143, %c0_144, %c0_145] : memref<2x1x32xf32, #tpu.memory_space<vmem>>, vector<1x1x32xf32>
      %115 = vector.shape_cast %114 : vector<1x1x32xf32> to vector<1x32xf32>
      %c0_146 = arith.constant 0 : index
      %c0_147 = arith.constant 0 : index
      %c0_148 = arith.constant 0 : index
      %116 = vector.load %arg14[%c0_146, %c0_147, %c0_148] : memref<2x1x32xf32, #tpu.memory_space<vmem>>, vector<1x1x32xf32>
      %117 = vector.shape_cast %116 : vector<1x1x32xf32> to vector<1x32xf32>
      %cst_149 = arith.constant dense<0.000000e+00> : vector<2xf32>
      %118 = vector.multi_reduction <add>, %108, %cst_149 [1] : vector<2x32xf32> to vector<2xf32>
      %119 = vector.shape_cast %118 : vector<2xf32> to vector<2x1xf32>
      %cst_150 = arith.constant 3.200000e+01 : f32
      %120 = vector.broadcast %cst_150 : f32 to vector<2x1xf32>
      %121 = arith.divf %119, %120 : vector<2x1xf32>
      %122 = vector.broadcast %121 : vector<2x1xf32> to vector<2x32xf32>
      %123 = arith.subf %108, %122 : vector<2x32xf32>
      %124 = arith.mulf %123, %123 : vector<2x32xf32>
      %cst_151 = arith.constant dense<0.000000e+00> : vector<2xf32>
      %125 = vector.multi_reduction <add>, %124, %cst_151 [1] : vector<2x32xf32> to vector<2xf32>
      %126 = vector.shape_cast %125 : vector<2xf32> to vector<2x1xf32>
      %cst_152 = arith.constant 3.200000e+01 : f32
      %127 = vector.broadcast %cst_152 : f32 to vector<2x1xf32>
      %128 = arith.divf %126, %127 : vector<2x1xf32>
      %129 = vector.broadcast %121 : vector<2x1xf32> to vector<2x32xf32>
      %130 = arith.subf %108, %129 : vector<2x32xf32>
      %cst_153 = arith.constant 9.99999974E-6 : f32
      %131 = vector.broadcast %cst_153 : f32 to vector<2x1xf32>
      %132 = arith.addf %128, %131 : vector<2x1xf32>
      %133 = math.rsqrt %132 : vector<2x1xf32>
      %134 = vector.broadcast %133 : vector<2x1xf32> to vector<2x32xf32>
      %135 = arith.mulf %130, %134 : vector<2x32xf32>
      %136 = vector.broadcast %115 : vector<1x32xf32> to vector<2x32xf32>
      %137 = arith.mulf %135, %136 : vector<2x32xf32>
      %138 = vector.broadcast %117 : vector<1x32xf32> to vector<2x32xf32>
      %139 = arith.addf %137, %138 : vector<2x32xf32>
      %c0_154 = arith.constant 0 : index
      %c0_155 = arith.constant 0 : index
      %c0_156 = arith.constant 0 : index
      %140 = vector.load %arg15[%c0_154, %c0_155, %c0_156] : memref<2x32x32xf32, #tpu.memory_space<vmem>>, vector<1x32x32xf32>
      %141 = vector.shape_cast %140 : vector<1x32x32xf32> to vector<32x32xf32>
      %cst_157 = arith.constant dense<0.000000e+00> : vector<2x32xf32>
      %142 = tpu.matmul %139, %141, %cst_157 {dimension_numbers = #tpu.dot_dimension_numbers<[1], [0], [0], [1], [0, 0, 1, 1], [], []>} : vector<2x32xf32>, vector<32x32xf32>, vector<2x32xf32> -> vector<2x32xf32>
      %c0_158 = arith.constant 0 : index
      %c0_159 = arith.constant 0 : index
      %c0_160 = arith.constant 0 : index
      %143 = vector.load %arg16[%c0_158, %c0_159, %c0_160] : memref<2x32x32xf32, #tpu.memory_space<vmem>>, vector<1x32x32xf32>
      %144 = vector.shape_cast %143 : vector<1x32x32xf32> to vector<32x32xf32>
      %cst_161 = arith.constant dense<0.000000e+00> : vector<2x32xf32>
      %145 = tpu.matmul %139, %144, %cst_161 {dimension_numbers = #tpu.dot_dimension_numbers<[1], [0], [0], [1], [0, 0, 1, 1], [], []>} : vector<2x32xf32>, vector<32x32xf32>, vector<2x32xf32> -> vector<2x32xf32>
      %c0_162 = arith.constant 0 : index
      %c0_163 = arith.constant 0 : index
      %c0_164 = arith.constant 0 : index
      %146 = vector.load %arg17[%c0_162, %c0_163, %c0_164] : memref<2x32x32xf32, #tpu.memory_space<vmem>>, vector<1x32x32xf32>
      %147 = vector.shape_cast %146 : vector<1x32x32xf32> to vector<32x32xf32>
      %cst_165 = arith.constant dense<0.000000e+00> : vector<2x32xf32>
      %148 = tpu.matmul %139, %147, %cst_165 {dimension_numbers = #tpu.dot_dimension_numbers<[1], [0], [0], [1], [0, 0, 1, 1], [], []>} : vector<2x32xf32>, vector<32x32xf32>, vector<2x32xf32> -> vector<2x32xf32>
      %149 = vector.broadcast %110 : vector<1x32xf32> to vector<2x32xf32>
      %150 = arith.mulf %142, %149 : vector<2x32xf32>
      %cst_166 = arith.constant dense<0.000000e+00> : vector<2x32xf32>
      %151 = tpu.matmul %142, %113, %cst_166 {dimension_numbers = #tpu.dot_dimension_numbers<[1], [0], [0], [1], [0, 0, 1, 1], [], []>} : vector<2x32xf32>, vector<32x32xf32>, vector<2x32xf32> -> vector<2x32xf32>
      %152 = vector.broadcast %112 : vector<1x32xf32> to vector<2x32xf32>
      %153 = arith.mulf %151, %152 : vector<2x32xf32>
      %154 = arith.addf %150, %153 : vector<2x32xf32>
      %155 = vector.broadcast %110 : vector<1x32xf32> to vector<2x32xf32>
      %156 = arith.mulf %145, %155 : vector<2x32xf32>
      %cst_167 = arith.constant dense<0.000000e+00> : vector<2x32xf32>
      %157 = tpu.matmul %145, %113, %cst_167 {dimension_numbers = #tpu.dot_dimension_numbers<[1], [0], [0], [1], [0, 0, 1, 1], [], []>} : vector<2x32xf32>, vector<32x32xf32>, vector<2x32xf32> -> vector<2x32xf32>
      %158 = vector.broadcast %112 : vector<1x32xf32> to vector<2x32xf32>
      %159 = arith.mulf %157, %158 : vector<2x32xf32>
      %160 = arith.addf %156, %159 : vector<2x32xf32>
      %161 = vector.extract_strided_slice %160 {offsets = [0, 0], sizes = [1, 32], strides = [1, 1]} : vector<2x32xf32> to vector<1x32xf32>
      %c1_i32_168 = arith.constant 1 : i32
      %162 = arith.addi %c1_i32_168, %arg40 : i32
      %163 = arith.index_cast %162 : i32 to index
      %c0_169 = arith.constant 0 : index
      %164 = vector.load %arg36[%163, %c0_169] : memref<160x32xf32, #tpu.memory_space<vmem>>, vector<1x32xf32>
      tpu.vector_store %arg36[%163, %c0_169], %161 {strides = array<i32>} : memref<160x32xf32, #tpu.memory_space<vmem>>, vector<1x32xf32>,
      %165 = vector.extract_strided_slice %148 {offsets = [0, 0], sizes = [1, 32], strides = [1, 1]} : vector<2x32xf32> to vector<1x32xf32>
      %c1_i32_170 = arith.constant 1 : i32
      %166 = arith.addi %c1_i32_170, %arg40 : i32
      %167 = arith.index_cast %166 : i32 to index
      %c0_171 = arith.constant 0 : index
      %168 = vector.load %arg37[%167, %c0_171] : memref<160x32xf32, #tpu.memory_space<vmem>>, vector<1x32xf32>
      tpu.vector_store %arg37[%167, %c0_171], %165 {strides = array<i32>} : memref<160x32xf32, #tpu.memory_space<vmem>>, vector<1x32xf32>,
      %169 = vector.extract_strided_slice %154 {offsets = [0, 0], sizes = [1, 32], strides = [1, 1]} : vector<2x32xf32> to vector<1x32xf32>
      %c1_i32_172 = arith.constant 1 : i32
      %170 = arith.addi %c1_i32_172, %arg40 : i32
      %c0_173 = arith.constant 0 : index
      %c0_174 = arith.constant 0 : index
      %171 = vector.load %arg36[%c0_173, %c0_174] : memref<160x32xf32, #tpu.memory_space<vmem>>, vector<33x32xf32>
      %c0_175 = arith.constant 0 : index
      %c0_176 = arith.constant 0 : index
      %172 = vector.load %arg37[%c0_175, %c0_176] : memref<160x32xf32, #tpu.memory_space<vmem>>, vector<33x32xf32>
      %173 = vector.broadcast %169 : vector<1x32xf32> to vector<33x32xf32>
      %174 = arith.mulf %171, %173 : vector<33x32xf32>
      %c0_177 = arith.constant 0 : index
      %c0_178 = arith.constant 0 : index
      %175 = vector.load %arg6[%c0_177, %c0_178] : memref<32x2xf32, #tpu.memory_space<vmem>>, vector<32x2xf32>
      %cst_179 = arith.constant dense<0.000000e+00> : vector<33x2xf32>
      %176 = tpu.matmul %174, %175, %cst_179 {dimension_numbers = #tpu.dot_dimension_numbers<[1], [0], [0], [1], [0, 0, 1, 1], [], []>} : vector<33x32xf32>, vector<32x2xf32>, vector<33x2xf32> -> vector<33x2xf32>
      %cst_180 = arith.constant 2.500000e-01 : f32
      %177 = vector.broadcast %cst_180 : f32 to vector<33x2xf32>
      %178 = arith.mulf %176, %177 : vector<33x2xf32>
      %179 = tpu.iota {dimensions = array<i32: 0>} : vector<33x2xi32>
      %180 = vector.broadcast %170 : i32 to vector<33x2xi32>
      %181 = arith.cmpi sle, %179, %180 : vector<33x2xi32>
      %cst_181 = arith.constant -1.000000e+30 : f32
      %182 = vector.broadcast %cst_181 : f32 to vector<33x2xf32>
      %183 = arith.select %181, %178, %182 : vector<33x2xi1>, vector<33x2xf32>
      %cst_182 = arith.constant dense<0xFF800000> : vector<2xf32>
      %184 = vector.multi_reduction <maximumf>, %183, %cst_182 [0] : vector<33x2xf32> to vector<2xf32>
      %185 = vector.shape_cast %184 : vector<2xf32> to vector<1x2xf32>
      %186 = vector.broadcast %185 : vector<1x2xf32> to vector<33x2xf32>
      %187 = arith.subf %183, %186 : vector<33x2xf32>
      %188 = math.exp %187 : vector<33x2xf32>
      %cst_183 = arith.constant dense<0.000000e+00> : vector<2xf32>
      %189 = vector.multi_reduction <add>, %188, %cst_183 [0] : vector<33x2xf32> to vector<2xf32>
      %190 = vector.shape_cast %189 : vector<2xf32> to vector<1x2xf32>
      %191 = vector.broadcast %190 : vector<1x2xf32> to vector<33x2xf32>
      %192 = arith.divf %188, %191 : vector<33x2xf32>
      %c0_184 = arith.constant 0 : index
      %c0_185 = arith.constant 0 : index
      %193 = vector.load %arg7[%c0_184, %c0_185] : memref<2x32xf32, #tpu.memory_space<vmem>>, vector<2x32xf32>
      %cst_186 = arith.constant dense<0.000000e+00> : vector<33x32xf32>
      %194 = tpu.matmul %192, %193, %cst_186 {dimension_numbers = #tpu.dot_dimension_numbers<[1], [0], [0], [1], [0, 0, 1, 1], [], []>} : vector<33x2xf32>, vector<2x32xf32>, vector<33x32xf32> -> vector<33x32xf32>
      %195 = arith.mulf %194, %172 : vector<33x32xf32>
      %cst_187 = arith.constant dense<0.000000e+00> : vector<32xf32>
      %196 = vector.multi_reduction <add>, %195, %cst_187 [0] : vector<33x32xf32> to vector<32xf32>
      %197 = vector.shape_cast %196 : vector<32xf32> to vector<1x32xf32>
      %198 = vector.extract_strided_slice %160 {offsets = [1, 0], sizes = [1, 32], strides = [1, 1]} : vector<2x32xf32> to vector<1x32xf32>
      %c41_i32 = arith.constant 41 : i32
      %199 = arith.addi %c41_i32, %arg40 : i32
      %200 = arith.index_cast %199 : i32 to index
      %c0_188 = arith.constant 0 : index
      %201 = vector.load %arg36[%200, %c0_188] : memref<160x32xf32, #tpu.memory_space<vmem>>, vector<1x32xf32>
      tpu.vector_store %arg36[%200, %c0_188], %198 {strides = array<i32>} : memref<160x32xf32, #tpu.memory_space<vmem>>, vector<1x32xf32>,
      %202 = vector.extract_strided_slice %148 {offsets = [1, 0], sizes = [1, 32], strides = [1, 1]} : vector<2x32xf32> to vector<1x32xf32>
      %c41_i32_189 = arith.constant 41 : i32
      %203 = arith.addi %c41_i32_189, %arg40 : i32
      %204 = arith.index_cast %203 : i32 to index
      %c0_190 = arith.constant 0 : index
      %205 = vector.load %arg37[%204, %c0_190] : memref<160x32xf32, #tpu.memory_space<vmem>>, vector<1x32xf32>
      tpu.vector_store %arg37[%204, %c0_190], %202 {strides = array<i32>} : memref<160x32xf32, #tpu.memory_space<vmem>>, vector<1x32xf32>,
      %206 = vector.extract_strided_slice %154 {offsets = [1, 0], sizes = [1, 32], strides = [1, 1]} : vector<2x32xf32> to vector<1x32xf32>
      %c1_i32_191 = arith.constant 1 : i32
      %207 = arith.addi %c1_i32_191, %arg40 : i32
      %c40_192 = arith.constant 40 : index
      %c0_193 = arith.constant 0 : index
      %208 = vector.load %arg36[%c40_192, %c0_193] : memref<160x32xf32, #tpu.memory_space<vmem>>, vector<33x32xf32>
      %c40_194 = arith.constant 40 : index
      %c0_195 = arith.constant 0 : index
      %209 = vector.load %arg37[%c40_194, %c0_195] : memref<160x32xf32, #tpu.memory_space<vmem>>, vector<33x32xf32>
      %210 = vector.broadcast %206 : vector<1x32xf32> to vector<33x32xf32>
      %211 = arith.mulf %208, %210 : vector<33x32xf32>
      %c0_196 = arith.constant 0 : index
      %c0_197 = arith.constant 0 : index
      %212 = vector.load %arg6[%c0_196, %c0_197] : memref<32x2xf32, #tpu.memory_space<vmem>>, vector<32x2xf32>
      %cst_198 = arith.constant dense<0.000000e+00> : vector<33x2xf32>
      %213 = tpu.matmul %211, %212, %cst_198 {dimension_numbers = #tpu.dot_dimension_numbers<[1], [0], [0], [1], [0, 0, 1, 1], [], []>} : vector<33x32xf32>, vector<32x2xf32>, vector<33x2xf32> -> vector<33x2xf32>
      %cst_199 = arith.constant 2.500000e-01 : f32
      %214 = vector.broadcast %cst_199 : f32 to vector<33x2xf32>
      %215 = arith.mulf %213, %214 : vector<33x2xf32>
      %216 = tpu.iota {dimensions = array<i32: 0>} : vector<33x2xi32>
      %217 = vector.broadcast %207 : i32 to vector<33x2xi32>
      %218 = arith.cmpi sle, %216, %217 : vector<33x2xi32>
      %cst_200 = arith.constant -1.000000e+30 : f32
      %219 = vector.broadcast %cst_200 : f32 to vector<33x2xf32>
      %220 = arith.select %218, %215, %219 : vector<33x2xi1>, vector<33x2xf32>
      %cst_201 = arith.constant dense<0xFF800000> : vector<2xf32>
      %221 = vector.multi_reduction <maximumf>, %220, %cst_201 [0] : vector<33x2xf32> to vector<2xf32>
      %222 = vector.shape_cast %221 : vector<2xf32> to vector<1x2xf32>
      %223 = vector.broadcast %222 : vector<1x2xf32> to vector<33x2xf32>
      %224 = arith.subf %220, %223 : vector<33x2xf32>
      %225 = math.exp %224 : vector<33x2xf32>
      %cst_202 = arith.constant dense<0.000000e+00> : vector<2xf32>
      %226 = vector.multi_reduction <add>, %225, %cst_202 [0] : vector<33x2xf32> to vector<2xf32>
      %227 = vector.shape_cast %226 : vector<2xf32> to vector<1x2xf32>
      %228 = vector.broadcast %227 : vector<1x2xf32> to vector<33x2xf32>
      %229 = arith.divf %225, %228 : vector<33x2xf32>
      %c0_203 = arith.constant 0 : index
      %c0_204 = arith.constant 0 : index
      %230 = vector.load %arg7[%c0_203, %c0_204] : memref<2x32xf32, #tpu.memory_space<vmem>>, vector<2x32xf32>
      %cst_205 = arith.constant dense<0.000000e+00> : vector<33x32xf32>
      %231 = tpu.matmul %229, %230, %cst_205 {dimension_numbers = #tpu.dot_dimension_numbers<[1], [0], [0], [1], [0, 0, 1, 1], [], []>} : vector<33x2xf32>, vector<2x32xf32>, vector<33x32xf32> -> vector<33x32xf32>
      %232 = arith.mulf %231, %209 : vector<33x32xf32>
      %cst_206 = arith.constant dense<0.000000e+00> : vector<32xf32>
      %233 = vector.multi_reduction <add>, %232, %cst_206 [0] : vector<33x32xf32> to vector<32xf32>
      %234 = vector.shape_cast %233 : vector<32xf32> to vector<1x32xf32>
      %235 = tpu.concatenate %197, %234 in 0 : vector<1x32xf32>, vector<1x32xf32> -> vector<2x32xf32>
      %c0_207 = arith.constant 0 : index
      %c0_208 = arith.constant 0 : index
      %c0_209 = arith.constant 0 : index
      %236 = vector.load %arg18[%c0_207, %c0_208, %c0_209] : memref<2x32x32xf32, #tpu.memory_space<vmem>>, vector<1x32x32xf32>
      %237 = vector.shape_cast %236 : vector<1x32x32xf32> to vector<32x32xf32>
      %cst_210 = arith.constant dense<0.000000e+00> : vector<2x32xf32>
      %238 = tpu.matmul %235, %237, %cst_210 {dimension_numbers = #tpu.dot_dimension_numbers<[1], [0], [0], [1], [0, 0, 1, 1], [], []>} : vector<2x32xf32>, vector<32x32xf32>, vector<2x32xf32> -> vector<2x32xf32>
      %239 = arith.addf %108, %238 : vector<2x32xf32>
      %c0_211 = arith.constant 0 : index
      %c0_212 = arith.constant 0 : index
      %c0_213 = arith.constant 0 : index
      %240 = vector.load %arg21[%c0_211, %c0_212, %c0_213] : memref<2x1x32xf32, #tpu.memory_space<vmem>>, vector<1x1x32xf32>
      %241 = vector.shape_cast %240 : vector<1x1x32xf32> to vector<1x32xf32>
      %c0_214 = arith.constant 0 : index
      %c0_215 = arith.constant 0 : index
      %c0_216 = arith.constant 0 : index
      %242 = vector.load %arg22[%c0_214, %c0_215, %c0_216] : memref<2x1x32xf32, #tpu.memory_space<vmem>>, vector<1x1x32xf32>
      %243 = vector.shape_cast %242 : vector<1x1x32xf32> to vector<1x32xf32>
      %cst_217 = arith.constant dense<0.000000e+00> : vector<2xf32>
      %244 = vector.multi_reduction <add>, %239, %cst_217 [1] : vector<2x32xf32> to vector<2xf32>
      %245 = vector.shape_cast %244 : vector<2xf32> to vector<2x1xf32>
      %cst_218 = arith.constant 3.200000e+01 : f32
      %246 = vector.broadcast %cst_218 : f32 to vector<2x1xf32>
      %247 = arith.divf %245, %246 : vector<2x1xf32>
      %248 = vector.broadcast %247 : vector<2x1xf32> to vector<2x32xf32>
      %249 = arith.subf %239, %248 : vector<2x32xf32>
      %250 = arith.mulf %249, %249 : vector<2x32xf32>
      %cst_219 = arith.constant dense<0.000000e+00> : vector<2xf32>
      %251 = vector.multi_reduction <add>, %250, %cst_219 [1] : vector<2x32xf32> to vector<2xf32>
      %252 = vector.shape_cast %251 : vector<2xf32> to vector<2x1xf32>
      %cst_220 = arith.constant 3.200000e+01 : f32
      %253 = vector.broadcast %cst_220 : f32 to vector<2x1xf32>
      %254 = arith.divf %252, %253 : vector<2x1xf32>
      %255 = vector.broadcast %247 : vector<2x1xf32> to vector<2x32xf32>
      %256 = arith.subf %239, %255 : vector<2x32xf32>
      %cst_221 = arith.constant 9.99999974E-6 : f32
      %257 = vector.broadcast %cst_221 : f32 to vector<2x1xf32>
      %258 = arith.addf %254, %257 : vector<2x1xf32>
      %259 = math.rsqrt %258 : vector<2x1xf32>
      %260 = vector.broadcast %259 : vector<2x1xf32> to vector<2x32xf32>
      %261 = arith.mulf %256, %260 : vector<2x32xf32>
      %262 = vector.broadcast %241 : vector<1x32xf32> to vector<2x32xf32>
      %263 = arith.mulf %261, %262 : vector<2x32xf32>
      %264 = vector.broadcast %243 : vector<1x32xf32> to vector<2x32xf32>
      %265 = arith.addf %263, %264 : vector<2x32xf32>
      %c0_222 = arith.constant 0 : index
      %c0_223 = arith.constant 0 : index
      %c0_224 = arith.constant 0 : index
      %266 = vector.load %arg23[%c0_222, %c0_223, %c0_224] : memref<2x32x32xf32, #tpu.memory_space<vmem>>, vector<1x32x32xf32>
      %267 = vector.shape_cast %266 : vector<1x32x32xf32> to vector<32x32xf32>
      %cst_225 = arith.constant dense<0.000000e+00> : vector<2x32xf32>
      %268 = tpu.matmul %265, %267, %cst_225 {dimension_numbers = #tpu.dot_dimension_numbers<[1], [0], [0], [1], [0, 0, 1, 1], [], []>} : vector<2x32xf32>, vector<32x32xf32>, vector<2x32xf32> -> vector<2x32xf32>
      %269 = vector.extract_strided_slice %268 {offsets = [0, 0], sizes = [1, 32], strides = [1, 1]} : vector<2x32xf32> to vector<1x32xf32>
      %c0_226 = arith.constant 0 : index
      %c0_227 = arith.constant 0 : index
      %270 = vector.load %arg38[%c0_226, %c0_227] : memref<64x32xf32, #tpu.memory_space<vmem>>, vector<9x32xf32>
      %c0_228 = arith.constant 0 : index
      %c0_229 = arith.constant 0 : index
      %271 = vector.load %arg39[%c0_228, %c0_229] : memref<64x32xf32, #tpu.memory_space<vmem>>, vector<9x32xf32>
      %272 = vector.broadcast %269 : vector<1x32xf32> to vector<9x32xf32>
      %273 = arith.mulf %270, %272 : vector<9x32xf32>
      %c0_230 = arith.constant 0 : index
      %c0_231 = arith.constant 0 : index
      %274 = vector.load %arg6[%c0_230, %c0_231] : memref<32x2xf32, #tpu.memory_space<vmem>>, vector<32x2xf32>
      %cst_232 = arith.constant dense<0.000000e+00> : vector<9x2xf32>
      %275 = tpu.matmul %273, %274, %cst_232 {dimension_numbers = #tpu.dot_dimension_numbers<[1], [0], [0], [1], [0, 0, 1, 1], [], []>} : vector<9x32xf32>, vector<32x2xf32>, vector<9x2xf32> -> vector<9x2xf32>
      %cst_233 = arith.constant 2.500000e-01 : f32
      %276 = vector.broadcast %cst_233 : f32 to vector<9x2xf32>
      %277 = arith.mulf %275, %276 : vector<9x2xf32>
      %cst_234 = arith.constant dense<0xFF800000> : vector<2xf32>
      %278 = vector.multi_reduction <maximumf>, %277, %cst_234 [0] : vector<9x2xf32> to vector<2xf32>
      %279 = vector.shape_cast %278 : vector<2xf32> to vector<1x2xf32>
      %280 = vector.broadcast %279 : vector<1x2xf32> to vector<9x2xf32>
      %281 = arith.subf %277, %280 : vector<9x2xf32>
      %282 = math.exp %281 : vector<9x2xf32>
      %cst_235 = arith.constant dense<0.000000e+00> : vector<2xf32>
      %283 = vector.multi_reduction <add>, %282, %cst_235 [0] : vector<9x2xf32> to vector<2xf32>
      %284 = vector.shape_cast %283 : vector<2xf32> to vector<1x2xf32>
      %285 = vector.broadcast %284 : vector<1x2xf32> to vector<9x2xf32>
      %286 = arith.divf %282, %285 : vector<9x2xf32>
      %c0_236 = arith.constant 0 : index
      %c0_237 = arith.constant 0 : index
      %287 = vector.load %arg7[%c0_236, %c0_237] : memref<2x32xf32, #tpu.memory_space<vmem>>, vector<2x32xf32>
      %cst_238 = arith.constant dense<0.000000e+00> : vector<9x32xf32>
      %288 = tpu.matmul %286, %287, %cst_238 {dimension_numbers = #tpu.dot_dimension_numbers<[1], [0], [0], [1], [0, 0, 1, 1], [], []>} : vector<9x2xf32>, vector<2x32xf32>, vector<9x32xf32> -> vector<9x32xf32>
      %289 = arith.mulf %288, %271 : vector<9x32xf32>
      %cst_239 = arith.constant dense<0.000000e+00> : vector<32xf32>
      %290 = vector.multi_reduction <add>, %289, %cst_239 [0] : vector<9x32xf32> to vector<32xf32>
      %291 = vector.shape_cast %290 : vector<32xf32> to vector<1x32xf32>
      %292 = vector.extract_strided_slice %268 {offsets = [1, 0], sizes = [1, 32], strides = [1, 1]} : vector<2x32xf32> to vector<1x32xf32>
      %c16_240 = arith.constant 16 : index
      %c0_241 = arith.constant 0 : index
      %293 = vector.load %arg38[%c16_240, %c0_241] : memref<64x32xf32, #tpu.memory_space<vmem>>, vector<9x32xf32>
      %c16_242 = arith.constant 16 : index
      %c0_243 = arith.constant 0 : index
      %294 = vector.load %arg39[%c16_242, %c0_243] : memref<64x32xf32, #tpu.memory_space<vmem>>, vector<9x32xf32>
      %295 = vector.broadcast %292 : vector<1x32xf32> to vector<9x32xf32>
      %296 = arith.mulf %293, %295 : vector<9x32xf32>
      %c0_244 = arith.constant 0 : index
      %c0_245 = arith.constant 0 : index
      %297 = vector.load %arg6[%c0_244, %c0_245] : memref<32x2xf32, #tpu.memory_space<vmem>>, vector<32x2xf32>
      %cst_246 = arith.constant dense<0.000000e+00> : vector<9x2xf32>
      %298 = tpu.matmul %296, %297, %cst_246 {dimension_numbers = #tpu.dot_dimension_numbers<[1], [0], [0], [1], [0, 0, 1, 1], [], []>} : vector<9x32xf32>, vector<32x2xf32>, vector<9x2xf32> -> vector<9x2xf32>
      %cst_247 = arith.constant 2.500000e-01 : f32
      %299 = vector.broadcast %cst_247 : f32 to vector<9x2xf32>
      %300 = arith.mulf %298, %299 : vector<9x2xf32>
      %cst_248 = arith.constant dense<0xFF800000> : vector<2xf32>
      %301 = vector.multi_reduction <maximumf>, %300, %cst_248 [0] : vector<9x2xf32> to vector<2xf32>
      %302 = vector.shape_cast %301 : vector<2xf32> to vector<1x2xf32>
      %303 = vector.broadcast %302 : vector<1x2xf32> to vector<9x2xf32>
      %304 = arith.subf %300, %303 : vector<9x2xf32>
      %305 = math.exp %304 : vector<9x2xf32>
      %cst_249 = arith.constant dense<0.000000e+00> : vector<2xf32>
      %306 = vector.multi_reduction <add>, %305, %cst_249 [0] : vector<9x2xf32> to vector<2xf32>
      %307 = vector.shape_cast %306 : vector<2xf32> to vector<1x2xf32>
      %308 = vector.broadcast %307 : vector<1x2xf32> to vector<9x2xf32>
      %309 = arith.divf %305, %308 : vector<9x2xf32>
      %c0_250 = arith.constant 0 : index
      %c0_251 = arith.constant 0 : index
      %310 = vector.load %arg7[%c0_250, %c0_251] : memref<2x32xf32, #tpu.memory_space<vmem>>, vector<2x32xf32>
      %cst_252 = arith.constant dense<0.000000e+00> : vector<9x32xf32>
      %311 = tpu.matmul %309, %310, %cst_252 {dimension_numbers = #tpu.dot_dimension_numbers<[1], [0], [0], [1], [0, 0, 1, 1], [], []>} : vector<9x2xf32>, vector<2x32xf32>, vector<9x32xf32> -> vector<9x32xf32>
      %312 = arith.mulf %311, %294 : vector<9x32xf32>
      %cst_253 = arith.constant dense<0.000000e+00> : vector<32xf32>
      %313 = vector.multi_reduction <add>, %312, %cst_253 [0] : vector<9x32xf32> to vector<32xf32>
      %314 = vector.shape_cast %313 : vector<32xf32> to vector<1x32xf32>
      %315 = tpu.concatenate %291, %314 in 0 : vector<1x32xf32>, vector<1x32xf32> -> vector<2x32xf32>
      %c0_254 = arith.constant 0 : index
      %c0_255 = arith.constant 0 : index
      %c0_256 = arith.constant 0 : index
      %316 = vector.load %arg26[%c0_254, %c0_255, %c0_256] : memref<2x32x32xf32, #tpu.memory_space<vmem>>, vector<1x32x32xf32>
      %317 = vector.shape_cast %316 : vector<1x32x32xf32> to vector<32x32xf32>
      %cst_257 = arith.constant dense<0.000000e+00> : vector<2x32xf32>
      %318 = tpu.matmul %315, %317, %cst_257 {dimension_numbers = #tpu.dot_dimension_numbers<[1], [0], [0], [1], [0, 0, 1, 1], [], []>} : vector<2x32xf32>, vector<32x32xf32>, vector<2x32xf32> -> vector<2x32xf32>
      %319 = arith.addf %239, %318 : vector<2x32xf32>
      %c0_258 = arith.constant 0 : index
      %c0_259 = arith.constant 0 : index
      %c0_260 = arith.constant 0 : index
      %320 = vector.load %arg29[%c0_258, %c0_259, %c0_260] : memref<2x1x32xf32, #tpu.memory_space<vmem>>, vector<1x1x32xf32>
      %321 = vector.shape_cast %320 : vector<1x1x32xf32> to vector<1x32xf32>
      %c0_261 = arith.constant 0 : index
      %c0_262 = arith.constant 0 : index
      %c0_263 = arith.constant 0 : index
      %322 = vector.load %arg30[%c0_261, %c0_262, %c0_263] : memref<2x1x32xf32, #tpu.memory_space<vmem>>, vector<1x1x32xf32>
      %323 = vector.shape_cast %322 : vector<1x1x32xf32> to vector<1x32xf32>
      %cst_264 = arith.constant dense<0.000000e+00> : vector<2xf32>
      %324 = vector.multi_reduction <add>, %319, %cst_264 [1] : vector<2x32xf32> to vector<2xf32>
      %325 = vector.shape_cast %324 : vector<2xf32> to vector<2x1xf32>
      %cst_265 = arith.constant 3.200000e+01 : f32
      %326 = vector.broadcast %cst_265 : f32 to vector<2x1xf32>
      %327 = arith.divf %325, %326 : vector<2x1xf32>
      %328 = vector.broadcast %327 : vector<2x1xf32> to vector<2x32xf32>
      %329 = arith.subf %319, %328 : vector<2x32xf32>
      %330 = arith.mulf %329, %329 : vector<2x32xf32>
      %cst_266 = arith.constant dense<0.000000e+00> : vector<2xf32>
      %331 = vector.multi_reduction <add>, %330, %cst_266 [1] : vector<2x32xf32> to vector<2xf32>
      %332 = vector.shape_cast %331 : vector<2xf32> to vector<2x1xf32>
      %cst_267 = arith.constant 3.200000e+01 : f32
      %333 = vector.broadcast %cst_267 : f32 to vector<2x1xf32>
      %334 = arith.divf %332, %333 : vector<2x1xf32>
      %335 = vector.broadcast %327 : vector<2x1xf32> to vector<2x32xf32>
      %336 = arith.subf %319, %335 : vector<2x32xf32>
      %cst_268 = arith.constant 9.99999974E-6 : f32
      %337 = vector.broadcast %cst_268 : f32 to vector<2x1xf32>
      %338 = arith.addf %334, %337 : vector<2x1xf32>
      %339 = math.rsqrt %338 : vector<2x1xf32>
      %340 = vector.broadcast %339 : vector<2x1xf32> to vector<2x32xf32>
      %341 = arith.mulf %336, %340 : vector<2x32xf32>
      %342 = vector.broadcast %321 : vector<1x32xf32> to vector<2x32xf32>
      %343 = arith.mulf %341, %342 : vector<2x32xf32>
      %344 = vector.broadcast %323 : vector<1x32xf32> to vector<2x32xf32>
      %345 = arith.addf %343, %344 : vector<2x32xf32>
      %c0_269 = arith.constant 0 : index
      %c0_270 = arith.constant 0 : index
      %c0_271 = arith.constant 0 : index
      %346 = vector.load %arg31[%c0_269, %c0_270, %c0_271] : memref<2x32x128xf32, #tpu.memory_space<vmem>>, vector<1x32x128xf32>
      %347 = vector.shape_cast %346 : vector<1x32x128xf32> to vector<32x128xf32>
      %cst_272 = arith.constant dense<0.000000e+00> : vector<2x128xf32>
      %348 = tpu.matmul %345, %347, %cst_272 {dimension_numbers = #tpu.dot_dimension_numbers<[1], [0], [0], [1], [0, 0, 1, 1], [], []>} : vector<2x32xf32>, vector<32x128xf32>, vector<2x128xf32> -> vector<2x128xf32>
      %c0_273 = arith.constant 0 : index
      %c0_274 = arith.constant 0 : index
      %c0_275 = arith.constant 0 : index
      %349 = vector.load %arg32[%c0_273, %c0_274, %c0_275] : memref<2x1x128xf32, #tpu.memory_space<vmem>>, vector<1x1x128xf32>
      %350 = vector.shape_cast %349 : vector<1x1x128xf32> to vector<1x128xf32>
      %351 = vector.broadcast %350 : vector<1x128xf32> to vector<2x128xf32>
      %352 = arith.addf %348, %351 : vector<2x128xf32>
      %353 = arith.mulf %352, %352 : vector<2x128xf32>
      %354 = arith.mulf %352, %353 : vector<2x128xf32>
      %cst_276 = arith.constant 4.471500e-02 : f32
      %355 = vector.broadcast %cst_276 : f32 to vector<2x128xf32>
      %356 = arith.mulf %355, %354 : vector<2x128xf32>
      %357 = arith.addf %352, %356 : vector<2x128xf32>
      %cst_277 = arith.constant 0.797884583 : f32
      %358 = vector.broadcast %cst_277 : f32 to vector<2x128xf32>
      %359 = arith.mulf %358, %357 : vector<2x128xf32>
      %360 = math.tanh %359 : vector<2x128xf32>
      %cst_278 = arith.constant 1.000000e+00 : f32
      %361 = vector.broadcast %cst_278 : f32 to vector<2x128xf32>
      %362 = arith.addf %361, %360 : vector<2x128xf32>
      %cst_279 = arith.constant 5.000000e-01 : f32
      %363 = vector.broadcast %cst_279 : f32 to vector<2x128xf32>
      %364 = arith.mulf %363, %362 : vector<2x128xf32>
      %365 = arith.mulf %352, %364 : vector<2x128xf32>
      %c0_280 = arith.constant 0 : index
      %c0_281 = arith.constant 0 : index
      %c0_282 = arith.constant 0 : index
      %366 = vector.load %arg33[%c0_280, %c0_281, %c0_282] : memref<2x128x32xf32, #tpu.memory_space<vmem>>, vector<1x128x32xf32>
      %367 = vector.shape_cast %366 : vector<1x128x32xf32> to vector<128x32xf32>
      %cst_283 = arith.constant dense<0.000000e+00> : vector<2x32xf32>
      %368 = tpu.matmul %365, %367, %cst_283 {dimension_numbers = #tpu.dot_dimension_numbers<[1], [0], [0], [1], [0, 0, 1, 1], [], []>} : vector<2x128xf32>, vector<128x32xf32>, vector<2x32xf32> -> vector<2x32xf32>
      %369 = arith.addf %319, %368 : vector<2x32xf32>
      %c0_284 = arith.constant 0 : index
      %c0_285 = arith.constant 0 : index
      %c0_286 = arith.constant 0 : index
      %370 = vector.load %arg34[%c0_284, %c0_285, %c0_286] : memref<2x1x32xf32, #tpu.memory_space<vmem>>, vector<1x1x32xf32>
      %371 = vector.shape_cast %370 : vector<1x1x32xf32> to vector<1x32xf32>
      %372 = vector.broadcast %371 : vector<1x32xf32> to vector<2x32xf32>
      %373 = arith.addf %369, %372 : vector<2x32xf32>
      %c1_287 = arith.constant 1 : index
      %c0_288 = arith.constant 0 : index
      %c0_289 = arith.constant 0 : index
      %374 = vector.load %arg13[%c1_287, %c0_288, %c0_289] : memref<2x1x32xf32, #tpu.memory_space<vmem>>, vector<1x1x32xf32>
      %375 = vector.shape_cast %374 : vector<1x1x32xf32> to vector<1x32xf32>
      %c1_290 = arith.constant 1 : index
      %c0_291 = arith.constant 0 : index
      %c0_292 = arith.constant 0 : index
      %376 = vector.load %arg14[%c1_290, %c0_291, %c0_292] : memref<2x1x32xf32, #tpu.memory_space<vmem>>, vector<1x1x32xf32>
      %377 = vector.shape_cast %376 : vector<1x1x32xf32> to vector<1x32xf32>
      %cst_293 = arith.constant dense<0.000000e+00> : vector<2xf32>
      %378 = vector.multi_reduction <add>, %373, %cst_293 [1] : vector<2x32xf32> to vector<2xf32>
      %379 = vector.shape_cast %378 : vector<2xf32> to vector<2x1xf32>
      %cst_294 = arith.constant 3.200000e+01 : f32
      %380 = vector.broadcast %cst_294 : f32 to vector<2x1xf32>
      %381 = arith.divf %379, %380 : vector<2x1xf32>
      %382 = vector.broadcast %381 : vector<2x1xf32> to vector<2x32xf32>
      %383 = arith.subf %373, %382 : vector<2x32xf32>
      %384 = arith.mulf %383, %383 : vector<2x32xf32>
      %cst_295 = arith.constant dense<0.000000e+00> : vector<2xf32>
      %385 = vector.multi_reduction <add>, %384, %cst_295 [1] : vector<2x32xf32> to vector<2xf32>
      %386 = vector.shape_cast %385 : vector<2xf32> to vector<2x1xf32>
      %cst_296 = arith.constant 3.200000e+01 : f32
      %387 = vector.broadcast %cst_296 : f32 to vector<2x1xf32>
      %388 = arith.divf %386, %387 : vector<2x1xf32>
      %389 = vector.broadcast %381 : vector<2x1xf32> to vector<2x32xf32>
      %390 = arith.subf %373, %389 : vector<2x32xf32>
      %cst_297 = arith.constant 9.99999974E-6 : f32
      %391 = vector.broadcast %cst_297 : f32 to vector<2x1xf32>
      %392 = arith.addf %388, %391 : vector<2x1xf32>
      %393 = math.rsqrt %392 : vector<2x1xf32>
      %394 = vector.broadcast %393 : vector<2x1xf32> to vector<2x32xf32>
      %395 = arith.mulf %390, %394 : vector<2x32xf32>
      %396 = vector.broadcast %375 : vector<1x32xf32> to vector<2x32xf32>
      %397 = arith.mulf %395, %396 : vector<2x32xf32>
      %398 = vector.broadcast %377 : vector<1x32xf32> to vector<2x32xf32>
      %399 = arith.addf %397, %398 : vector<2x32xf32>
      %c1_298 = arith.constant 1 : index
      %c0_299 = arith.constant 0 : index
      %c0_300 = arith.constant 0 : index
      %400 = vector.load %arg15[%c1_298, %c0_299, %c0_300] : memref<2x32x32xf32, #tpu.memory_space<vmem>>, vector<1x32x32xf32>
      %401 = vector.shape_cast %400 : vector<1x32x32xf32> to vector<32x32xf32>
      %cst_301 = arith.constant dense<0.000000e+00> : vector<2x32xf32>
      %402 = tpu.matmul %399, %401, %cst_301 {dimension_numbers = #tpu.dot_dimension_numbers<[1], [0], [0], [1], [0, 0, 1, 1], [], []>} : vector<2x32xf32>, vector<32x32xf32>, vector<2x32xf32> -> vector<2x32xf32>
      %c1_302 = arith.constant 1 : index
      %c0_303 = arith.constant 0 : index
      %c0_304 = arith.constant 0 : index
      %403 = vector.load %arg16[%c1_302, %c0_303, %c0_304] : memref<2x32x32xf32, #tpu.memory_space<vmem>>, vector<1x32x32xf32>
      %404 = vector.shape_cast %403 : vector<1x32x32xf32> to vector<32x32xf32>
      %cst_305 = arith.constant dense<0.000000e+00> : vector<2x32xf32>
      %405 = tpu.matmul %399, %404, %cst_305 {dimension_numbers = #tpu.dot_dimension_numbers<[1], [0], [0], [1], [0, 0, 1, 1], [], []>} : vector<2x32xf32>, vector<32x32xf32>, vector<2x32xf32> -> vector<2x32xf32>
      %c1_306 = arith.constant 1 : index
      %c0_307 = arith.constant 0 : index
      %c0_308 = arith.constant 0 : index
      %406 = vector.load %arg17[%c1_306, %c0_307, %c0_308] : memref<2x32x32xf32, #tpu.memory_space<vmem>>, vector<1x32x32xf32>
      %407 = vector.shape_cast %406 : vector<1x32x32xf32> to vector<32x32xf32>
      %cst_309 = arith.constant dense<0.000000e+00> : vector<2x32xf32>
      %408 = tpu.matmul %399, %407, %cst_309 {dimension_numbers = #tpu.dot_dimension_numbers<[1], [0], [0], [1], [0, 0, 1, 1], [], []>} : vector<2x32xf32>, vector<32x32xf32>, vector<2x32xf32> -> vector<2x32xf32>
      %409 = vector.broadcast %110 : vector<1x32xf32> to vector<2x32xf32>
      %410 = arith.mulf %402, %409 : vector<2x32xf32>
      %cst_310 = arith.constant dense<0.000000e+00> : vector<2x32xf32>
      %411 = tpu.matmul %402, %113, %cst_310 {dimension_numbers = #tpu.dot_dimension_numbers<[1], [0], [0], [1], [0, 0, 1, 1], [], []>} : vector<2x32xf32>, vector<32x32xf32>, vector<2x32xf32> -> vector<2x32xf32>
      %412 = vector.broadcast %112 : vector<1x32xf32> to vector<2x32xf32>
      %413 = arith.mulf %411, %412 : vector<2x32xf32>
      %414 = arith.addf %410, %413 : vector<2x32xf32>
      %415 = vector.broadcast %110 : vector<1x32xf32> to vector<2x32xf32>
      %416 = arith.mulf %405, %415 : vector<2x32xf32>
      %cst_311 = arith.constant dense<0.000000e+00> : vector<2x32xf32>
      %417 = tpu.matmul %405, %113, %cst_311 {dimension_numbers = #tpu.dot_dimension_numbers<[1], [0], [0], [1], [0, 0, 1, 1], [], []>} : vector<2x32xf32>, vector<32x32xf32>, vector<2x32xf32> -> vector<2x32xf32>
      %418 = vector.broadcast %112 : vector<1x32xf32> to vector<2x32xf32>
      %419 = arith.mulf %417, %418 : vector<2x32xf32>
      %420 = arith.addf %416, %419 : vector<2x32xf32>
      %421 = vector.extract_strided_slice %420 {offsets = [0, 0], sizes = [1, 32], strides = [1, 1]} : vector<2x32xf32> to vector<1x32xf32>
      %c81_i32 = arith.constant 81 : i32
      %422 = arith.addi %c81_i32, %arg40 : i32
      %423 = arith.index_cast %422 : i32 to index
      %c0_312 = arith.constant 0 : index
      %424 = vector.load %arg36[%423, %c0_312] : memref<160x32xf32, #tpu.memory_space<vmem>>, vector<1x32xf32>
      tpu.vector_store %arg36[%423, %c0_312], %421 {strides = array<i32>} : memref<160x32xf32, #tpu.memory_space<vmem>>, vector<1x32xf32>,
      %425 = vector.extract_strided_slice %408 {offsets = [0, 0], sizes = [1, 32], strides = [1, 1]} : vector<2x32xf32> to vector<1x32xf32>
      %c81_i32_313 = arith.constant 81 : i32
      %426 = arith.addi %c81_i32_313, %arg40 : i32
      %427 = arith.index_cast %426 : i32 to index
      %c0_314 = arith.constant 0 : index
      %428 = vector.load %arg37[%427, %c0_314] : memref<160x32xf32, #tpu.memory_space<vmem>>, vector<1x32xf32>
      tpu.vector_store %arg37[%427, %c0_314], %425 {strides = array<i32>} : memref<160x32xf32, #tpu.memory_space<vmem>>, vector<1x32xf32>,
      %429 = vector.extract_strided_slice %414 {offsets = [0, 0], sizes = [1, 32], strides = [1, 1]} : vector<2x32xf32> to vector<1x32xf32>
      %c1_i32_315 = arith.constant 1 : i32
      %430 = arith.addi %c1_i32_315, %arg40 : i32
      %c80_316 = arith.constant 80 : index
      %c0_317 = arith.constant 0 : index
      %431 = vector.load %arg36[%c80_316, %c0_317] : memref<160x32xf32, #tpu.memory_space<vmem>>, vector<33x32xf32>
      %c80_318 = arith.constant 80 : index
      %c0_319 = arith.constant 0 : index
      %432 = vector.load %arg37[%c80_318, %c0_319] : memref<160x32xf32, #tpu.memory_space<vmem>>, vector<33x32xf32>
      %433 = vector.broadcast %429 : vector<1x32xf32> to vector<33x32xf32>
      %434 = arith.mulf %431, %433 : vector<33x32xf32>
      %c0_320 = arith.constant 0 : index
      %c0_321 = arith.constant 0 : index
      %435 = vector.load %arg6[%c0_320, %c0_321] : memref<32x2xf32, #tpu.memory_space<vmem>>, vector<32x2xf32>
      %cst_322 = arith.constant dense<0.000000e+00> : vector<33x2xf32>
      %436 = tpu.matmul %434, %435, %cst_322 {dimension_numbers = #tpu.dot_dimension_numbers<[1], [0], [0], [1], [0, 0, 1, 1], [], []>} : vector<33x32xf32>, vector<32x2xf32>, vector<33x2xf32> -> vector<33x2xf32>
      %cst_323 = arith.constant 2.500000e-01 : f32
      %437 = vector.broadcast %cst_323 : f32 to vector<33x2xf32>
      %438 = arith.mulf %436, %437 : vector<33x2xf32>
      %439 = tpu.iota {dimensions = array<i32: 0>} : vector<33x2xi32>
      %440 = vector.broadcast %430 : i32 to vector<33x2xi32>
      %441 = arith.cmpi sle, %439, %440 : vector<33x2xi32>
      %cst_324 = arith.constant -1.000000e+30 : f32
      %442 = vector.broadcast %cst_324 : f32 to vector<33x2xf32>
      %443 = arith.select %441, %438, %442 : vector<33x2xi1>, vector<33x2xf32>
      %cst_325 = arith.constant dense<0xFF800000> : vector<2xf32>
      %444 = vector.multi_reduction <maximumf>, %443, %cst_325 [0] : vector<33x2xf32> to vector<2xf32>
      %445 = vector.shape_cast %444 : vector<2xf32> to vector<1x2xf32>
      %446 = vector.broadcast %445 : vector<1x2xf32> to vector<33x2xf32>
      %447 = arith.subf %443, %446 : vector<33x2xf32>
      %448 = math.exp %447 : vector<33x2xf32>
      %cst_326 = arith.constant dense<0.000000e+00> : vector<2xf32>
      %449 = vector.multi_reduction <add>, %448, %cst_326 [0] : vector<33x2xf32> to vector<2xf32>
      %450 = vector.shape_cast %449 : vector<2xf32> to vector<1x2xf32>
      %451 = vector.broadcast %450 : vector<1x2xf32> to vector<33x2xf32>
      %452 = arith.divf %448, %451 : vector<33x2xf32>
      %c0_327 = arith.constant 0 : index
      %c0_328 = arith.constant 0 : index
      %453 = vector.load %arg7[%c0_327, %c0_328] : memref<2x32xf32, #tpu.memory_space<vmem>>, vector<2x32xf32>
      %cst_329 = arith.constant dense<0.000000e+00> : vector<33x32xf32>
      %454 = tpu.matmul %452, %453, %cst_329 {dimension_numbers = #tpu.dot_dimension_numbers<[1], [0], [0], [1], [0, 0, 1, 1], [], []>} : vector<33x2xf32>, vector<2x32xf32>, vector<33x32xf32> -> vector<33x32xf32>
      %455 = arith.mulf %454, %432 : vector<33x32xf32>
      %cst_330 = arith.constant dense<0.000000e+00> : vector<32xf32>
      %456 = vector.multi_reduction <add>, %455, %cst_330 [0] : vector<33x32xf32> to vector<32xf32>
      %457 = vector.shape_cast %456 : vector<32xf32> to vector<1x32xf32>
      %458 = vector.extract_strided_slice %420 {offsets = [1, 0], sizes = [1, 32], strides = [1, 1]} : vector<2x32xf32> to vector<1x32xf32>
      %c121_i32 = arith.constant 121 : i32
      %459 = arith.addi %c121_i32, %arg40 : i32
      %460 = arith.index_cast %459 : i32 to index
      %c0_331 = arith.constant 0 : index
      %461 = vector.load %arg36[%460, %c0_331] : memref<160x32xf32, #tpu.memory_space<vmem>>, vector<1x32xf32>
      tpu.vector_store %arg36[%460, %c0_331], %458 {strides = array<i32>} : memref<160x32xf32, #tpu.memory_space<vmem>>, vector<1x32xf32>,
      %462 = vector.extract_strided_slice %408 {offsets = [1, 0], sizes = [1, 32], strides = [1, 1]} : vector<2x32xf32> to vector<1x32xf32>
      %c121_i32_332 = arith.constant 121 : i32
      %463 = arith.addi %c121_i32_332, %arg40 : i32
      %464 = arith.index_cast %463 : i32 to index
      %c0_333 = arith.constant 0 : index
      %465 = vector.load %arg37[%464, %c0_333] : memref<160x32xf32, #tpu.memory_space<vmem>>, vector<1x32xf32>
      tpu.vector_store %arg37[%464, %c0_333], %462 {strides = array<i32>} : memref<160x32xf32, #tpu.memory_space<vmem>>, vector<1x32xf32>,
      %466 = vector.extract_strided_slice %414 {offsets = [1, 0], sizes = [1, 32], strides = [1, 1]} : vector<2x32xf32> to vector<1x32xf32>
      %c1_i32_334 = arith.constant 1 : i32
      %467 = arith.addi %c1_i32_334, %arg40 : i32
      %c120_335 = arith.constant 120 : index
      %c0_336 = arith.constant 0 : index
      %468 = vector.load %arg36[%c120_335, %c0_336] : memref<160x32xf32, #tpu.memory_space<vmem>>, vector<33x32xf32>
      %c120_337 = arith.constant 120 : index
      %c0_338 = arith.constant 0 : index
      %469 = vector.load %arg37[%c120_337, %c0_338] : memref<160x32xf32, #tpu.memory_space<vmem>>, vector<33x32xf32>
      %470 = vector.broadcast %466 : vector<1x32xf32> to vector<33x32xf32>
      %471 = arith.mulf %468, %470 : vector<33x32xf32>
      %c0_339 = arith.constant 0 : index
      %c0_340 = arith.constant 0 : index
      %472 = vector.load %arg6[%c0_339, %c0_340] : memref<32x2xf32, #tpu.memory_space<vmem>>, vector<32x2xf32>
      %cst_341 = arith.constant dense<0.000000e+00> : vector<33x2xf32>
      %473 = tpu.matmul %471, %472, %cst_341 {dimension_numbers = #tpu.dot_dimension_numbers<[1], [0], [0], [1], [0, 0, 1, 1], [], []>} : vector<33x32xf32>, vector<32x2xf32>, vector<33x2xf32> -> vector<33x2xf32>
      %cst_342 = arith.constant 2.500000e-01 : f32
      %474 = vector.broadcast %cst_342 : f32 to vector<33x2xf32>
      %475 = arith.mulf %473, %474 : vector<33x2xf32>
      %476 = tpu.iota {dimensions = array<i32: 0>} : vector<33x2xi32>
      %477 = vector.broadcast %467 : i32 to vector<33x2xi32>
      %478 = arith.cmpi sle, %476, %477 : vector<33x2xi32>
      %cst_343 = arith.constant -1.000000e+30 : f32
      %479 = vector.broadcast %cst_343 : f32 to vector<33x2xf32>
      %480 = arith.select %478, %475, %479 : vector<33x2xi1>, vector<33x2xf32>
      %cst_344 = arith.constant dense<0xFF800000> : vector<2xf32>
      %481 = vector.multi_reduction <maximumf>, %480, %cst_344 [0] : vector<33x2xf32> to vector<2xf32>
      %482 = vector.shape_cast %481 : vector<2xf32> to vector<1x2xf32>
      %483 = vector.broadcast %482 : vector<1x2xf32> to vector<33x2xf32>
      %484 = arith.subf %480, %483 : vector<33x2xf32>
      %485 = math.exp %484 : vector<33x2xf32>
      %cst_345 = arith.constant dense<0.000000e+00> : vector<2xf32>
      %486 = vector.multi_reduction <add>, %485, %cst_345 [0] : vector<33x2xf32> to vector<2xf32>
      %487 = vector.shape_cast %486 : vector<2xf32> to vector<1x2xf32>
      %488 = vector.broadcast %487 : vector<1x2xf32> to vector<33x2xf32>
      %489 = arith.divf %485, %488 : vector<33x2xf32>
      %c0_346 = arith.constant 0 : index
      %c0_347 = arith.constant 0 : index
      %490 = vector.load %arg7[%c0_346, %c0_347] : memref<2x32xf32, #tpu.memory_space<vmem>>, vector<2x32xf32>
      %cst_348 = arith.constant dense<0.000000e+00> : vector<33x32xf32>
      %491 = tpu.matmul %489, %490, %cst_348 {dimension_numbers = #tpu.dot_dimension_numbers<[1], [0], [0], [1], [0, 0, 1, 1], [], []>} : vector<33x2xf32>, vector<2x32xf32>, vector<33x32xf32> -> vector<33x32xf32>
      %492 = arith.mulf %491, %469 : vector<33x32xf32>
      %cst_349 = arith.constant dense<0.000000e+00> : vector<32xf32>
      %493 = vector.multi_reduction <add>, %492, %cst_349 [0] : vector<33x32xf32> to vector<32xf32>
      %494 = vector.shape_cast %493 : vector<32xf32> to vector<1x32xf32>
      %495 = tpu.concatenate %457, %494 in 0 : vector<1x32xf32>, vector<1x32xf32> -> vector<2x32xf32>
      %c1_350 = arith.constant 1 : index
      %c0_351 = arith.constant 0 : index
      %c0_352 = arith.constant 0 : index
      %496 = vector.load %arg18[%c1_350, %c0_351, %c0_352] : memref<2x32x32xf32, #tpu.memory_space<vmem>>, vector<1x32x32xf32>
      %497 = vector.shape_cast %496 : vector<1x32x32xf32> to vector<32x32xf32>
      %cst_353 = arith.constant dense<0.000000e+00> : vector<2x32xf32>
      %498 = tpu.matmul %495, %497, %cst_353 {dimension_numbers = #tpu.dot_dimension_numbers<[1], [0], [0], [1], [0, 0, 1, 1], [], []>} : vector<2x32xf32>, vector<32x32xf32>, vector<2x32xf32> -> vector<2x32xf32>
      %499 = arith.addf %373, %498 : vector<2x32xf32>
      %c1_354 = arith.constant 1 : index
      %c0_355 = arith.constant 0 : index
      %c0_356 = arith.constant 0 : index
      %500 = vector.load %arg21[%c1_354, %c0_355, %c0_356] : memref<2x1x32xf32, #tpu.memory_space<vmem>>, vector<1x1x32xf32>
      %501 = vector.shape_cast %500 : vector<1x1x32xf32> to vector<1x32xf32>
      %c1_357 = arith.constant 1 : index
      %c0_358 = arith.constant 0 : index
      %c0_359 = arith.constant 0 : index
      %502 = vector.load %arg22[%c1_357, %c0_358, %c0_359] : memref<2x1x32xf32, #tpu.memory_space<vmem>>, vector<1x1x32xf32>
      %503 = vector.shape_cast %502 : vector<1x1x32xf32> to vector<1x32xf32>
      %cst_360 = arith.constant dense<0.000000e+00> : vector<2xf32>
      %504 = vector.multi_reduction <add>, %499, %cst_360 [1] : vector<2x32xf32> to vector<2xf32>
      %505 = vector.shape_cast %504 : vector<2xf32> to vector<2x1xf32>
      %cst_361 = arith.constant 3.200000e+01 : f32
      %506 = vector.broadcast %cst_361 : f32 to vector<2x1xf32>
      %507 = arith.divf %505, %506 : vector<2x1xf32>
      %508 = vector.broadcast %507 : vector<2x1xf32> to vector<2x32xf32>
      %509 = arith.subf %499, %508 : vector<2x32xf32>
      %510 = arith.mulf %509, %509 : vector<2x32xf32>
      %cst_362 = arith.constant dense<0.000000e+00> : vector<2xf32>
      %511 = vector.multi_reduction <add>, %510, %cst_362 [1] : vector<2x32xf32> to vector<2xf32>
      %512 = vector.shape_cast %511 : vector<2xf32> to vector<2x1xf32>
      %cst_363 = arith.constant 3.200000e+01 : f32
      %513 = vector.broadcast %cst_363 : f32 to vector<2x1xf32>
      %514 = arith.divf %512, %513 : vector<2x1xf32>
      %515 = vector.broadcast %507 : vector<2x1xf32> to vector<2x32xf32>
      %516 = arith.subf %499, %515 : vector<2x32xf32>
      %cst_364 = arith.constant 9.99999974E-6 : f32
      %517 = vector.broadcast %cst_364 : f32 to vector<2x1xf32>
      %518 = arith.addf %514, %517 : vector<2x1xf32>
      %519 = math.rsqrt %518 : vector<2x1xf32>
      %520 = vector.broadcast %519 : vector<2x1xf32> to vector<2x32xf32>
      %521 = arith.mulf %516, %520 : vector<2x32xf32>
      %522 = vector.broadcast %501 : vector<1x32xf32> to vector<2x32xf32>
      %523 = arith.mulf %521, %522 : vector<2x32xf32>
      %524 = vector.broadcast %503 : vector<1x32xf32> to vector<2x32xf32>
      %525 = arith.addf %523, %524 : vector<2x32xf32>
      %c1_365 = arith.constant 1 : index
      %c0_366 = arith.constant 0 : index
      %c0_367 = arith.constant 0 : index
      %526 = vector.load %arg23[%c1_365, %c0_366, %c0_367] : memref<2x32x32xf32, #tpu.memory_space<vmem>>, vector<1x32x32xf32>
      %527 = vector.shape_cast %526 : vector<1x32x32xf32> to vector<32x32xf32>
      %cst_368 = arith.constant dense<0.000000e+00> : vector<2x32xf32>
      %528 = tpu.matmul %525, %527, %cst_368 {dimension_numbers = #tpu.dot_dimension_numbers<[1], [0], [0], [1], [0, 0, 1, 1], [], []>} : vector<2x32xf32>, vector<32x32xf32>, vector<2x32xf32> -> vector<2x32xf32>
      %529 = vector.extract_strided_slice %528 {offsets = [0, 0], sizes = [1, 32], strides = [1, 1]} : vector<2x32xf32> to vector<1x32xf32>
      %c32_369 = arith.constant 32 : index
      %c0_370 = arith.constant 0 : index
      %530 = vector.load %arg38[%c32_369, %c0_370] : memref<64x32xf32, #tpu.memory_space<vmem>>, vector<9x32xf32>
      %c32_371 = arith.constant 32 : index
      %c0_372 = arith.constant 0 : index
      %531 = vector.load %arg39[%c32_371, %c0_372] : memref<64x32xf32, #tpu.memory_space<vmem>>, vector<9x32xf32>
      %532 = vector.broadcast %529 : vector<1x32xf32> to vector<9x32xf32>
      %533 = arith.mulf %530, %532 : vector<9x32xf32>
      %c0_373 = arith.constant 0 : index
      %c0_374 = arith.constant 0 : index
      %534 = vector.load %arg6[%c0_373, %c0_374] : memref<32x2xf32, #tpu.memory_space<vmem>>, vector<32x2xf32>
      %cst_375 = arith.constant dense<0.000000e+00> : vector<9x2xf32>
      %535 = tpu.matmul %533, %534, %cst_375 {dimension_numbers = #tpu.dot_dimension_numbers<[1], [0], [0], [1], [0, 0, 1, 1], [], []>} : vector<9x32xf32>, vector<32x2xf32>, vector<9x2xf32> -> vector<9x2xf32>
      %cst_376 = arith.constant 2.500000e-01 : f32
      %536 = vector.broadcast %cst_376 : f32 to vector<9x2xf32>
      %537 = arith.mulf %535, %536 : vector<9x2xf32>
      %cst_377 = arith.constant dense<0xFF800000> : vector<2xf32>
      %538 = vector.multi_reduction <maximumf>, %537, %cst_377 [0] : vector<9x2xf32> to vector<2xf32>
      %539 = vector.shape_cast %538 : vector<2xf32> to vector<1x2xf32>
      %540 = vector.broadcast %539 : vector<1x2xf32> to vector<9x2xf32>
      %541 = arith.subf %537, %540 : vector<9x2xf32>
      %542 = math.exp %541 : vector<9x2xf32>
      %cst_378 = arith.constant dense<0.000000e+00> : vector<2xf32>
      %543 = vector.multi_reduction <add>, %542, %cst_378 [0] : vector<9x2xf32> to vector<2xf32>
      %544 = vector.shape_cast %543 : vector<2xf32> to vector<1x2xf32>
      %545 = vector.broadcast %544 : vector<1x2xf32> to vector<9x2xf32>
      %546 = arith.divf %542, %545 : vector<9x2xf32>
      %c0_379 = arith.constant 0 : index
      %c0_380 = arith.constant 0 : index
      %547 = vector.load %arg7[%c0_379, %c0_380] : memref<2x32xf32, #tpu.memory_space<vmem>>, vector<2x32xf32>
      %cst_381 = arith.constant dense<0.000000e+00> : vector<9x32xf32>
      %548 = tpu.matmul %546, %547, %cst_381 {dimension_numbers = #tpu.dot_dimension_numbers<[1], [0], [0], [1], [0, 0, 1, 1], [], []>} : vector<9x2xf32>, vector<2x32xf32>, vector<9x32xf32> -> vector<9x32xf32>
      %549 = arith.mulf %548, %531 : vector<9x32xf32>
      %cst_382 = arith.constant dense<0.000000e+00> : vector<32xf32>
      %550 = vector.multi_reduction <add>, %549, %cst_382 [0] : vector<9x32xf32> to vector<32xf32>
      %551 = vector.shape_cast %550 : vector<32xf32> to vector<1x32xf32>
      %552 = vector.extract_strided_slice %528 {offsets = [1, 0], sizes = [1, 32], strides = [1, 1]} : vector<2x32xf32> to vector<1x32xf32>
      %c48_383 = arith.constant 48 : index
      %c0_384 = arith.constant 0 : index
      %553 = vector.load %arg38[%c48_383, %c0_384] : memref<64x32xf32, #tpu.memory_space<vmem>>, vector<9x32xf32>
      %c48_385 = arith.constant 48 : index
      %c0_386 = arith.constant 0 : index
      %554 = vector.load %arg39[%c48_385, %c0_386] : memref<64x32xf32, #tpu.memory_space<vmem>>, vector<9x32xf32>
      %555 = vector.broadcast %552 : vector<1x32xf32> to vector<9x32xf32>
      %556 = arith.mulf %553, %555 : vector<9x32xf32>
      %c0_387 = arith.constant 0 : index
      %c0_388 = arith.constant 0 : index
      %557 = vector.load %arg6[%c0_387, %c0_388] : memref<32x2xf32, #tpu.memory_space<vmem>>, vector<32x2xf32>
      %cst_389 = arith.constant dense<0.000000e+00> : vector<9x2xf32>
      %558 = tpu.matmul %556, %557, %cst_389 {dimension_numbers = #tpu.dot_dimension_numbers<[1], [0], [0], [1], [0, 0, 1, 1], [], []>} : vector<9x32xf32>, vector<32x2xf32>, vector<9x2xf32> -> vector<9x2xf32>
      %cst_390 = arith.constant 2.500000e-01 : f32
      %559 = vector.broadcast %cst_390 : f32 to vector<9x2xf32>
      %560 = arith.mulf %558, %559 : vector<9x2xf32>
      %cst_391 = arith.constant dense<0xFF800000> : vector<2xf32>
      %561 = vector.multi_reduction <maximumf>, %560, %cst_391 [0] : vector<9x2xf32> to vector<2xf32>
      %562 = vector.shape_cast %561 : vector<2xf32> to vector<1x2xf32>
      %563 = vector.broadcast %562 : vector<1x2xf32> to vector<9x2xf32>
      %564 = arith.subf %560, %563 : vector<9x2xf32>
      %565 = math.exp %564 : vector<9x2xf32>
      %cst_392 = arith.constant dense<0.000000e+00> : vector<2xf32>
      %566 = vector.multi_reduction <add>, %565, %cst_392 [0] : vector<9x2xf32> to vector<2xf32>
      %567 = vector.shape_cast %566 : vector<2xf32> to vector<1x2xf32>
      %568 = vector.broadcast %567 : vector<1x2xf32> to vector<9x2xf32>
      %569 = arith.divf %565, %568 : vector<9x2xf32>
      %c0_393 = arith.constant 0 : index
      %c0_394 = arith.constant 0 : index
      %570 = vector.load %arg7[%c0_393, %c0_394] : memref<2x32xf32, #tpu.memory_space<vmem>>, vector<2x32xf32>
      %cst_395 = arith.constant dense<0.000000e+00> : vector<9x32xf32>
      %571 = tpu.matmul %569, %570, %cst_395 {dimension_numbers = #tpu.dot_dimension_numbers<[1], [0], [0], [1], [0, 0, 1, 1], [], []>} : vector<9x2xf32>, vector<2x32xf32>, vector<9x32xf32> -> vector<9x32xf32>
      %572 = arith.mulf %571, %554 : vector<9x32xf32>
      %cst_396 = arith.constant dense<0.000000e+00> : vector<32xf32>
      %573 = vector.multi_reduction <add>, %572, %cst_396 [0] : vector<9x32xf32> to vector<32xf32>
      %574 = vector.shape_cast %573 : vector<32xf32> to vector<1x32xf32>
      %575 = tpu.concatenate %551, %574 in 0 : vector<1x32xf32>, vector<1x32xf32> -> vector<2x32xf32>
      %c1_397 = arith.constant 1 : index
      %c0_398 = arith.constant 0 : index
      %c0_399 = arith.constant 0 : index
      %576 = vector.load %arg26[%c1_397, %c0_398, %c0_399] : memref<2x32x32xf32, #tpu.memory_space<vmem>>, vector<1x32x32xf32>
      %577 = vector.shape_cast %576 : vector<1x32x32xf32> to vector<32x32xf32>
      %cst_400 = arith.constant dense<0.000000e+00> : vector<2x32xf32>
      %578 = tpu.matmul %575, %577, %cst_400 {dimension_numbers = #tpu.dot_dimension_numbers<[1], [0], [0], [1], [0, 0, 1, 1], [], []>} : vector<2x32xf32>, vector<32x32xf32>, vector<2x32xf32> -> vector<2x32xf32>
      %579 = arith.addf %499, %578 : vector<2x32xf32>
      %c1_401 = arith.constant 1 : index
      %c0_402 = arith.constant 0 : index
      %c0_403 = arith.constant 0 : index
      %580 = vector.load %arg29[%c1_401, %c0_402, %c0_403] : memref<2x1x32xf32, #tpu.memory_space<vmem>>, vector<1x1x32xf32>
      %581 = vector.shape_cast %580 : vector<1x1x32xf32> to vector<1x32xf32>
      %c1_404 = arith.constant 1 : index
      %c0_405 = arith.constant 0 : index
      %c0_406 = arith.constant 0 : index
      %582 = vector.load %arg30[%c1_404, %c0_405, %c0_406] : memref<2x1x32xf32, #tpu.memory_space<vmem>>, vector<1x1x32xf32>
      %583 = vector.shape_cast %582 : vector<1x1x32xf32> to vector<1x32xf32>
      %cst_407 = arith.constant dense<0.000000e+00> : vector<2xf32>
      %584 = vector.multi_reduction <add>, %579, %cst_407 [1] : vector<2x32xf32> to vector<2xf32>
      %585 = vector.shape_cast %584 : vector<2xf32> to vector<2x1xf32>
      %cst_408 = arith.constant 3.200000e+01 : f32
      %586 = vector.broadcast %cst_408 : f32 to vector<2x1xf32>
      %587 = arith.divf %585, %586 : vector<2x1xf32>
      %588 = vector.broadcast %587 : vector<2x1xf32> to vector<2x32xf32>
      %589 = arith.subf %579, %588 : vector<2x32xf32>
      %590 = arith.mulf %589, %589 : vector<2x32xf32>
      %cst_409 = arith.constant dense<0.000000e+00> : vector<2xf32>
      %591 = vector.multi_reduction <add>, %590, %cst_409 [1] : vector<2x32xf32> to vector<2xf32>
      %592 = vector.shape_cast %591 : vector<2xf32> to vector<2x1xf32>
      %cst_410 = arith.constant 3.200000e+01 : f32
      %593 = vector.broadcast %cst_410 : f32 to vector<2x1xf32>
      %594 = arith.divf %592, %593 : vector<2x1xf32>
      %595 = vector.broadcast %587 : vector<2x1xf32> to vector<2x32xf32>
      %596 = arith.subf %579, %595 : vector<2x32xf32>
      %cst_411 = arith.constant 9.99999974E-6 : f32
      %597 = vector.broadcast %cst_411 : f32 to vector<2x1xf32>
      %598 = arith.addf %594, %597 : vector<2x1xf32>
      %599 = math.rsqrt %598 : vector<2x1xf32>
      %600 = vector.broadcast %599 : vector<2x1xf32> to vector<2x32xf32>
      %601 = arith.mulf %596, %600 : vector<2x32xf32>
      %602 = vector.broadcast %581 : vector<1x32xf32> to vector<2x32xf32>
      %603 = arith.mulf %601, %602 : vector<2x32xf32>
      %604 = vector.broadcast %583 : vector<1x32xf32> to vector<2x32xf32>
      %605 = arith.addf %603, %604 : vector<2x32xf32>
      %c1_412 = arith.constant 1 : index
      %c0_413 = arith.constant 0 : index
      %c0_414 = arith.constant 0 : index
      %606 = vector.load %arg31[%c1_412, %c0_413, %c0_414] : memref<2x32x128xf32, #tpu.memory_space<vmem>>, vector<1x32x128xf32>
      %607 = vector.shape_cast %606 : vector<1x32x128xf32> to vector<32x128xf32>
      %cst_415 = arith.constant dense<0.000000e+00> : vector<2x128xf32>
      %608 = tpu.matmul %605, %607, %cst_415 {dimension_numbers = #tpu.dot_dimension_numbers<[1], [0], [0], [1], [0, 0, 1, 1], [], []>} : vector<2x32xf32>, vector<32x128xf32>, vector<2x128xf32> -> vector<2x128xf32>
      %c1_416 = arith.constant 1 : index
      %c0_417 = arith.constant 0 : index
      %c0_418 = arith.constant 0 : index
      %609 = vector.load %arg32[%c1_416, %c0_417, %c0_418] : memref<2x1x128xf32, #tpu.memory_space<vmem>>, vector<1x1x128xf32>
      %610 = vector.shape_cast %609 : vector<1x1x128xf32> to vector<1x128xf32>
      %611 = vector.broadcast %610 : vector<1x128xf32> to vector<2x128xf32>
      %612 = arith.addf %608, %611 : vector<2x128xf32>
      %613 = arith.mulf %612, %612 : vector<2x128xf32>
      %614 = arith.mulf %612, %613 : vector<2x128xf32>
      %cst_419 = arith.constant 4.471500e-02 : f32
      %615 = vector.broadcast %cst_419 : f32 to vector<2x128xf32>
      %616 = arith.mulf %615, %614 : vector<2x128xf32>
      %617 = arith.addf %612, %616 : vector<2x128xf32>
      %cst_420 = arith.constant 0.797884583 : f32
      %618 = vector.broadcast %cst_420 : f32 to vector<2x128xf32>
      %619 = arith.mulf %618, %617 : vector<2x128xf32>
      %620 = math.tanh %619 : vector<2x128xf32>
      %cst_421 = arith.constant 1.000000e+00 : f32
      %621 = vector.broadcast %cst_421 : f32 to vector<2x128xf32>
      %622 = arith.addf %621, %620 : vector<2x128xf32>
      %cst_422 = arith.constant 5.000000e-01 : f32
      %623 = vector.broadcast %cst_422 : f32 to vector<2x128xf32>
      %624 = arith.mulf %623, %622 : vector<2x128xf32>
      %625 = arith.mulf %612, %624 : vector<2x128xf32>
      %c1_423 = arith.constant 1 : index
      %c0_424 = arith.constant 0 : index
      %c0_425 = arith.constant 0 : index
      %626 = vector.load %arg33[%c1_423, %c0_424, %c0_425] : memref<2x128x32xf32, #tpu.memory_space<vmem>>, vector<1x128x32xf32>
      %627 = vector.shape_cast %626 : vector<1x128x32xf32> to vector<128x32xf32>
      %cst_426 = arith.constant dense<0.000000e+00> : vector<2x32xf32>
      %628 = tpu.matmul %625, %627, %cst_426 {dimension_numbers = #tpu.dot_dimension_numbers<[1], [0], [0], [1], [0, 0, 1, 1], [], []>} : vector<2x128xf32>, vector<128x32xf32>, vector<2x32xf32> -> vector<2x32xf32>
      %629 = arith.addf %579, %628 : vector<2x32xf32>
      %c1_427 = arith.constant 1 : index
      %c0_428 = arith.constant 0 : index
      %c0_429 = arith.constant 0 : index
      %630 = vector.load %arg34[%c1_427, %c0_428, %c0_429] : memref<2x1x32xf32, #tpu.memory_space<vmem>>, vector<1x1x32xf32>
      %631 = vector.shape_cast %630 : vector<1x1x32xf32> to vector<1x32xf32>
      %632 = vector.broadcast %631 : vector<1x32xf32> to vector<2x32xf32>
      %633 = arith.addf %629, %632 : vector<2x32xf32>
      %c0_430 = arith.constant 0 : index
      %c0_431 = arith.constant 0 : index
      %634 = vector.load %arg10[%c0_430, %c0_431] : memref<1x32xf32, #tpu.memory_space<vmem>>, vector<1x32xf32>
      %c0_432 = arith.constant 0 : index
      %c0_433 = arith.constant 0 : index
      %635 = vector.load %arg11[%c0_432, %c0_433] : memref<1x32xf32, #tpu.memory_space<vmem>>, vector<1x32xf32>
      %cst_434 = arith.constant dense<0.000000e+00> : vector<2xf32>
      %636 = vector.multi_reduction <add>, %633, %cst_434 [1] : vector<2x32xf32> to vector<2xf32>
      %637 = vector.shape_cast %636 : vector<2xf32> to vector<2x1xf32>
      %cst_435 = arith.constant 3.200000e+01 : f32
      %638 = vector.broadcast %cst_435 : f32 to vector<2x1xf32>
      %639 = arith.divf %637, %638 : vector<2x1xf32>
      %640 = vector.broadcast %639 : vector<2x1xf32> to vector<2x32xf32>
      %641 = arith.subf %633, %640 : vector<2x32xf32>
      %642 = arith.mulf %641, %641 : vector<2x32xf32>
      %cst_436 = arith.constant dense<0.000000e+00> : vector<2xf32>
      %643 = vector.multi_reduction <add>, %642, %cst_436 [1] : vector<2x32xf32> to vector<2xf32>
      %644 = vector.shape_cast %643 : vector<2xf32> to vector<2x1xf32>
      %cst_437 = arith.constant 3.200000e+01 : f32
      %645 = vector.broadcast %cst_437 : f32 to vector<2x1xf32>
      %646 = arith.divf %644, %645 : vector<2x1xf32>
      %647 = vector.broadcast %639 : vector<2x1xf32> to vector<2x32xf32>
      %648 = arith.subf %633, %647 : vector<2x32xf32>
      %cst_438 = arith.constant 9.99999974E-6 : f32
      %649 = vector.broadcast %cst_438 : f32 to vector<2x1xf32>
      %650 = arith.addf %646, %649 : vector<2x1xf32>
      %651 = math.rsqrt %650 : vector<2x1xf32>
      %652 = vector.broadcast %651 : vector<2x1xf32> to vector<2x32xf32>
      %653 = arith.mulf %648, %652 : vector<2x32xf32>
      %654 = vector.broadcast %634 : vector<1x32xf32> to vector<2x32xf32>
      %655 = arith.mulf %653, %654 : vector<2x32xf32>
      %656 = vector.broadcast %635 : vector<1x32xf32> to vector<2x32xf32>
      %657 = arith.addf %655, %656 : vector<2x32xf32>
      %c0_439 = arith.constant 0 : index
      %c0_440 = arith.constant 0 : index
      %658 = vector.load %arg12[%c0_439, %c0_440] : memref<32x17xf32, #tpu.memory_space<vmem>>, vector<32x17xf32>
      %cst_441 = arith.constant dense<0.000000e+00> : vector<2x17xf32>
      %659 = tpu.matmul %657, %658, %cst_441 {dimension_numbers = #tpu.dot_dimension_numbers<[1], [0], [0], [1], [0, 0, 1, 1], [], []>} : vector<2x32xf32>, vector<32x17xf32>, vector<2x17xf32> -> vector<2x17xf32>
      %cst_442 = arith.constant dense<0xFF800000> : vector<2xf32>
      %660 = vector.multi_reduction <maximumf>, %659, %cst_442 [1] : vector<2x17xf32> to vector<2xf32>
      %661 = vector.shape_cast %660 : vector<2xf32> to vector<2x1xf32>
      %662 = tpu.iota {dimensions = array<i32: 1>} : vector<2x17xi32>
      %663 = vector.broadcast %661 : vector<2x1xf32> to vector<2x17xf32>
      %664 = arith.cmpf oge, %659, %663 : vector<2x17xf32>
      %665 = arith.sitofp %662 : vector<2x17xi32> to vector<2x17xf32>
      %cst_443 = arith.constant 1.700000e+01 : f32
      %666 = vector.broadcast %cst_443 : f32 to vector<2x17xf32>
      %667 = arith.select %664, %665, %666 : vector<2x17xi1>, vector<2x17xf32>
      %cst_444 = arith.constant dense<0x7F800000> : vector<2xf32>
      %668 = vector.multi_reduction <minimumf>, %667, %cst_444 [1] : vector<2x17xf32> to vector<2xf32>
      %669 = vector.shape_cast %668 : vector<2xf32> to vector<2x1xf32>
      %670 = arith.fptosi %669 : vector<2x1xf32> to vector<2x1xi32>
      %671 = vector.broadcast %670 : vector<2x1xi32> to vector<2x17xi32>
      %672 = arith.cmpi eq, %662, %671 : vector<2x17xi32>
      %673 = arith.extui %672 : vector<2x17xi1> to vector<2x17xi32>
      %674 = arith.sitofp %673 : vector<2x17xi32> to vector<2x17xf32>
      %675 = tpu.iota {dimensions = array<i32: 1>} : vector<2x32xi32>
      %c1_i32_445 = arith.constant 1 : i32
      %676 = arith.addi %arg40, %c1_i32_445 : i32
      %677 = vector.broadcast %676 : i32 to vector<2x32xi32>
      %678 = arith.cmpi eq, %675, %677 : vector<2x32xi32>
      %c0_446 = arith.constant 0 : index
      %c0_447 = arith.constant 0 : index
      %679 = vector.load %arg35[%c0_446, %c0_447] : memref<2x32xi32, #tpu.memory_space<vmem>>, vector<2x32xi32>
      %680 = vector.shape_cast %670 : vector<2x1xi32> to vector<2x1xi32>
      %681 = vector.broadcast %680 : vector<2x1xi32> to vector<2x32xi32>
      %682 = arith.select %678, %681, %679 : vector<2x32xi1>, vector<2x32xi32>
      %c0_448 = arith.constant 0 : index
      %c0_449 = arith.constant 0 : index
      %683 = vector.load %arg35[%c0_448, %c0_449] : memref<2x32xi32, #tpu.memory_space<vmem>>, vector<2x32xi32>
      tpu.vector_store %arg35[%c0_448, %c0_449], %682 {strides = array<i32>} : memref<2x32xi32, #tpu.memory_space<vmem>>, vector<2x32xi32>,
      %c0_i32_450 = arith.constant 0 : i32
      %684 = arith.addi %c0_i32_450, %arg40 : i32
      %c1_i32_451 = arith.constant 1 : i32
      %685 = arith.addi %684, %c1_i32_451 : i32
      %686 = arith.index_cast %685 : i32 to index
      %c0_452 = arith.constant 0 : index
      %687 = vector.load %arg2[%686, %c0_452] : memref<64x17xf32, #tpu.memory_space<vmem>>, vector<1x17xf32>
      %c32_i32 = arith.constant 32 : i32
      %688 = arith.addi %c32_i32, %arg40 : i32
      %c1_i32_453 = arith.constant 1 : i32
      %689 = arith.addi %688, %c1_i32_453 : i32
      %690 = arith.index_cast %689 : i32 to index
      %c0_454 = arith.constant 0 : index
      %691 = vector.load %arg2[%690, %c0_454] : memref<64x17xf32, #tpu.memory_space<vmem>>, vector<1x17xf32>
      %692 = tpu.concatenate %687, %691 in 0 : vector<1x17xf32>, vector<1x17xf32> -> vector<2x17xf32>
      %c1_i32_455 = arith.constant 1 : i32
      %693 = arith.addi %arg40, %c1_i32_455 : i32
      %694 = arith.cmpi slt, %693, %101 : i32
      %695 = arith.extui %694 : i1 to i32
      %696 = arith.sitofp %695 : i32 to f32
      %697 = vector.broadcast %696 : f32 to vector<2x17xf32>
      %698 = arith.mulf %697, %692 : vector<2x17xf32>
      %cst_456 = arith.constant 1.000000e+00 : f32
      %699 = arith.subf %cst_456, %696 : f32
      %700 = vector.broadcast %699 : f32 to vector<2x17xf32>
      %701 = arith.mulf %700, %674 : vector<2x17xf32>
      %702 = arith.addf %698, %701 : vector<2x17xf32>
      scf.yield %702 : vector<2x17xf32>
    }
    return
  }
  func.func @transform_0(%arg0: i32, %arg1: memref<1xi32, #tpu.memory_space<smem>>) -> (i32, i32) {
    %c0_i32 = arith.constant 0 : i32
    %c0_i32_0 = arith.constant 0 : i32
    %c0_i32_1 = arith.constant 0 : i32
    return %c0_i32, %c0_i32_0 : i32, i32
  }
  func.func @transform_1(%arg0: i32, %arg1: memref<1xi32, #tpu.memory_space<smem>>) -> (i32, i32) {
    %c0_i32 = arith.constant 0 : i32
    %c0_i32_0 = arith.constant 0 : i32
    %c0_i32_1 = arith.constant 0 : i32
    return %c0_i32, %c0_i32_0 : i32, i32
  }
  func.func @transform_2(%arg0: i32, %arg1: memref<1xi32, #tpu.memory_space<smem>>) -> (i32, i32) {
    %c0_i32 = arith.constant 0 : i32
    %c0_i32_0 = arith.constant 0 : i32
    %c0_i32_1 = arith.constant 0 : i32
    return %c0_i32, %c0_i32_0 : i32, i32
  }
  func.func @transform_3(%arg0: i32, %arg1: memref<1xi32, #tpu.memory_space<smem>>) -> (i32, i32) {
    %c0_i32 = arith.constant 0 : i32
    %c0_i32_0 = arith.constant 0 : i32
    %c0_i32_1 = arith.constant 0 : i32
    return %c0_i32, %c0_i32_0 : i32, i32
  }
  func.func @transform_4(%arg0: i32, %arg1: memref<1xi32, #tpu.memory_space<smem>>) -> (i32, i32) {
    %c0_i32 = arith.constant 0 : i32
    %c0_i32_0 = arith.constant 0 : i32
    %c0_i32_1 = arith.constant 0 : i32
    return %c0_i32, %c0_i32_0 : i32, i32
  }
  func.func @transform_5(%arg0: i32, %arg1: memref<1xi32, #tpu.memory_space<smem>>) -> (i32, i32) {
    %c0_i32 = arith.constant 0 : i32
    %c0_i32_0 = arith.constant 0 : i32
    %c0_i32_1 = arith.constant 0 : i32
    return %c0_i32, %c0_i32_0 : i32, i32
  }
  func.func @transform_6(%arg0: i32, %arg1: memref<1xi32, #tpu.memory_space<smem>>) -> (i32, i32, i32) {
    %c0_i32 = arith.constant 0 : i32
    %c0_i32_0 = arith.constant 0 : i32
    %c0_i32_1 = arith.constant 0 : i32
    %c0_i32_2 = arith.constant 0 : i32
    return %c0_i32, %c0_i32_0, %c0_i32_1 : i32, i32, i32
  }
  func.func @transform_7(%arg0: i32, %arg1: memref<1xi32, #tpu.memory_space<smem>>) -> (i32, i32) {
    %c0_i32 = arith.constant 0 : i32
    %c0_i32_0 = arith.constant 0 : i32
    %c0_i32_1 = arith.constant 0 : i32
    return %c0_i32, %c0_i32_0 : i32, i32
  }
  func.func @transform_8(%arg0: i32, %arg1: memref<1xi32, #tpu.memory_space<smem>>) -> (i32, i32) {
    %c0_i32 = arith.constant 0 : i32
    %c0_i32_0 = arith.constant 0 : i32
    %c0_i32_1 = arith.constant 0 : i32
    return %c0_i32, %c0_i32_0 : i32, i32
  }
  func.func @transform_9(%arg0: i32, %arg1: memref<1xi32, #tpu.memory_space<smem>>) -> (i32, i32) {
    %c0_i32 = arith.constant 0 : i32
    %c0_i32_0 = arith.constant 0 : i32
    %c0_i32_1 = arith.constant 0 : i32
    return %c0_i32, %c0_i32_0 : i32, i32
  }
  func.func @transform_10(%arg0: i32, %arg1: memref<1xi32, #tpu.memory_space<smem>>) -> (i32, i32) {
    %c0_i32 = arith.constant 0 : i32
    %c0_i32_0 = arith.constant 0 : i32
    %c0_i32_1 = arith.constant 0 : i32
    return %c0_i32, %c0_i32_0 : i32, i32
  }
  func.func @transform_11(%arg0: i32, %arg1: memref<1xi32, #tpu.memory_space<smem>>) -> (i32, i32, i32) {
    %c0_i32 = arith.constant 0 : i32
    %c0_i32_0 = arith.constant 0 : i32
    %c0_i32_1 = arith.constant 0 : i32
    %c0_i32_2 = arith.constant 0 : i32
    return %c0_i32, %c0_i32_0, %c0_i32_1 : i32, i32, i32
  }
  func.func @transform_12(%arg0: i32, %arg1: memref<1xi32, #tpu.memory_space<smem>>) -> (i32, i32, i32) {
    %c0_i32 = arith.constant 0 : i32
    %c0_i32_0 = arith.constant 0 : i32
    %c0_i32_1 = arith.constant 0 : i32
    %c0_i32_2 = arith.constant 0 : i32
    return %c0_i32, %c0_i32_0, %c0_i32_1 : i32, i32, i32
  }
  func.func @transform_13(%arg0: i32, %arg1: memref<1xi32, #tpu.memory_space<smem>>) -> (i32, i32, i32) {
    %c0_i32 = arith.constant 0 : i32
    %c0_i32_0 = arith.constant 0 : i32
    %c0_i32_1 = arith.constant 0 : i32
    %c0_i32_2 = arith.constant 0 : i32
    return %c0_i32, %c0_i32_0, %c0_i32_1 : i32, i32, i32
  }
  func.func @transform_14(%arg0: i32, %arg1: memref<1xi32, #tpu.memory_space<smem>>) -> (i32, i32, i32) {
    %c0_i32 = arith.constant 0 : i32
    %c0_i32_0 = arith.constant 0 : i32
    %c0_i32_1 = arith.constant 0 : i32
    %c0_i32_2 = arith.constant 0 : i32
    return %c0_i32, %c0_i32_0, %c0_i32_1 : i32, i32, i32
  }
  func.func @transform_15(%arg0: i32, %arg1: memref<1xi32, #tpu.memory_space<smem>>) -> (i32, i32, i32) {
    %c0_i32 = arith.constant 0 : i32
    %c0_i32_0 = arith.constant 0 : i32
    %c0_i32_1 = arith.constant 0 : i32
    %c0_i32_2 = arith.constant 0 : i32
    return %c0_i32, %c0_i32_0, %c0_i32_1 : i32, i32, i32
  }
  func.func @transform_16(%arg0: i32, %arg1: memref<1xi32, #tpu.memory_space<smem>>) -> (i32, i32, i32) {
    %c0_i32 = arith.constant 0 : i32
    %c0_i32_0 = arith.constant 0 : i32
    %c0_i32_1 = arith.constant 0 : i32
    %c0_i32_2 = arith.constant 0 : i32
    return %c0_i32, %c0_i32_0, %c0_i32_1 : i32, i32, i32
  }
  func.func @transform_17(%arg0: i32, %arg1: memref<1xi32, #tpu.memory_space<smem>>) -> (i32, i32, i32) {
    %c0_i32 = arith.constant 0 : i32
    %c0_i32_0 = arith.constant 0 : i32
    %c0_i32_1 = arith.constant 0 : i32
    %c0_i32_2 = arith.constant 0 : i32
    return %c0_i32, %c0_i32_0, %c0_i32_1 : i32, i32, i32
  }
  func.func @transform_18(%arg0: i32, %arg1: memref<1xi32, #tpu.memory_space<smem>>) -> (i32, i32, i32) {
    %c0_i32 = arith.constant 0 : i32
    %c0_i32_0 = arith.constant 0 : i32
    %c0_i32_1 = arith.constant 0 : i32
    %c0_i32_2 = arith.constant 0 : i32
    return %c0_i32, %c0_i32_0, %c0_i32_1 : i32, i32, i32
  }
  func.func @transform_19(%arg0: i32, %arg1: memref<1xi32, #tpu.memory_space<smem>>) -> (i32, i32, i32) {
    %c0_i32 = arith.constant 0 : i32
    %c0_i32_0 = arith.constant 0 : i32
    %c0_i32_1 = arith.constant 0 : i32
    %c0_i32_2 = arith.constant 0 : i32
    return %c0_i32, %c0_i32_0, %c0_i32_1 : i32, i32, i32
  }
  func.func @transform_20(%arg0: i32, %arg1: memref<1xi32, #tpu.memory_space<smem>>) -> (i32, i32, i32) {
    %c0_i32 = arith.constant 0 : i32
    %c0_i32_0 = arith.constant 0 : i32
    %c0_i32_1 = arith.constant 0 : i32
    %c0_i32_2 = arith.constant 0 : i32
    return %c0_i32, %c0_i32_0, %c0_i32_1 : i32, i32, i32
  }
  func.func @transform_21(%arg0: i32, %arg1: memref<1xi32, #tpu.memory_space<smem>>) -> (i32, i32, i32) {
    %c0_i32 = arith.constant 0 : i32
    %c0_i32_0 = arith.constant 0 : i32
    %c0_i32_1 = arith.constant 0 : i32
    %c0_i32_2 = arith.constant 0 : i32
    return %c0_i32, %c0_i32_0, %c0_i32_1 : i32, i32, i32
  }
  func.func @transform_22(%arg0: i32, %arg1: memref<1xi32, #tpu.memory_space<smem>>) -> (i32, i32, i32) {
    %c0_i32 = arith.constant 0 : i32
    %c0_i32_0 = arith.constant 0 : i32
    %c0_i32_1 = arith.constant 0 : i32
    %c0_i32_2 = arith.constant 0 : i32
    return %c0_i32, %c0_i32_0, %c0_i32_1 : i32, i32, i32
  }
  func.func @transform_23(%arg0: i32, %arg1: memref<1xi32, #tpu.memory_space<smem>>) -> (i32, i32, i32) {
    %c0_i32 = arith.constant 0 : i32
    %c0_i32_0 = arith.constant 0 : i32
    %c0_i32_1 = arith.constant 0 : i32
    %c0_i32_2 = arith.constant 0 : i32
    return %c0_i32, %c0_i32_0, %c0_i32_1 : i32, i32, i32
  }
  func.func @transform_24(%arg0: i32, %arg1: memref<1xi32, #tpu.memory_space<smem>>) -> (i32, i32, i32) {
    %c0_i32 = arith.constant 0 : i32
    %c0_i32_0 = arith.constant 0 : i32
    %c0_i32_1 = arith.constant 0 : i32
    %c0_i32_2 = arith.constant 0 : i32
    return %c0_i32, %c0_i32_0, %c0_i32_1 : i32, i32, i32
  }
  func.func @transform_25(%arg0: i32, %arg1: memref<1xi32, #tpu.memory_space<smem>>) -> (i32, i32, i32) {
    %c0_i32 = arith.constant 0 : i32
    %c0_i32_0 = arith.constant 0 : i32
    %c0_i32_1 = arith.constant 0 : i32
    %c0_i32_2 = arith.constant 0 : i32
    return %c0_i32, %c0_i32_0, %c0_i32_1 : i32, i32, i32
  }
  func.func @transform_26(%arg0: i32, %arg1: memref<1xi32, #tpu.memory_space<smem>>) -> (i32, i32, i32) {
    %c0_i32 = arith.constant 0 : i32
    %c0_i32_0 = arith.constant 0 : i32
    %c0_i32_1 = arith.constant 0 : i32
    %c0_i32_2 = arith.constant 0 : i32
    return %c0_i32, %c0_i32_0, %c0_i32_1 : i32, i32, i32
  }
  func.func @transform_27(%arg0: i32, %arg1: memref<1xi32, #tpu.memory_space<smem>>) -> (i32, i32, i32) {
    %c0_i32 = arith.constant 0 : i32
    %c0_i32_0 = arith.constant 0 : i32
    %c0_i32_1 = arith.constant 0 : i32
    %c0_i32_2 = arith.constant 0 : i32
    return %c0_i32, %c0_i32_0, %c0_i32_1 : i32, i32, i32
  }
  func.func @transform_28(%arg0: i32, %arg1: memref<1xi32, #tpu.memory_space<smem>>) -> (i32, i32, i32) {
    %c0_i32 = arith.constant 0 : i32
    %c0_i32_0 = arith.constant 0 : i32
    %c0_i32_1 = arith.constant 0 : i32
    %c0_i32_2 = arith.constant 0 : i32
    return %c0_i32, %c0_i32_0, %c0_i32_1 : i32, i32, i32
  }
  func.func @transform_29(%arg0: i32, %arg1: memref<1xi32, #tpu.memory_space<smem>>) -> (i32, i32, i32) {
    %c0_i32 = arith.constant 0 : i32
    %c0_i32_0 = arith.constant 0 : i32
    %c0_i32_1 = arith.constant 0 : i32
    %c0_i32_2 = arith.constant 0 : i32
    return %c0_i32, %c0_i32_0, %c0_i32_1 : i32, i32, i32
  }
  func.func @transform_30(%arg0: i32, %arg1: memref<1xi32, #tpu.memory_space<smem>>) -> (i32, i32, i32) {
    %c0_i32 = arith.constant 0 : i32
    %c0_i32_0 = arith.constant 0 : i32
    %c0_i32_1 = arith.constant 0 : i32
    %c0_i32_2 = arith.constant 0 : i32
    return %c0_i32, %c0_i32_0, %c0_i32_1 : i32, i32, i32
  }
  func.func @transform_31(%arg0: i32, %arg1: memref<1xi32, #tpu.memory_space<smem>>) -> (i32, i32, i32) {
    %c0_i32 = arith.constant 0 : i32
    %c0_i32_0 = arith.constant 0 : i32
    %c0_i32_1 = arith.constant 0 : i32
    %c0_i32_2 = arith.constant 0 : i32
    return %c0_i32, %c0_i32_0, %c0_i32_1 : i32, i32, i32
  }
  func.func @transform_32(%arg0: i32, %arg1: memref<1xi32, #tpu.memory_space<smem>>) -> (i32, i32, i32) {
    %c0_i32 = arith.constant 0 : i32
    %c0_i32_0 = arith.constant 0 : i32
    %c0_i32_1 = arith.constant 0 : i32
    %c0_i32_2 = arith.constant 0 : i32
    return %c0_i32, %c0_i32_0, %c0_i32_1 : i32, i32, i32
  }
  func.func @transform_33(%arg0: i32, %arg1: memref<1xi32, #tpu.memory_space<smem>>) -> (i32, i32) {
    %c0_i32 = arith.constant 0 : i32
    %c0_i32_0 = arith.constant 0 : i32
    %c0_i32_1 = arith.constant 0 : i32
    return %c0_i32, %c0_i32_0 : i32, i32
  }
}

</mosaic_0001>

<bundles_post_ra>
// kernel: generate.1
= control target key start
LH: loop header
LB: loop body
LE: loop exit
PB: predicated region body
PF: predicated region fallthrough
CT: control target
= control target key end

     0   :  { %s6749_s6 = smov 1   ;;  %s6750_s10 = smov 2   ;;  %s8014_s0 = inlined_call_operand.smem [shape: u32[35], index: -1, kind: input, shape index: {}] }
   0x1   :  { %s6802_s5 = sld [smem:[%s8014_s0]]   ;;  %s6751_s14 = smov 3  }
   0x2   :  { %s6807_s9 = sld [smem:[%s8014_s0 + %s6749_s6]]   ;;  %s6752_s18 = smov 4  }
   0x3   :  { %s6812_s13 = sld [smem:[%s8014_s0 + %s6750_s10]]   ;;  %s6753_s22 = smov 5  }
   0x4   :  { %s6817_s17 = sld [smem:[%s8014_s0 + %s6751_s14]]   ;;  %s6754_s26 = smov 6  }
   0x5   :  { %s6822_s21 = sld [smem:[%s8014_s0 + %s6752_s18]]   ;;  %s6755_s30 = smov 7  }
   0x6   :  { %s6827_s25 = sld [smem:[%s8014_s0 + %s6753_s22]]   ;;  %s6756_s4 = smov 8  }
   0x7   :  { %s6832_s29 = sld [smem:[%s8014_s0 + %s6754_s26]]   ;;  %s6757_s10 = smov 9  }
   0x8   :  { %s6837_s3 = sld [smem:[%s8014_s0 + %s6755_s30]]   ;;  %s6758_s15 = smov 10  }
   0x9   :  { %8028 = sst [smem:[#allocation14_spill]] %s6812_s13  ;;  %s6759_s20 = smov 11  }
   0xa   :  { %8029 = sst [smem:[#allocation15_spill]] %s6817_s17  ;;  %s6760_s26 = smov 12  }
   0xb   :  { %8030 = sst [smem:[#allocation16_spill]] %s6822_s21  ;;  %s6761_s1 = smov 13  }
   0xc   :  { %8031 = sst [smem:[#allocation17_spill]] %s6827_s25  ;;  %s6762_s7 = smov 14  }
   0xd   :  { %8032 = sst [smem:[#allocation18_spill]] %s6832_s29  ;;  %s6764_s22 = smov 16  }
   0xe   :  { %s6842_s8 = sld [smem:[%s8014_s0 + %s6756_s4]]   ;;  %s6765_s28 = smov 17  }
   0xf   :  { %s6847_s14 = sld [smem:[%s8014_s0 + %s6757_s10]]  }
  0x10   :  { %s6852_s19 = sld [smem:[%s8014_s0 + %s6758_s15]]   ;;  %s6763_s15 = smov 15  }
  0x11   :  { %s6857_s24 = sld [smem:[%s8014_s0 + %s6759_s20]]  }
  0x12   :  { %s6862_s30 = sld [smem:[%s8014_s0 + %s6760_s26]]  }
  0x13   :  { %s6867_s6 = sld [smem:[%s8014_s0 + %s6761_s1]]  }
  0x14   :  { %s6872_s12 = sld [smem:[%s8014_s0 + %s6762_s7]]   ;;  %s6766_s7 = smov 18  }
  0x15   :  { %8033 = sst [smem:[#allocation19_spill]] %s6847_s14 }
  0x16   :  { %8034 = sst [smem:[#allocation20_spill]] %s6852_s19 }
  0x17   :  { %8035 = sst [smem:[#allocation21_spill]] %s6857_s24 }
  0x18   :  { %8036 = sst [smem:[#allocation22_spill]] %s6862_s30 }
  0x19   :  { %8037 = sst [smem:[#allocation23_spill]] %s6867_s6 }
  0x1a   :  { %s6877_s20 = sld [smem:[%s8014_s0 + %s6763_s15]]   ;;  %s6767_s15 = smov 19  }
  0x1b   :  { %s6882_s27 = sld [smem:[%s8014_s0 + %s6764_s22]]   ;;  %s6768_s22 = smov 20  }
  0x1c   :  { %s6887_s4 = sld [smem:[%s8014_s0 + %s6765_s28]]   ;;  %s6769_s28 = smov 21  }
  0x1d   :  { %s6892_s19 = sld [smem:[%s8014_s0 + %s6766_s7]]   ;;  %s6770_s7 = smov 22  }
  0x1e   :  { %s6897_s14 = sld [smem:[%s8014_s0 + %s6767_s15]]   ;;  %s6771_s15 = smov 23  }
  0x1f   :  { %s6902_s24 = sld [smem:[%s8014_s0 + %s6768_s22]]   ;;  %s6772_s22 = smov 24  }
  0x20   :  { %s6912_s29 = sld [smem:[%s8014_s0 + %s6770_s7]]   ;;  %s6774_s7 = smov 26  }
  0x21   :  { %8038 = sst [smem:[#allocation24_spill]] %s6882_s27 }
  0x22   :  { %8039 = sst [smem:[#allocation25_spill]] %s6887_s4 }
  0x23   :  { %s6907_s4 = sld [smem:[%s8014_s0 + %s6769_s28]]   ;;  %s6773_s28 = smov 25  }
  0x24   :  { %s6917_s17 = sld [smem:[%s8014_s0 + %s6771_s15]]   ;;  %s6775_s15 = smov 27  }
  0x25   :  { %s6922_s13 = sld [smem:[%s8014_s0 + %s6772_s22]]   ;;  %s6776_s22 = smov 28  }
  0x26   :  { %8040 = sst [smem:[#allocation26_spill]] %s6912_s29 }
  0x27   :  { %s6927_s25 = sld [smem:[%s8014_s0 + %s6773_s28]]   ;;  %s6777_s28 = smov 29  }
  0x28   :  { %s6932_s29 = sld [smem:[%s8014_s0 + %s6774_s7]]   ;;  %s6778_s7 = smov 30  }
  0x29   :  { %s6937_s21 = sld [smem:[%s8014_s0 + %s6775_s15]]   ;;  %s6779_s15 = smov 31  }
  0x2a   :  { %s6942_s6 = sld [smem:[%s8014_s0 + %s6776_s22]]   ;;  %s6780_s22 = smov 32  }
  0x2b   :  { %s6952_s27 = sld [smem:[%s8014_s0 + %s6778_s7]]   ;;  %s6782_s7 = smov 34  }
  0x2c   :  { %s6957_s30 = sld [smem:[%s8014_s0 + %s6779_s15]]  }
  0x2d   :  { %8041 = sst [smem:[#allocation27_spill]] %s6927_s25 }
  0x2e   :  { %s6947_s25 = sld [smem:[%s8014_s0 + %s6777_s28]]   ;;  %s6781_s28 = smov 33  }
  0x30   :  { %8042 = sst [smem:[#allocation28_spill]] %s6942_s6 }
  0x31   :  { %8044 = sst [smem:[#allocation30_spill]] %s6952_s27 }
  0x32   :  { %s6962_s6 = sld [smem:[%s8014_s0 + %s6780_s22]]  }
  0x33   :  { %s6972_s27 = sld [smem:[%s8014_s0 + %s6782_s7]]  }
  0x34   :  { %8043 = sst [smem:[#allocation29_spill]] %s6947_s25 }
  0x35   :  { %s6967_s25 = sld [smem:[%s8014_s0 + %s6781_s28]]  }
  0x36   :  { %75 = vsyncpa [#allocation9], 0 }
  0x37   :  { %76 = vsyncpa [#allocation11], 0  ;;  %s6783_s15 = smov [#allocation8]   ;;  %s6685_s18 = scalar_lea.hbm %s6902_s24, 32 }
  0x38   :  { %s120_s16 = sshll.u32 %s6783_s15, 4  ;;  %p6686_p0 = scmp.ne.s32.totalorder %s6902_s24, %s6685_s18  ;;  %s121_s16 = int_to_ptr.vmem [resolvable:$true] %s120_s16 }
  0x39   :  { %p6689_p1 = scmp.lt.u32.totalorder %s6685_s18, %s6902_s24 }
  0x3b   :  { %p6691_p2 = pnand %p6689_p1, %p6686_p0 }
  0x3d   :  { %6694 = shalt.err (!%p6691_p2)
}
  0x3e   :  { %s6695_s22 = scalar_lea.vmem %s121_s16, 32  ;;  %p6700_p4 = scmp.lt.s32.totalorder %s121_s16, %s121_s16 }
  0x3f   :  { %p6696_p3 = scmp.ne.s32.totalorder %s121_s16, %s6695_s22  ;;  %p6701_p5 = scmp.lt.s32.totalorder %s6695_s22, %s6695_s22 }
  0x41   :  { %p6702_p6 = por %p6701_p5, %p6700_p4 }
  0x43   :  { %p6703_p7 = pnand %p6702_p6, %p6696_p3 }
  0x45   :  { %6706 = shalt.err (!%p6703_p7)
}
  0x46   :  { %s6784_s0 = smov 16   ;;  %s6785_s23 = smov 1  }
  0x47   :  { %126 = dma.hbm_to_vmem [thread:$0]  %s6902_s24, 32, %s121_s16, [#allocation9], %s6784_s0, %s6784_s0, %s6785_s23  }
  0x48   :  { %s6786_s26 = smov [#allocation10]   ;;  %s6707_s1 = scalar_lea.hbm %s6907_s4, 32 }
  0x49   :  { %s132_s28 = sshll.u32 %s6786_s26, 4  ;;  %p6708_p8 = scmp.ne.s32.totalorder %s6907_s4, %s6707_s1  ;;  %s133_s28 = int_to_ptr.vmem [resolvable:$true] %s132_s28 }
  0x4a   :  { %p6711_p9 = scmp.lt.u32.totalorder %s6707_s1, %s6907_s4 }
  0x4c   :  { %p6713_p10 = pnand %p6711_p9, %p6708_p8 }
  0x4e   :  { %6716 = shalt.err (!%p6713_p10)
}
  0x4f   :  { %s6717_s2 = scalar_lea.vmem %s133_s28, 32  ;;  %p6722_p12 = scmp.lt.s32.totalorder %s133_s28, %s133_s28 }
  0x50   :  { %p6718_p11 = scmp.ne.s32.totalorder %s133_s28, %s6717_s2  ;;  %p6723_p13 = scmp.lt.s32.totalorder %s6717_s2, %s6717_s2 }
  0x52   :  { %p6724_p0 = por %p6723_p13, %p6722_p12 }
  0x54   :  { %p6725_p1 = pnand %p6724_p0, %p6718_p11 }
  0x56   :  { %6728 = shalt.err (!%p6725_p1)
}
  0x57   :  { %138 = dma.hbm_to_vmem [thread:$0]  %s6907_s4, 32, %s133_s28, [#allocation11], %s6784_s0, %s6784_s0, %s6785_s23  }
  0x58   :  { %6737 = dma.done.wait [#allocation9], 32  }
  0x59   :  { %6738 = vsyncadd [#allocation9], 4294967264 }
  0x5a   :  { %6739 = dma.done.wait [#allocation11], 32  }
  0x5b   :  { %6740 = vsyncadd [#allocation11], 4294967264  ;;  %vm169_vm0 = vcmask 254976   ;;  %vm171_vm1 = vcmask 261120   ;;  %v6787_v0 = vmov 0   ;;  %v6788_v1 = vmov 0.0  }
  0x5c   :  { %170 = vst.msk [vmem:[%s6972_s27] sm:$0x3] %vm169_vm0, %v6787_v0  ;;  %v6789_v2 = vmov 0.0|0.0   ;;  %vm6790_vm2 = vmmov 0   ;;  %v234_v3 = vld [vmem:[%s6917_s17] sm:$0xff]  ;;  %v235_v4 = vld [vmem:[%s6917_s17 + $0x8] sm:$0xff] }
  0x5d   :  { %173 = vst.msk [vmem:[#allocation2 + $0x8] sm:$0xff] %vm171_vm1, %v6788_v1  ;;  %174 = vst.msk [vmem:[#allocation2 + $0x10] sm:$0xff] %vm171_vm1, %v6788_v1  ;;  %6259 = vmatprep.subr.bf16.mxu0 %v6789_v2  ;;  %6265 = vmatprep.subr.bf16.mxu1 %v6789_v2  ;;  %v311_v5 = vld [vmem:[%s6922_s13] sm:$0xff]  ;;  %v6260_v6 = vpack.c.bf16 %v235_v4, %v234_v3  ;;  %v312_v7 = vld [vmem:[%s6922_s13 + $0x8] sm:$0xff]  ;;  %vm229_vm3 = vcmask 253952   ;;  %vm389_vm4 = vcmask 1040384  }
  0x5e   :  { %175 = vst.msk [vmem:[#allocation2 + $0x18] sm:$0xff] %vm171_vm1, %v6788_v1  ;;  %176 = vst.msk [vmem:[#allocation2 + $0x20] sm:$0xff] %vm171_vm1, %v6788_v1  ;;  %5667 = vmatprep.mubr.msk.f32.mxu0 %vm6790_vm2, %v6788_v1  ;;  %5678 = vmatprep.mubr.msk.f32.mxu1 %vm6790_vm2, %v6788_v1  ;;  %v236_v8 = vld [vmem:[%s6917_s17 + $0x10] sm:$0xff]  ;;  %v237_v9 = vld [vmem:[%s6917_s17 + $0x18] sm:$0xff]  ;;  %v6266_v10 = vpack.c.bf16 %v312_v7, %v311_v5 }
  0x5f   :  { %178 = vst.msk [vmem:[#allocation2 + $0x30] sm:$0xff] %vm171_vm1, %v6788_v1  ;;  %179 = vst.msk [vmem:[#allocation2 + $0x38] sm:$0xff] %vm171_vm1, %v6788_v1  ;;  %v313_v11 = vld [vmem:[%s6922_s13 + $0x10] sm:$0xff]  ;;  %v314_v12 = vld [vmem:[%s6922_s13 + $0x18] sm:$0xff]  ;;  %6261 = vmatpush3.bf16.msra.mxu0 %v6260_v6  ;;  %v6263_v13 = vpack.c.bf16 %v237_v9, %v236_v8 }
  0x60   :  { %180 = vst.msk [vmem:[#allocation2 + $0x40] sm:$0xff] %vm171_vm1, %v6788_v1  ;;  %181 = vst.msk [vmem:[#allocation2 + $0x48] sm:$0xff] %vm171_vm1, %v6788_v1  ;;  %6267 = vmatpush3.bf16.msra.mxu1 %v6266_v10  ;;  %6262 = vmatprep.subr.bf16.mxu0 %v6789_v2  ;;  %v6269_v14 = vpack.c.bf16 %v314_v12, %v313_v11  ;;  %v228_v15 = vld [vmem:[%s6892_s19] sm:$0x1]  ;;  %v5197_v19 = vld [vmem:[%s6917_s17 + $0x28] sm:$0xff] }
  0x61   :  { %183 = vst.msk [vmem:[#allocation2 + $0x58] sm:$0xff] %vm171_vm1, %v6788_v1  ;;  %184 = vst.msk [vmem:[#allocation2 + $0x60] sm:$0xff] %vm171_vm1, %v6788_v1  ;;  %6268 = vmatprep.subr.bf16.mxu1 %v6789_v2  ;;  %v231_v16 = vld [vmem:[%s6897_s14] sm:$0x1]  ;;  %v5202_v21 = vld [vmem:[%s6922_s13 + $0x28] sm:$0xff] }
  0x62   :  { %185 = vst.msk [vmem:[#allocation2 + $0x68] sm:$0xff] %vm171_vm1, %v6788_v1  ;;  %186 = vst.msk [vmem:[#allocation2 + $0x70] sm:$0xff] %vm171_vm1, %v6788_v1  ;;  %v233_v17 = vld [vmem:[%s6837_s3] sm:$0xff]  ;;  %v5191_v22 = vld [vmem:[%s6837_s3 + $0x8] sm:$0xff] }
  0x63   :  { %188 = vst.msk [vmem:[#allocation2 + $0x80] sm:$0xff] %vm171_vm1, %v6788_v1  ;;  %189 = vst.msk [vmem:[#allocation2 + $0x88] sm:$0xff] %vm171_vm1, %v6788_v1  ;;  %6264 = vmatpush3.bf16.msra.mxu0 %v6263_v13  ;;  %v5196_v18 = vld [vmem:[%s6917_s17 + $0x20] sm:$0xff]  ;;  %v5198_v25 = vld [vmem:[%s6917_s17 + $0x30] sm:$0xff] }
  0x64   :  { %190 = vst.msk [vmem:[#allocation2 + $0x90] sm:$0xff] %vm171_vm1, %v6788_v1  ;;  %191 = vst.msk [vmem:[#allocation2 + $0x98] sm:$0xff] %vm171_vm1, %v6788_v1  ;;  %6270 = vmatpush3.bf16.msra.mxu1 %v6269_v14  ;;  %6271 = vmatprep.subr.bf16.mxu0 %v6789_v2  ;;  %v5201_v20 = vld [vmem:[%s6922_s13 + $0x20] sm:$0xff]  ;;  %v6284_v23 = vpack.c.bf16 %v5197_v19, %v5196_v18  ;;  %v5199_v26 = vld [vmem:[%s6917_s17 + $0x38] sm:$0xff] }
  0x65   :  { %193 = vst.msk [vmem:[#allocation3 + $0x8] sm:$0xff] %vm171_vm1, %v6788_v1  ;;  %194 = vst.msk [vmem:[#allocation3 + $0x10] sm:$0xff] %vm171_vm1, %v6788_v1  ;;  %6277 = vmatprep.subr.bf16.mxu1 %v6789_v2  ;;  %v6290_v24 = vpack.c.bf16 %v5202_v21, %v5201_v20  ;;  %v5203_v27 = vld [vmem:[%s6922_s13 + $0x30] sm:$0xff]  ;;  %v5204_v28 = vld [vmem:[%s6922_s13 + $0x38] sm:$0xff]  ;;  %v6287_v29 = vpack.c.bf16 %v5199_v26, %v5198_v25  ;;  %s924_s13 = sadd.s32 5, %s6802_s5 }
  0x66   :  { %195 = vst.msk [vmem:[#allocation3 + $0x18] sm:$0xff] %vm171_vm1, %v6788_v1  ;;  %196 = vst.msk [vmem:[#allocation3 + $0x20] sm:$0xff] %vm171_vm1, %v6788_v1  ;;  %5668 = vmatmul.mubr.msk.f32.vlgmr.msra.gmra.mrb[0].mxu0 %vm171_vm1, %v233_v17  ;;  %v6293_v30 = vpack.c.bf16 %v5204_v28, %v5203_v27  ;;  %v400_v31 = vld [vmem:[%s6892_s19] sm:$0x1]  ;;  %v5194_v33 = vld [vmem:[%s6892_s19 + $0x1] sm:$0x1] }
  0x67   :  { %198 = vst.msk [vmem:[#allocation3 + $0x30] sm:$0xff] %vm171_vm1, %v6788_v1  ;;  %199 = vst.msk [vmem:[#allocation3 + $0x38] sm:$0xff] %vm171_vm1, %v6788_v1  ;;  %5679 = vmatmul.mubr.msk.f32.vlgmr.msra.gmra.mrb[0].mxu1 %vm171_vm1, %v233_v17  ;;  %6273 = vmatpush3.bf16.msra.mxu0 %v6260_v6  ;;  %v402_v32 = vld [vmem:[%s6897_s14] sm:$0x1]  ;;  %v5195_v34 = vld [vmem:[%s6897_s14 + $0x1] sm:$0x1] }
  0x68   :  { %200 = vst.msk [vmem:[#allocation3 + $0x40] sm:$0xff] %vm171_vm1, %v6788_v1  ;;  %201 = vst.msk [vmem:[#allocation3 + $0x48] sm:$0xff] %vm171_vm1, %v6788_v1  ;;  %6279 = vmatpush3.bf16.msra.mxu1 %v6266_v10  ;;  %6274 = vmatprep.subr.bf16.mxu0 %v6789_v2  ;;  %v5208_v35 = vld [vmem:[%s6892_s19 + $0x1] sm:$0x1]  ;;  %v917_v37 = vld [vmem:[%s6807_s9] sm:$0x1] }
  0x69   :  { %203 = vst.msk [vmem:[#allocation3 + $0x58] sm:$0xff] %vm171_vm1, %v6788_v1  ;;  %204 = vst.msk [vmem:[#allocation3 + $0x60] sm:$0xff] %vm171_vm1, %v6788_v1  ;;  %6280 = vmatprep.subr.bf16.mxu1 %v6789_v2  ;;  %5689 = vmatprep.mubr.msk.f32.mxu0 %vm6790_vm2, %v6788_v1  ;;  %v5209_v36 = vld [vmem:[%s6897_s14 + $0x1] sm:$0x1]  ;;  %v918_v38 = vld [vmem:[%s6807_s9 + $0x20] sm:$0x1] }
  0x6a   :  { %205 = vst.msk [vmem:[#allocation3 + $0x68] sm:$0xff] %vm171_vm1, %v6788_v1  ;;  %206 = vst.msk [vmem:[#allocation3 + $0x70] sm:$0xff] %vm171_vm1, %v6788_v1  ;;  %5700 = vmatprep.mubr.msk.f32.mxu1 %vm6790_vm2, %v6788_v1  ;;  %v920_v39 = vrot.slane %v918_v38, 7  ;;  %v385_v42 = vld [vmem:[%s6932_s29] sm:$0x1]  ;;  %p5223_p2 = scmp.le.s32.totalorder %s924_s13, 0 }
  0x6b   :  { %208 = vst.msk [vmem:[#allocation3 + $0x80] sm:$0xff] %vm171_vm1, %v6788_v1  ;;  %209 = vst.msk [vmem:[#allocation3 + $0x88] sm:$0xff] %vm171_vm1, %v6788_v1  ;;  %6276 = vmatpush3.bf16.msra.mxu0 %v6263_v13  ;;  %v393_v45 = vld [vmem:[%s6937_s21] sm:$0x1]  ;;  %v5206_v62 = vld [vmem:[%s6932_s29 + $0x1] sm:$0x1] }
  0x6c   :  { %210 = vst.msk [vmem:[#allocation3 + $0x90] sm:$0xff] %vm171_vm1, %v6788_v1  ;;  %211 = vst.msk [vmem:[#allocation3 + $0x98] sm:$0xff] %vm171_vm1, %v6788_v1  ;;  %6282 = vmatpush3.bf16.msra.mxu1 %v6269_v14  ;;  %6283 = vmatprep.subr.bf16.mxu0 %v6789_v2  ;;  %v922_v40 = vsel %vm389_vm4, %v917_v37, %v920_v39   ;;  %v557_v52 = vld [vmem:[%s6932_s29] sm:$0x1]  ;;  %v5221_v8 = vld [vmem:[%s6932_s29 + $0x1] sm:$0x1] }
  0x6d   :  { %172 = vst.msk [vmem:[#allocation2] sm:$0xff] %vm171_vm1, %v6788_v1  ;;  %177 = vst.msk [vmem:[#allocation2 + $0x28] sm:$0xff] %vm171_vm1, %v6788_v1  ;;  %6289 = vmatprep.subr.bf16.mxu1 %v6789_v2  ;;  %v564_v55 = vld [vmem:[%s6937_s21] sm:$0x1]  ;;  %v5222_v11 = vld [vmem:[%s6937_s21 + $0x1] sm:$0x1] }
  0x6e   :  { %182 = vst.msk [vmem:[#allocation2 + $0x50] sm:$0xff] %vm171_vm1, %v6788_v1  ;;  %187 = vst.msk [vmem:[#allocation2 + $0x78] sm:$0xff] %vm171_vm1, %v6788_v1  ;;  %5690 = vmatmul.mubr.msk.f32.vlgmr.msra.gmra.mrb[2].mxu0 %vm171_vm1, %v5191_v22  ;;  %s7210_s17 = smov (!%p5223_p2), 0  }
  0x6f   :  { %192 = vst.msk [vmem:[#allocation3] sm:$0xff] %vm171_vm1, %v6788_v1  ;;  %197 = vst.msk [vmem:[#allocation3 + $0x28] sm:$0xff] %vm171_vm1, %v6788_v1  ;;  %5701 = vmatmul.mubr.msk.f32.vlgmr.msra.gmra.mrb[2].mxu1 %vm171_vm1, %v5191_v22  ;;  %6285 = vmatpush3.bf16.msra.mxu0 %v6284_v23 }
  0x70   :  { %202 = vst.msk [vmem:[#allocation3 + $0x50] sm:$0xff] %vm171_vm1, %v6788_v1  ;;  %207 = vst.msk [vmem:[#allocation3 + $0x78] sm:$0xff] %vm171_vm1, %v6788_v1  ;;  %6291 = vmatpush3.bf16.msra.mxu1 %v6290_v24  ;;  %6286 = vmatprep.subr.bf16.mxu0 %v6789_v2 }
  0x71   :  { %212 = vst.msk [vmem:[#allocation4] sm:$0xff] %vm171_vm1, %v6788_v1  ;;  %213 = vst.msk [vmem:[#allocation4 + $0x8] sm:$0xff] %vm171_vm1, %v6788_v1  ;;  %6292 = vmatprep.subr.bf16.mxu1 %v6789_v2  ;;  %5711 = vmatprep.mubr.msk.f32.mxu0 %vm6790_vm2, %v6788_v1 }
  0x72   :  { %214 = vst.msk [vmem:[#allocation4 + $0x10] sm:$0xff] %vm171_vm1, %v6788_v1  ;;  %215 = vst.msk [vmem:[#allocation4 + $0x18] sm:$0xff] %vm171_vm1, %v6788_v1  ;;  %5722 = vmatprep.mubr.msk.f32.mxu1 %vm6790_vm2, %v6788_v1 }
  0x73   :  { %216 = vst.msk [vmem:[#allocation4 + $0x20] sm:$0xff] %vm171_vm1, %v6788_v1  ;;  %217 = vst.msk [vmem:[#allocation4 + $0x28] sm:$0xff] %vm171_vm1, %v6788_v1  ;;  %6288 = vmatpush3.bf16.msra.mxu0 %v6287_v29 }
  0x74   :  { %218 = vst.msk [vmem:[#allocation4 + $0x30] sm:$0xff] %vm171_vm1, %v6788_v1  ;;  %219 = vst.msk [vmem:[#allocation4 + $0x38] sm:$0xff] %vm171_vm1, %v6788_v1  ;;  %6294 = vmatpush3.bf16.msra.mxu1 %v6293_v30  ;;  %6295 = vmatprep.subr.bf16.mxu0 %v6789_v2 }
  0x75   :  { %220 = vst.msk [vmem:[#allocation5] sm:$0xff] %vm171_vm1, %v6788_v1  ;;  %221 = vst.msk [vmem:[#allocation5 + $0x8] sm:$0xff] %vm171_vm1, %v6788_v1  ;;  %6301 = vmatprep.subr.bf16.mxu1 %v6789_v2 }
  0x76   :  { %222 = vst.msk [vmem:[#allocation5 + $0x10] sm:$0xff] %vm171_vm1, %v6788_v1  ;;  %223 = vst.msk [vmem:[#allocation5 + $0x18] sm:$0xff] %vm171_vm1, %v6788_v1  ;;  %5712 = vmatmul.mubr.msk.f32.vlgmr.msra.gmra.mrb[4].mxu0 %vm171_vm1, %v233_v17 }
  0x77   :  { %224 = vst.msk [vmem:[#allocation5 + $0x20] sm:$0xff] %vm171_vm1, %v6788_v1  ;;  %225 = vst.msk [vmem:[#allocation5 + $0x28] sm:$0xff] %vm171_vm1, %v6788_v1  ;;  %5723 = vmatmul.mubr.msk.f32.vlgmr.msra.gmra.mrb[4].mxu1 %vm171_vm1, %v233_v17  ;;  %6297 = vmatpush3.bf16.msra.mxu0 %v6284_v23 }
  0x78   :  { %226 = vst.msk [vmem:[#allocation5 + $0x30] sm:$0xff] %vm171_vm1, %v6788_v1  ;;  %227 = vst.msk [vmem:[#allocation5 + $0x38] sm:$0xff] %vm171_vm1, %v6788_v1  ;;  %6303 = vmatpush3.bf16.msra.mxu1 %v6290_v24  ;;  %6298 = vmatprep.subr.bf16.mxu0 %v6789_v2 }
  0x79   :  { %230 = vst.msk [vmem:[#allocation2] sm:$0x1] %vm229_vm3, %v228_v15  ;;  %232 = vst.msk [vmem:[#allocation3] sm:$0x1] %vm229_vm3, %v231_v16  ;;  %6304 = vmatprep.subr.bf16.mxu1 %v6789_v2  ;;  %5733 = vmatprep.mubr.msk.f32.mxu0 %vm6790_vm2, %v6788_v1 }
  0x7a   :  { %5744 = vmatprep.mubr.msk.f32.mxu1 %vm6790_vm2, %v6788_v1  ;;  %401 = vst.msk [vmem:[#allocation2 + $0x28] sm:$0x1] %vm229_vm3, %v400_v31  ;;  %403 = vst.msk [vmem:[#allocation3 + $0x28] sm:$0x1] %vm229_vm3, %v402_v32  ;;  %v5207_v1 = vld [vmem:[%s6937_s21 + $0x1] sm:$0x1] }
  0x7b   :  { %6300 = vmatpush3.bf16.msra.mxu0 %v6287_v29  ;;  %573 = vst.msk [vmem:[#allocation2 + $0x50] sm:$0x1] %vm229_vm3, %v5194_v33  ;;  %576 = vst.msk [vmem:[#allocation3 + $0x50] sm:$0x1] %vm229_vm3, %v5195_v34 }
  0x7c   :  { %6306 = vmatpush3.bf16.msra.mxu1 %v6293_v30  ;;  %748 = vst.msk [vmem:[#allocation2 + $0x78] sm:$0x1] %vm229_vm3, %v5208_v35  ;;  %750 = vst.msk [vmem:[#allocation3 + $0x78] sm:$0x1] %vm229_vm3, %v5209_v36 }
  0x7e   :  { %5734 = vmatmul.mubr.msk.f32.vlgmr.msra.gmra.mrb[6].mxu0 %vm171_vm1, %v5191_v22 }
  0x7f   :  { %5745 = vmatmul.mubr.msk.f32.vlgmr.msra.gmra.mrb[6].mxu1 %vm171_vm1, %v5191_v22 }
 0x139   :  { %v307_v41 = vpop.f32.mrb[0].mxu0 }
 0x13a   :  { %v387_v43 = vrot.slane %v307_v41, 7  ;;  %v381_v44 = vpop.f32.mrb[0].mxu1  ;;  %v5669_v46 = vpop.f32.mrb[1].mxu0 }
 0x13b   :  { %v395_v47 = vrot.slane %v381_v44, 7  ;;  %v5680_v48 = vpop.f32.mrb[1].mxu1 }
 0x13c   :  { %v390_v49 = vsel %vm389_vm4, %v385_v42, %v387_v43  ;;  %392 = vst.msk [vmem:[#allocation4 + $0x8] sm:$0x1] %vm229_vm3, %v387_v43 }
 0x13d   :  { %391 = vst.msk [vmem:[#allocation4] sm:$0xff] %vm171_vm1, %v390_v49  ;;  %v397_v50 = vsel %vm389_vm4, %v393_v45, %v395_v47 }
 0x13e   :  { %399 = vst.msk [vmem:[#allocation5 + $0x8] sm:$0x1] %vm229_vm3, %v395_v47 }
 0x13f   :  { %398 = vst.msk [vmem:[#allocation5] sm:$0xff] %vm171_vm1, %v397_v50 }
 0x141   :  { %v479_v51 = vpop.f32.mrb[2].mxu0 }
 0x142   :  { %v559_v53 = vrot.slane %v479_v51, 7  ;;  %v553_v54 = vpop.f32.mrb[2].mxu1  ;;  %v5691_v56 = vpop.f32.mrb[3].mxu0 }
 0x143   :  { %v566_v57 = vrot.slane %v553_v54, 7  ;;  %v5702_v58 = vpop.f32.mrb[3].mxu1 }
 0x144   :  { %v561_v59 = vsel %vm389_vm4, %v557_v52, %v559_v53  ;;  %563 = vst.msk [vmem:[#allocation4 + $0x18] sm:$0x1] %vm229_vm3, %v559_v53 }
 0x145   :  { %562 = vst.msk [vmem:[#allocation4 + $0x10] sm:$0xff] %vm171_vm1, %v561_v59  ;;  %v568_v60 = vsel %vm389_vm4, %v564_v55, %v566_v57 }
 0x146   :  { %570 = vst.msk [vmem:[#allocation5 + $0x18] sm:$0x1] %vm229_vm3, %v566_v57 }
 0x147   :  { %569 = vst.msk [vmem:[#allocation5 + $0x10] sm:$0xff] %vm171_vm1, %v568_v60 }
 0x149   :  { %v652_v61 = vpop.f32.mrb[4].mxu0 }
 0x14a   :  { %v734_v63 = vrot.slane %v652_v61, 7  ;;  %v727_v0 = vpop.f32.mrb[4].mxu1  ;;  %v5713_v2 = vpop.f32.mrb[5].mxu0 }
 0x14b   :  { %v742_v3 = vrot.slane %v727_v0, 7  ;;  %v5724_v4 = vpop.f32.mrb[5].mxu1 }
 0x14c   :  { %v736_v5 = vsel %vm389_vm4, %v5206_v62, %v734_v63  ;;  %738 = vst.msk [vmem:[#allocation4 + $0x28] sm:$0x1] %vm229_vm3, %v734_v63 }
 0x14d   :  { %737 = vst.msk [vmem:[#allocation4 + $0x20] sm:$0xff] %vm171_vm1, %v736_v5  ;;  %v744_v6 = vsel %vm389_vm4, %v5207_v1, %v742_v3 }
 0x14e   :  { %746 = vst.msk [vmem:[#allocation5 + $0x28] sm:$0x1] %vm229_vm3, %v742_v3 }
 0x14f   :  { %745 = vst.msk [vmem:[#allocation5 + $0x20] sm:$0xff] %vm171_vm1, %v744_v6 }
 0x151   :  { %v825_v7 = vpop.f32.mrb[6].mxu0  ;;  %5150 = sbr.rel (%p5223_p2) target bundleno = 9358 (0x248e), region = 230 }
 0x152   :  { %v905_v9 = vrot.slane %v825_v7, 7  ;;  %v899_v10 = vpop.f32.mrb[6].mxu1  ;;  %v5735_v12 = vpop.f32.mrb[7].mxu0 }
 0x153   :  { %v912_v13 = vrot.slane %v899_v10, 7  ;;  %v5746_v14 = vpop.f32.mrb[7].mxu1 }
 0x154   :  { %v907_v15 = vsel %vm389_vm4, %v5221_v8, %v905_v9  ;;  %909 = vst.msk [vmem:[#allocation4 + $0x38] sm:$0x1] %vm229_vm3, %v905_v9 }
 0x155   :  { %908 = vst.msk [vmem:[#allocation4 + $0x30] sm:$0xff] %vm171_vm1, %v907_v15  ;;  %v914_v16 = vsel %vm389_vm4, %v5222_v11, %v912_v13 }
 0x156   :  { %916 = vst.msk [vmem:[#allocation5 + $0x38] sm:$0x1] %vm229_vm3, %v912_v13 }
 0x157   :  { %915 = vst.msk [vmem:[#allocation5 + $0x30] sm:$0xff] %vm171_vm1, %v914_v16 }
 0x158 LB: > { %v932_v17 = vld [vmem:[%s6842_s8] sm:$0xff]  ;;  %v933_v18 = vld [vmem:[%s6842_s8 + $0x8] sm:$0xff]  ;;  %v6791_v19 = vmov 0.0|0.0   ;;  %vm6792_vm5 = vmmov 0   ;;  %v6793_v21 = vmov 0.0   ;;  %vm935_vm6 = vcmask 138240   ;;  %s6747_s17 = sphi %s7210_s17, %s8062_s17   ;;  %v6743_v40 = vphi %v922_v40, %v5118_v40  }
 0x159   : > { %6307 = vmatprep.subr.bf16.mxu0 %v6791_v19  ;;  %v6308_v20 = vpack.c.bf16 %v933_v18, %v932_v17  ;;  %6310 = vmatprep.subr.bf16.mxu1 %v6791_v19  ;;  %v934_v22 = vld [vmem:[%s6842_s8 + $0x10] sm:$0x1]  ;;  %v1050_v31 = vld [vmem:[%s6872_s12] sm:$0xff]  ;;  %v1051_v32 = vld [vmem:[%s6872_s12 + $0x8] sm:$0xff]  ;;  %s8045_s21 = sld [smem:[#allocation22_spill]]  ;;  %s8046_s29 = sld [smem:[#allocation24_spill]] }
 0x15a   : > { %5753 = vmatprep.mubr.msk.f32.mxu0 %vm6792_vm5, %v6793_v21  ;;  %5764 = vmatprep.mubr.msk.f32.mxu1 %vm6792_vm5, %v6793_v21  ;;  %v1127_v33 = vld [vmem:[%s6877_s20] sm:$0xff]  ;;  %v6311_v34 = vpack.c.bf16 %v1051_v32, %v1050_v31  ;;  %v1128_v35 = vld [vmem:[%s6877_s20 + $0x8] sm:$0xff]  ;;  %v1052_v36 = vld [vmem:[%s6872_s12 + $0x10] sm:$0xff]  ;;  %s8047_s3 = sld [smem:[#allocation23_spill]]  ;;  %s8048_s14 = sld [smem:[#allocation16_spill]]  ;;  %vm1775_vm7 = vcmask 254977  }
 0x15b   : > { %6309 = vmatpush3.bf16.msra.mxu0 %v6308_v20  ;;  %v1053_v37 = vld [vmem:[%s6872_s12 + $0x18] sm:$0xff]  ;;  %v6317_v38 = vpack.c.bf16 %v1128_v35, %v1127_v33  ;;  %v1129_v39 = vld [vmem:[%s6877_s20 + $0x10] sm:$0xff]  ;;  %s8049_s19 = sld [smem:[#allocation17_spill]]  ;;  %s7288_s24 = scalar_lea.vmem [#allocation3], %s6747_s17  ;;  %v1450_v20 = vlaneseq  ;;  %vm1659_vm8 = vcmask 1041408   ;;  %vm1590_vm12 = vcmask 15360  }
 0x15c   : > { %5751 = vmatprep.subr.mxu0 %v6793_v21  ;;  %6312 = vmatpush3.bf16.msra.mxu1 %v6311_v34  ;;  %v6314_v41 = vpack.c.bf16 %v1053_v37, %v1052_v36  ;;  %s8050_s4 = sld [smem:[#allocation14_spill]]  ;;  %s8051_s7 = sld [smem:[#allocation15_spill]]  ;;  %vm1595_vm15 = vcmask 8192   ;;  %vm5081_vm2 = vcmask 132096  }
 0x15d   : > { %6313 = vmatprep.subr.bf16.mxu1 %v6791_v19  ;;  %v7329_v32 = vshrl.u32 %v1450_v20, 7  ;;  %s7332_s15 = scalar_lea.vmem [#allocation2], %s6747_s17  ;;  %s8052_s16 = sld [smem:[#allocation18_spill]] }
 0x15e   : > { %s7362_s18 = sadd.s32 1, %s6747_s17   ;;  %s8053_s22 = sld [smem:[#allocation25_spill]] }
 0x15f   : > { %5752 = vmatpush3.msk.msra.mxu0 %vm389_vm4, %v934_v22  ;;  %v5226_v47 = vld [vmem:[%s8045_s21] ss:$0 sm:$0xff]  ;;  %v1202_v50 = vld [vmem:[%s8046_s29 + $0x8] sm:$0xff]  ;;  %v1203_v57 = vld [vmem:[%s8046_s29 + $0x10] sm:$0xff]  ;;  %v7337_v34 = vsub.s32 0, %v7329_v32  ;;  %s8054_s0 = sld [smem:[#allocation26_spill]]  ;;  %p5110_p3 = scmp.lt.s32.totalorder %s7362_s18, %s6802_s5 }
 0x160   : > { %5754 = vmatmul.mubr.msk.f32.vlgmr.msra.gmra.mrb[0].mxu0 %vm935_vm6, %v6743_v40  ;;  %6316 = vmatprep.subr.bf16.mxu0 %v6791_v19  ;;  %v1130_v40 = vld [vmem:[%s6877_s20 + $0x18] sm:$0xff]  ;;  %v1201_v49 = vld [vmem:[%s8046_s29] sm:$0xff]  ;;  %v1017_v53 = vld [vmem:[%s8048_s14 + $0x8] sm:$0xff]  ;;  %s8055_s23 = sld [smem:[#allocation27_spill]]  ;;  %s8056_s26 = sld [smem:[#allocation30_spill]] }
 0x161   : > { %5775 = vmatprep.mubr.msk.f32.mxu0 %vm6792_vm5, %v6793_v21  ;;  %6318 = vmatpush3.bf16.msra.mxu0 %v6317_v38  ;;  %v6320_v42 = vpack.c.bf16 %v1130_v40, %v1129_v39  ;;  %v5227_v51 = vld [vmem:[%s8047_s3] ss:$0 sm:$0xff]  ;;  %v6323_v55 = vpack.c.bf16 %v1202_v50, %v1201_v49  ;;  %v1204_v58 = vld [vmem:[%s8046_s29 + $0x18] sm:$0xff]  ;;  %v1018_v60 = vld [vmem:[%s8048_s14 + $0x10] sm:$0xff]  ;;  %s8057_s28 = sld [smem:[#allocation28_spill]]  ;;  %s8058_s1 = sld [smem:[#allocation29_spill]] }
 0x162   : > { %6319 = vmatprep.subr.bf16.mxu0 %v6791_v19  ;;  %6315 = vmatpush3.bf16.msra.mxu1 %v6314_v41  ;;  %v1016_v52 = vld [vmem:[%s8048_s14] sm:$0xff]  ;;  %v1019_v61 = vld [vmem:[%s8048_s14 + $0x18] sm:$0xff]  ;;  %v6326_v62 = vpack.c.bf16 %v1204_v58, %v1203_v57  ;;  %v1460_v12 = vld [vmem:[%s8049_s19 + $0x8] sm:$0xff]  ;;  %s7318_s10 = scalar_lea.vmem %s8050_s4, %s6747_s17  ;;  %s7322_s11 = scalar_lea.vmem %s8051_s7, %s6747_s17  ;;  %v7376_v57 = vadd.s32 8, %v7329_v32 }
 0x163   : > { %6322 = vmatprep.subr.bf16.mxu1 %v6791_v19  ;;  %v7256_v59 = vpack.c.bf16 %v1017_v53, %v1016_v52  ;;  %v7266_v63 = vpack.c.bf16 %v1019_v61, %v1018_v60  ;;  %v1459_v11 = vld [vmem:[%s8049_s19] sm:$0xff]  ;;  %v1461_v13 = vld [vmem:[%s8049_s19 + $0x10] sm:$0xff]  ;;  %v1462_v15 = vld [vmem:[%s8049_s19 + $0x18] sm:$0xff]  ;;  %v7368_v53 = vadd.s32 24, %v7329_v32  ;;  %v7381_v60 = vadd.s32 32, %v7329_v32  ;;  %s8059_s2 = sld [smem:[#allocation21_spill]]  ;;  %s5143_s7 = scalar_lea.vmem %s6807_s9, %s6747_s17 }
 0x164   : > { %v7307_v14 = vpack.c.bf16 %v1460_v12, %v1459_v11  ;;  %v7311_v16 = vpack.c.bf16 %v1462_v15, %v1461_v13  ;;  %v5231_v17 = vld [vmem:[%s7318_s10] ss:$0 sm:$0xff]  ;;  %s8061_s4 = sld [smem:[#allocation20_spill]]  ;;  %p927_p4 = scmp.ge.s32.totalorder %s7362_s18, %s924_s13 }
 0x165   : > { %6321 = vmatpush3.bf16.msra.mxu0 %v6320_v42  ;;  %v5233_v18 = vld [vmem:[%s7322_s11] ss:$0 sm:$0xff]  ;;  %s8062_s17 = smov %s7362_s18 }
 0x166   : > { %6328 = vmatprep.subr.bf16.mxu0 %v6791_v19 }
 0x233   : > { %v7230_v23 = vpop.f32.mrb[0].mxu0 }
 0x234   : > { %v5755_v24 = vpop.f32.mrb[1].mxu0  ;;  %v1022_v25 = vsel %vm169_vm0, %v7230_v23, 0.0 }
 0x235   : > { %1023 = vadd.xlane.f32.xlu0 %v1022_v25 }
 0x2c2   : > { %v1024_v26 = vpop.xlane.xlu0 %1023 }
 0x2c3   : > { %v1026_v27 = vmul.f32 0.03125, %v1024_v26 }
 0x2c5   : > { %v1027_v28 = vsub.f32 %v7230_v23, %v1026_v27 }
 0x2c7   : > { %v1028_v29 = vmul.f32 %v1027_v28, %v1027_v28 }
 0x2c9   : > { %v1029_v30 = vsel %vm169_vm0, %v1028_v29, 0.0 }
 0x2ca   : > { %1030 = vadd.xlane.f32.xlu0 %v1029_v30 }
 0x357   : > { %v1031_v43 = vpop.xlane.xlu0 %1030 }
 0x358   : > { %v1032_v44 = vmul.f32 0.03125, %v1031_v43 }
 0x35a   : > { %v1033_v45 = vadd.f32 1e-05, %v1032_v44 }
 0x35c   : > { %6593 = vrsqrt.f32 %v1033_v45 }
 0x366   : > { %v6594_v46 = vpop.eup %6593 }
 0x367   : > { %v1035_v48 = vmul.f32 %v6594_v46, %v1027_v28  ;;  %v1643_v46 = vld [vmem:[%s8052_s16] sm:$0x3] }
 0x369   : > { %v1042_v54 = vmul.f32 %v5226_v47, %v1035_v48 }
 0x36b   : > { %v1049_v56 = vadd.f32 %v5227_v51, %v1042_v54  ;;  %v7365_v51 = vadd.s32 16, %v7329_v32  ;;  %v7371_v54 = vstv %s7362_s18 }
 0x36c   : > { %vm1583_vm10 = vcmp.le.s32.totalorder %v7368_v53, %v7371_v54  ;;  %vm1580_vm11 = vcmp.le.s32.totalorder %v7329_v32, %v7371_v54  ;;  %vm1581_vm13 = vcmp.le.s32.totalorder %v7376_v57, %v7371_v54  ;;  %vm1584_vm14 = vcmp.le.s32.totalorder %v7381_v60, %v7371_v54 }
 0x36d   : > { %5765 = vmatmul.mubr.msk.f32.vlgmr.msra.gmra.mrb[0].mxu1 %vm171_vm1, %v1049_v56  ;;  %5776 = vmatmul.mubr.msk.f32.vlgmr.msra.gmra.mrb[2].mxu0 %vm171_vm1, %v1049_v56  ;;  %vm1582_vm9 = vcmp.le.s32.totalorder %v7365_v51, %v7371_v54 }
 0x36e   : > { %6324 = vmatpush3.bf16.msra.mxu1 %v6323_v55  ;;  %5786 = vmatprep.mubr.msk.f32.mxu1 %vm6792_vm5, %v6793_v21 }
 0x36f   : > { %6325 = vmatprep.subr.bf16.mxu1 %v6791_v19  ;;  %6330 = vmatpush3.bf16.msra.mxu0 %v7256_v59 }
 0x370   : > { %6331 = vmatprep.subr.bf16.mxu0 %v6791_v19  ;;  %5797 = vmatprep.mubr.msk.f32.mxu0 %vm6792_vm5, %v6793_v21 }
 0x372   : > { %6327 = vmatpush3.bf16.msra.mxu1 %v6326_v62 }
 0x373   : > { %6334 = vmatprep.subr.bf16.mxu1 %v6791_v19  ;;  %6333 = vmatpush3.bf16.msra.mxu0 %v7266_v63 }
 0x374   : > { %6340 = vmatprep.subr.bf16.mxu0 %v6791_v19 }
 0x375   : > { %5787 = vmatmul.mubr.msk.f32.vlgmr.msra.gmra.mrb[2].mxu1 %vm171_vm1, %v1049_v56 }
 0x376   : > { %6336 = vmatpush3.bf16.msra.mxu1 %v7256_v59  ;;  %5808 = vmatprep.mubr.msk.f32.mxu1 %vm6792_vm5, %v6793_v21 }
 0x377   : > { %6337 = vmatprep.subr.bf16.mxu1 %v6791_v19 }
 0x37a   : > { %6339 = vmatpush3.bf16.msra.mxu1 %v7266_v63 }
 0x37b   : > { %5834 = vmatprep.subr.mxu1 %v6793_v21 }
 0x440   : > { %v1123_v0 = vpop.f32.mrb[0].mxu1  ;;  %v1197_v1 = vpop.f32.mrb[2].mxu0 }
 0x441   : > { %v5766_v2 = vpop.f32.mrb[1].mxu1  ;;  %v5777_v3 = vpop.f32.mrb[3].mxu0  ;;  %5798 = vmatmul.mubr.msk.f32.vlgmr.msra.gmra.mrb[4].mxu0 %vm171_vm1, %v1123_v0  ;;  %5809 = vmatmul.mubr.msk.f32.vlgmr.msra.gmra.mrb[4].mxu1 %vm171_vm1, %v1197_v1  ;;  %v1279_v25 = vmul.f32 %v5231_v17, %v1123_v0  ;;  %v1359_v26 = vmul.f32 %v5231_v17, %v1197_v1 }
 0x442   : > { %5819 = vmatprep.mubr.msk.f32.mxu0 %vm6792_vm5, %v6793_v21  ;;  %5836 = vmatprep.mubr.msk.f32.mxu1 %vm6792_vm5, %v6793_v21 }
 0x443   : > { %6342 = vmatpush3.bf16.msra.mxu0 %v7307_v14  ;;  %5835 = vmatpush3.msk.msra.mxu1 %vm1659_vm8, %v1643_v46 }
 0x444   : > { %6343 = vmatprep.subr.bf16.mxu0 %v6791_v19  ;;  %6346 = vmatprep.subr.bf16.mxu1 %v6791_v19 }
 0x447   : > { %6345 = vmatpush3.bf16.msra.mxu0 %v7311_v16 }
 0x448   : > { %v1271_v4 = vpop.f32.mrb[2].mxu1  ;;  %5874 = vmatprep.subr.mxu0 %v6793_v21 }
 0x449   : > { %5236 = vst.msk [vmem:[%s7288_s24 + $0x1] sm:$0x1] %vm229_vm3, %v1271_v4  ;;  %v5788_v5 = vpop.f32.mrb[3].mxu1 }
 0x450   : > { %v7292_v6 = vld [vmem:[#allocation3] sm:$0xff]  ;;  %v7294_v7 = vld [vmem:[#allocation3 + $0x8] sm:$0xff]  ;;  %v7296_v8 = vld [vmem:[#allocation3 + $0x10] sm:$0xff] }
 0x451   : > { %v7298_v9 = vld [vmem:[#allocation3 + $0x18] sm:$0xff]  ;;  %v7300_v10 = vld [vmem:[#allocation3 + $0x20] sm:$0x1] }
 0x452   : > { %5249 = vst.msk [vmem:[%s7288_s24 + $0x28] sm:$0x2] %vm1775_vm7, %v1271_v4 }
 0x514   : > { %v1349_v22 = vpop.f32.mrb[4].mxu0  ;;  %v1429_v24 = vpop.f32.mrb[4].mxu1 }
 0x515   : > { %v1357_v27 = vmul.f32 %v5233_v18, %v1349_v22  ;;  %v1433_v28 = vmul.f32 %v5233_v18, %v1429_v24  ;;  %v5799_v29 = vpop.f32.mrb[5].mxu0  ;;  %v5810_v30 = vpop.f32.mrb[5].mxu1 }
 0x517   : > { %v7326_v31 = vadd.f32 %v1357_v27, %v1279_v25  ;;  %v1434_v33 = vadd.f32 %v1433_v28, %v1359_v26 }
 0x519   : > { %5235 = vst.msk [vmem:[%s7332_s15 + $0x1] sm:$0x1] %vm229_vm3, %v1434_v33  ;;  %v1453_v35 = vrot.slane %v7326_v31, %v7337_v34 }
 0x520   : > { %v1440_v36 = vld [vmem:[#allocation2] sm:$0xff]  ;;  %v1441_v37 = vld [vmem:[#allocation2 + $0x8] sm:$0xff]  ;;  %v1442_v38 = vld [vmem:[#allocation2 + $0x10] sm:$0xff] }
 0x521   : > { %v1454_v39 = vmul.f32 %v1453_v35, %v1440_v36  ;;  %v1443_v40 = vld [vmem:[#allocation2 + $0x18] sm:$0xff]  ;;  %v1444_v41 = vld [vmem:[#allocation2 + $0x20] sm:$0x1]  ;;  %v1455_v42 = vmul.f32 %v1453_v35, %v1441_v37  ;;  %v1456_v43 = vmul.f32 %v1453_v35, %v1442_v38 }
 0x522   : > { %5248 = vst.msk [vmem:[%s7332_s15 + $0x28] sm:$0x2] %vm1775_vm7, %v1434_v33  ;;  %v1457_v44 = vmul.f32 %v1453_v35, %v1443_v40  ;;  %v1458_v45 = vmul.f32 %v1453_v35, %v1444_v41 }
 0x523   : > { %5820 = vmatmul.mubr.msk.f32.vlgmr.msra.gmra.mrb[6].mxu0 %vm171_vm1, %v1454_v39 }
 0x524   : > { %5822 = vmatprep.mubr.msk.f32.mxu0 %vm6792_vm5, %v6793_v21 }
 0x527   : > { %5823 = vmatmul.mubr.msk.f32.gmra.mrb[8].mxu0 %vm171_vm1, %v1455_v42 }
 0x528   : > { %5825 = vmatprep.mubr.msk.f32.mxu0 %vm6792_vm5, %v6793_v21 }
 0x52b   : > { %5826 = vmatmul.mubr.msk.f32.gmra.mrb[10].mxu0 %vm171_vm1, %v1456_v43 }
 0x52c   : > { %5828 = vmatprep.mubr.msk.f32.mxu0 %vm6792_vm5, %v6793_v21 }
 0x52f   : > { %5829 = vmatmul.mubr.msk.f32.gmra.mrb[12].mxu0 %vm171_vm1, %v1457_v44 }
 0x530   : > { %5831 = vmatprep.mubr.msk.f32.mxu0 %vm6792_vm5, %v6793_v21 }
 0x533   : > { %5832 = vmatmul.mubr.msk.f32.gmra.mrb[14].mxu0 %vm171_vm1, %v1458_v45 }
 0x534   : > { %5876 = vmatprep.mubr.msk.f32.mxu0 %vm6792_vm5, %v6793_v21 }
 0x5f6   : > { %v1544_v47 = vpop.f32.mrb[6].mxu0 }
 0x5f7   : > { %v5821_v48 = vpop.f32.mrb[7].mxu0  ;;  %v1568_v61 = vmul.f32 0.25, %v1544_v47 }
 0x5f9   : > { %v1585_v12 = vsel %vm1580_vm11, %v1568_v61, -1e+30 }
 0x5fa   : > { %v1549_v49 = vpop.f32.mrb[8].mxu0  ;;  %v1591_v24 = vsel %vm1590_vm12, %v1585_v12, -inf }
 0x5fb   : > { %v5824_v50 = vpop.f32.mrb[9].mxu0  ;;  %v1569_v2 = vmul.f32 0.25, %v1549_v49 }
 0x5fd   : > { %v1586_v18 = vsel %vm1581_vm13, %v1569_v2, -1e+30 }
 0x5fe   : > { %v1554_v52 = vpop.f32.mrb[10].mxu0  ;;  %v1592_v27 = vsel %vm1590_vm12, %v1586_v18, -inf }
 0x5ff   : > { %v1570_v55 = vmul.f32 0.25, %v1554_v52  ;;  %v5827_v56 = vpop.f32.mrb[11].mxu0 }
 0x601   : > { %v1587_v62 = vsel %vm1582_vm9, %v1570_v55, -1e+30 }
 0x602   : > { %v1559_v58 = vpop.f32.mrb[12].mxu0  ;;  %v1593_v4 = vsel %vm1590_vm12, %v1587_v62, -inf }
 0x603   : > { %v1571_v0 = vmul.f32 0.25, %v1559_v58  ;;  %v5830_v1 = vpop.f32.mrb[13].mxu0 }
 0x605   : > { %v1588_v3 = vsel %vm1583_vm10, %v1571_v0, -1e+30 }
 0x606   : > { %v1594_v5 = vsel %vm1590_vm12, %v1588_v3, -inf  ;;  %v1564_v11 = vpop.f32.mrb[14].mxu0 }
 0x607   : > { %v1599_v13 = vmax.f32 %v1593_v4, %v1594_v5  ;;  %v1572_v15 = vmul.f32 0.25, %v1564_v11  ;;  %v5833_v17 = vpop.f32.mrb[15].mxu0 }
 0x609   : > { %v1589_v22 = vsel %vm1584_vm14, %v1572_v15, -1e+30 }
 0x60a   : > { %v1596_v25 = vsel %vm1595_vm15, %v1589_v22, -inf }
 0x60b   : > { %v1597_v26 = vmax.f32 %v1591_v24, %v1596_v25 }
 0x60d   : > { %v1598_v28 = vmax.f32 %v1597_v26, %v1592_v27 }
 0x60f   : > { %v1600_v29 = vmax.f32 %v1598_v28, %v1599_v13 }
 0x611   : > { %v1601_v30 = vrot.slane %v1600_v29, 4 }
 0x613   : > { %v1602_v33 = vmax.f32 %v1600_v29, %v1601_v30  ;;  %v7428_v29 = vsub.s32 1, %v7329_v32  ;;  %v1779_v30 = vld [vmem:[#allocation2 + $0x28] sm:$0xff] }
 0x615   : > { %v1603_v35 = vrot.slane %v1602_v33, 2 }
 0x617   : > { %v1604_v36 = vmax.f32 %v1602_v33, %v1603_v35  ;;  %v1792_v33 = vrot.slane %v7326_v31, %v7428_v29 }
 0x619   : > { %v1605_v37 = vrot.slane %v1604_v36, 1  ;;  %v1793_v35 = vmul.f32 %v1792_v33, %v1779_v30 }
 0x61b   : > { %v1606_v38 = vmax.f32 %v1604_v36, %v1605_v37  ;;  %v1780_v36 = vld [vmem:[#allocation2 + $0x30] sm:$0xff] }
 0x61c   : > { %v1794_v37 = vmul.f32 %v1792_v33, %v1780_v36 }
 0x61d   : > { %v1607_v39 = vsub.f32 %v1585_v12, %v1606_v38  ;;  %v1608_v40 = vsub.f32 %v1586_v18, %v1606_v38  ;;  %v1609_v41 = vsub.f32 %v1587_v62, %v1606_v38  ;;  %v1610_v42 = vsub.f32 %v1588_v3, %v1606_v38 }
 0x61e   : > { %v1611_v43 = vsub.f32 %v1589_v22, %v1606_v38  ;;  %v1781_v38 = vld [vmem:[#allocation2 + $0x38] sm:$0xff] }
 0x61f   : > { %v1612_v44 = vmul.f32 1.442695, %v1607_v39  ;;  %v1614_v45 = vmul.f32 1.442695, %v1608_v40  ;;  %v1616_v46 = vmul.f32 1.442695, %v1609_v41  ;;  %v1795_v31 = vmul.f32 %v1792_v33, %v1781_v38 }
 0x620   : > { %v1618_v47 = vmul.f32 1.442695, %v1610_v42  ;;  %v1620_v48 = vmul.f32 1.442695, %v1611_v43  ;;  %v1782_v39 = vld [vmem:[#allocation2 + $0x40] sm:$0xff] }
 0x621   : > { %6595 = vpow2.f32 %v1612_v44  ;;  %v1796_v40 = vmul.f32 %v1792_v33, %v1782_v39  ;;  %v1783_v41 = vld [vmem:[#allocation2 + $0x48] sm:$0x1]  ;;  %v7454_v43 = vld [vmem:[%s8052_s16] sm:$0x3] }
 0x622   : > { %6597 = vpow2.f32 %v1614_v45  ;;  %v1797_v42 = vmul.f32 %v1792_v33, %v1783_v41  ;;  %5875 = vmatpush3.msk.msra.mxu0 %vm1659_vm8, %v7454_v43 }
 0x623   : > { %6599 = vpow2.f32 %v1616_v46  ;;  %6358 = vmatprep.subr.bf16.mxu0 %v6791_v19 }
 0x624   : > { %6601 = vpow2.f32 %v1618_v47 }
 0x625   : > { %6603 = vpow2.f32 %v1620_v48 }
 0x62b   : > { %v6596_v49 = vpop.eup %6595 }
 0x62c   : > { %v6598_v50 = vpop.eup %6597  ;;  %v1622_v52 = vsel %vm1590_vm12, %v6596_v49, 0.0 }
 0x62d   : > { %v6600_v55 = vpop.eup %6599  ;;  %v1623_v56 = vsel %vm1590_vm12, %v6598_v50, 0.0 }
 0x62e   : > { %v6602_v58 = vpop.eup %6601  ;;  %v1624_v61 = vadd.f32 %v1623_v56, %v1622_v52  ;;  %v1625_v62 = vsel %vm1590_vm12, %v6600_v55, 0.0 }
 0x62f   : > { %v6604_v0 = vpop.eup %6603  ;;  %v1627_v2 = vsel %vm1590_vm12, %v6602_v58, 0.0 }
 0x630   : > { %v1626_v1 = vadd.f32 %v1625_v62, %v1624_v61  ;;  %v1629_v4 = vsel %vm1595_vm15, %v6604_v0, 0.0 }
 0x632   : > { %v1628_v3 = vadd.f32 %v1627_v2, %v1626_v1 }
 0x634   : > { %v1630_v5 = vadd.f32 %v1629_v4, %v1628_v3 }
 0x636   : > { %v1631_v11 = vrot.slane %v1630_v5, 4 }
 0x638   : > { %v1632_v12 = vadd.f32 %v1631_v11, %v1630_v5 }
 0x63a   : > { %v1633_v13 = vrot.slane %v1632_v12, 2 }
 0x63c   : > { %v1634_v15 = vadd.f32 %v1633_v13, %v1632_v12 }
 0x63e   : > { %v1635_v17 = vrot.slane %v1634_v15, 1 }
 0x640   : > { %v1636_v18 = vadd.f32 %v1635_v17, %v1634_v15 }
 0x642   : > { %6605 = vrcp.f32 %v1636_v18 }
 0x64c   : > { %v6606_v22 = vpop.eup %6605 }
 0x64d   : > { %v1638_v24 = vmul.f32 %v6606_v22, %v6596_v49  ;;  %v1639_v25 = vmul.f32 %v6606_v22, %v6598_v50  ;;  %v1640_v26 = vmul.f32 %v6606_v22, %v6600_v55  ;;  %v1641_v27 = vmul.f32 %v6606_v22, %v6602_v58 }
 0x64e   : > { %v1642_v28 = vmul.f32 %v6606_v22, %v6604_v0 }
 0x64f   : > { %5837 = vmatmul.mubr.msk.f32.vlgmr.msra.gmra.mrb[6].mxu1 %vm1590_vm12, %v1638_v24 }
 0x650   : > { %6348 = vmatpush3.bf16.msra.mxu1 %v7307_v14  ;;  %5839 = vmatprep.mubr.msk.f32.mxu1 %vm6792_vm5, %v6793_v21 }
 0x651   : > { %6349 = vmatprep.subr.bf16.mxu1 %v6791_v19 }
 0x653   : > { %5840 = vmatmul.mubr.msk.f32.gmra.mrb[8].mxu1 %vm1590_vm12, %v1639_v25 }
 0x654   : > { %5842 = vmatprep.mubr.msk.f32.mxu1 %vm6792_vm5, %v6793_v21  ;;  %6351 = vmatpush3.bf16.msra.mxu1 %v7311_v16 }
 0x655   : > { %6528 = vmatprep.subr.mxu1 %v6793_v21 }
 0x657   : > { %5843 = vmatmul.mubr.msk.f32.gmra.mrb[10].mxu1 %vm1590_vm12, %v1640_v26 }
 0x658   : > { %5845 = vmatprep.mubr.msk.f32.mxu1 %vm6792_vm5, %v6793_v21 }
 0x65b   : > { %5846 = vmatmul.mubr.msk.f32.gmra.mrb[12].mxu1 %vm1590_vm12, %v1641_v27 }
 0x65c   : > { %5848 = vmatprep.mubr.msk.f32.mxu1 %vm6792_vm5, %v6793_v21 }
 0x65f   : > { %5849 = vmatmul.mubr.msk.f32.gmra.mrb[14].mxu1 %vm1590_vm12, %v1642_v28 }
 0x660   : > { %5859 = vmatprep.mubr.msk.f32.mxu1 %vm6792_vm5, %v6793_v21 }
 0x663   : > { %5860 = vmatmul.mubr.msk.f32.vlgmr.msra.gmra.mrb[16].mxu1 %vm171_vm1, %v1793_v35 }
 0x664   : > { %5862 = vmatprep.mubr.msk.f32.mxu1 %vm6792_vm5, %v6793_v21  ;;  %6529 = vmatpush3.msk.msra.mxu1 %vm1659_vm8, %v7454_v43 }
 0x665   : > { %6352 = vmatprep.subr.bf16.mxu1 %v6791_v19 }
 0x667   : > { %5863 = vmatmul.mubr.msk.f32.gmra.mrb[18].mxu1 %vm171_vm1, %v1794_v37 }
 0x668   : > { %5865 = vmatprep.mubr.msk.f32.mxu1 %vm6792_vm5, %v6793_v21 }
 0x66b   : > { %5866 = vmatmul.mubr.msk.f32.gmra.mrb[20].mxu1 %vm171_vm1, %v1795_v31 }
 0x66c   : > { %5868 = vmatprep.mubr.msk.f32.mxu1 %vm6792_vm5, %v6793_v21 }
 0x66f   : > { %5869 = vmatmul.mubr.msk.f32.gmra.mrb[22].mxu1 %vm171_vm1, %v1796_v40 }
 0x670   : > { %5871 = vmatprep.mubr.msk.f32.mxu1 %vm6792_vm5, %v6793_v21 }
 0x673   : > { %5872 = vmatmul.mubr.msk.f32.gmra.mrb[24].mxu1 %vm171_vm1, %v1797_v42 }
 0x674   : > { %5882 = vmatprep.mubr.msk.f32.mxu1 %vm6792_vm5, %v6793_v21 }
 0x722   : > { %v1729_v44 = vpop.f32.mrb[6].mxu1 }
 0x723   : > { %v5838_v45 = vpop.f32.mrb[7].mxu1  ;;  %v1753_v46 = vmul.f32 %v1729_v44, %v7292_v6 }
 0x725   : > { %v1758_v50 = vsel %vm171_vm1, %v1753_v46, 0.0 }
 0x726   : > { %v1734_v47 = vpop.f32.mrb[8].mxu1 }
 0x727   : > { %v1754_v48 = vmul.f32 %v1734_v47, %v7294_v7  ;;  %v5841_v49 = vpop.f32.mrb[9].mxu1 }
 0x729   : > { %v1759_v52 = vsel %vm171_vm1, %v1754_v48, 0.0 }
 0x72a   : > { %v1760_v55 = vadd.f32 %v1759_v52, %v1758_v50  ;;  %v1739_v56 = vpop.f32.mrb[10].mxu1 }
 0x72b   : > { %v1755_v58 = vmul.f32 %v1739_v56, %v7296_v8  ;;  %v5844_v61 = vpop.f32.mrb[11].mxu1 }
 0x72d   : > { %v1761_v62 = vsel %vm171_vm1, %v1755_v58, 0.0 }
 0x72e   : > { %v1762_v0 = vadd.f32 %v1761_v62, %v1760_v55  ;;  %v1744_v1 = vpop.f32.mrb[12].mxu1 }
 0x72f   : > { %v1756_v2 = vmul.f32 %v1744_v1, %v7298_v9  ;;  %v5847_v6 = vpop.f32.mrb[13].mxu1 }
 0x731   : > { %v1763_v3 = vsel %vm171_vm1, %v1756_v2, 0.0 }
 0x732   : > { %v1764_v7 = vadd.f32 %v1763_v3, %v1762_v0  ;;  %v1749_v4 = vpop.f32.mrb[14].mxu1 }
 0x733   : > { %v1757_v5 = vmul.f32 %v1749_v4, %v7300_v10  ;;  %v5850_v11 = vpop.f32.mrb[15].mxu1 }
 0x735   : > { %v1765_v12 = vsel %vm229_vm3, %v1757_v5, 0.0 }
 0x736   : > { %v7472_v13 = vadd.f32 %v1765_v12, %v1764_v7  ;;  %v1883_v8 = vpop.f32.mrb[16].mxu1 }
 0x737   : > { %v5861_v15 = vpop.f32.mrb[17].mxu1  ;;  %v1907_v26 = vmul.f32 0.25, %v1883_v8 }
 0x739   : > { %v1912_v38 = vsel %vm1580_vm11, %v1907_v26, -1e+30 }
 0x73a   : > { %v1888_v17 = vpop.f32.mrb[18].mxu1  ;;  %v1917_v44 = vsel %vm1590_vm12, %v1912_v38, -inf }
 0x73b   : > { %v5864_v18 = vpop.f32.mrb[19].mxu1  ;;  %v1908_v30 = vmul.f32 0.25, %v1888_v17 }
 0x73d   : > { %v1913_v41 = vsel %vm1581_vm13, %v1908_v30, -1e+30 }
 0x73e   : > { %v1893_v22 = vpop.f32.mrb[20].mxu1  ;;  %v1918_v47 = vsel %vm1590_vm12, %v1913_v41, -inf }
 0x73f   : > { %v1909_v24 = vmul.f32 0.25, %v1893_v22  ;;  %v5867_v25 = vpop.f32.mrb[21].mxu1 }
 0x741   : > { %v1914_v27 = vsel %vm1582_vm9, %v1909_v24, -1e+30 }
 0x742   : > { %v1898_v9 = vpop.f32.mrb[22].mxu1  ;;  %v1919_v35 = vsel %vm1590_vm12, %v1914_v27, -inf }
 0x743   : > { %v1910_v28 = vmul.f32 0.25, %v1898_v9  ;;  %v5870_v10 = vpop.f32.mrb[23].mxu1 }
 0x745   : > { %v1915_v33 = vsel %vm1583_vm10, %v1910_v28, -1e+30 }
 0x746   : > { %v1920_v36 = vsel %vm1590_vm12, %v1915_v33, -inf  ;;  %v1903_v37 = vpop.f32.mrb[24].mxu1 }
 0x747   : > { %v1924_v31 = vmax.f32 %v1919_v35, %v1920_v36  ;;  %v1911_v39 = vmul.f32 0.25, %v1903_v37  ;;  %v5873_v40 = vpop.f32.mrb[25].mxu1 }
 0x749   : > { %v1916_v42 = vsel %vm1584_vm14, %v1911_v39, -1e+30 }
 0x74a   : > { %v1921_v45 = vsel %vm1595_vm15, %v1916_v42, -inf }
 0x74b   : > { %v1922_v46 = vmax.f32 %v1917_v44, %v1921_v45 }
 0x74d   : > { %v1923_v48 = vmax.f32 %v1922_v46, %v1918_v47  ;;  %v2098_v46 = vld [vmem:[%s8053_s22] sm:$0xff]  ;;  %v2099_v47 = vld [vmem:[%s8053_s22 + $0x8] sm:$0xff] }
 0x74f   : > { %v1925_v49 = vmax.f32 %v1923_v48, %v1924_v31  ;;  %v6353_v48 = vpack.c.bf16 %v2099_v47, %v2098_v46 }
 0x751   : > { %v1926_v50 = vrot.slane %v1925_v49, 4 }
 0x753   : > { %v1927_v52 = vmax.f32 %v1925_v49, %v1926_v50  ;;  %v2100_v49 = vld [vmem:[%s8053_s22 + $0x10] sm:$0xff]  ;;  %v2101_v50 = vld [vmem:[%s8053_s22 + $0x18] sm:$0xff] }
 0x755   : > { %v1928_v55 = vrot.slane %v1927_v52, 2 }
 0x757   : > { %v1929_v56 = vmax.f32 %v1927_v52, %v1928_v55  ;;  %v6356_v52 = vpack.c.bf16 %v2101_v50, %v2100_v49 }
 0x759   : > { %v1930_v58 = vrot.slane %v1929_v56, 1 }
 0x75b   : > { %v1931_v61 = vmax.f32 %v1929_v56, %v1930_v58 }
 0x75d   : > { %v1932_v62 = vsub.f32 %v1912_v38, %v1931_v61  ;;  %v1933_v0 = vsub.f32 %v1913_v41, %v1931_v61  ;;  %v1934_v1 = vsub.f32 %v1914_v27, %v1931_v61  ;;  %v1935_v2 = vsub.f32 %v1915_v33, %v1931_v61 }
 0x75e   : > { %v1936_v6 = vsub.f32 %v1916_v42, %v1931_v61 }
 0x75f   : > { %v1937_v3 = vmul.f32 1.442695, %v1932_v62  ;;  %v1939_v7 = vmul.f32 1.442695, %v1933_v0  ;;  %v1941_v4 = vmul.f32 1.442695, %v1934_v1 }
 0x760   : > { %v1943_v5 = vmul.f32 1.442695, %v1935_v2  ;;  %v1945_v11 = vmul.f32 1.442695, %v1936_v6  ;;  %v1784_v62 = vld [vmem:[#allocation3 + $0x28] sm:$0xff]  ;;  %v1786_v1 = vld [vmem:[#allocation3 + $0x38] sm:$0xff] }
 0x761   : > { %6607 = vpow2.f32 %v1937_v3  ;;  %v1785_v2 = vld [vmem:[#allocation3 + $0x30] sm:$0xff] }
 0x762   : > { %6609 = vpow2.f32 %v1939_v7 }
 0x763   : > { %6611 = vpow2.f32 %v1941_v4 }
 0x764   : > { %6613 = vpow2.f32 %v1943_v5 }
 0x765   : > { %6615 = vpow2.f32 %v1945_v11 }
 0x76b   : > { %v6608_v12 = vpop.eup %6607 }
 0x76c   : > { %v6610_v8 = vpop.eup %6609  ;;  %v1947_v15 = vsel %vm1590_vm12, %v6608_v12, 0.0 }
 0x76d   : > { %v6612_v17 = vpop.eup %6611  ;;  %v1948_v18 = vsel %vm1590_vm12, %v6610_v8, 0.0 }
 0x76e   : > { %v6614_v22 = vpop.eup %6613  ;;  %v1949_v24 = vadd.f32 %v1948_v18, %v1947_v15  ;;  %v1950_v25 = vsel %vm1590_vm12, %v6612_v17, 0.0 }
 0x76f   : > { %v6616_v9 = vpop.eup %6615  ;;  %v1952_v27 = vsel %vm1590_vm12, %v6614_v22, 0.0 }
 0x770   : > { %v1951_v26 = vadd.f32 %v1950_v25, %v1949_v24  ;;  %v1954_v10 = vsel %vm1595_vm15, %v6616_v9, 0.0  ;;  %v1788_v24 = vld [vmem:[#allocation3 + $0x48] sm:$0x1] }
 0x772   : > { %v1953_v28 = vadd.f32 %v1952_v27, %v1951_v26 }
 0x774   : > { %v1955_v30 = vadd.f32 %v1954_v10, %v1953_v28 }
 0x776   : > { %v1956_v33 = vrot.slane %v1955_v30, 4 }
 0x778   : > { %v1957_v35 = vadd.f32 %v1956_v33, %v1955_v30 }
 0x77a   : > { %v1958_v36 = vrot.slane %v1957_v35, 2 }
 0x77c   : > { %v1959_v37 = vadd.f32 %v1958_v36, %v1957_v35 }
 0x77e   : > { %v1960_v38 = vrot.slane %v1959_v37, 1 }
 0x780   : > { %v1961_v31 = vadd.f32 %v1960_v38, %v1959_v37 }
 0x782   : > { %6617 = vrcp.f32 %v1961_v31 }
 0x78c   : > { %v6618_v39 = vpop.eup %6617 }
 0x78d   : > { %v1963_v40 = vmul.f32 %v6618_v39, %v6608_v12  ;;  %v1965_v41 = vmul.f32 %v6618_v39, %v6612_v17  ;;  %v1964_v42 = vmul.f32 %v6618_v39, %v6610_v8  ;;  %v1966_v44 = vmul.f32 %v6618_v39, %v6614_v22  ;;  %v1787_v8 = vld [vmem:[#allocation3 + $0x40] sm:$0xff] }
 0x78e   : > { %v1967_v45 = vmul.f32 %v6618_v39, %v6616_v9  ;;  %v1767_v12 = vrot.slane %v7472_v13, 4 }
 0x78f   : > { %5877 = vmatmul.mubr.msk.f32.vlgmr.msra.gmra.mrb[16].mxu0 %vm1590_vm12, %v1963_v40  ;;  %5883 = vmatmul.mubr.msk.f32.vlgmr.msra.gmra.mrb[26].mxu1 %vm1590_vm12, %v1965_v41 }
 0x790   : > { %5879 = vmatprep.mubr.msk.f32.mxu0 %vm6792_vm5, %v6793_v21  ;;  %5885 = vmatprep.mubr.msk.f32.mxu1 %vm6792_vm5, %v6793_v21  ;;  %v1768_v28 = vadd.f32 %v1767_v12, %v7472_v13 }
 0x791   : > { %6354 = vmatpush3.bf16.msra.mxu1 %v6353_v48 }
 0x792   : > { %6355 = vmatprep.subr.bf16.mxu1 %v6791_v19  ;;  %v1769_v36 = vrot.slane %v1768_v28, 2 }
 0x793   : > { %5880 = vmatmul.mubr.msk.f32.gmra.mrb[18].mxu0 %vm1590_vm12, %v1964_v42  ;;  %5886 = vmatmul.mubr.msk.f32.gmra.mrb[28].mxu1 %vm1590_vm12, %v1966_v44 }
 0x794   : > { %5888 = vmatprep.mubr.msk.f32.mxu1 %vm6792_vm5, %v6793_v21  ;;  %5910 = vmatprep.mubr.msk.f32.mxu0 %vm6792_vm5, %v6793_v21  ;;  %v1770_v31 = vadd.f32 %v1769_v36, %v1768_v28 }
 0x795   : > { %6357 = vmatpush3.bf16.msra.mxu1 %v6356_v52 }
 0x796   : > { %6365 = vmatprep.subr.bf16.mxu1 %v7307_v14  ;;  %v1771_v41 = vrot.slane %v1770_v31, 1 }
 0x797   : > { %5889 = vmatmul.mubr.msk.f32.gmra.mrb[30].mxu1 %vm1590_vm12, %v1967_v45 }
 0x798   : > { %5899 = vmatprep.mubr.msk.f32.mxu1 %vm6792_vm5, %v6793_v21  ;;  %v1772_v45 = vadd.f32 %v1771_v41, %v1770_v31 }
 0x862   : > { %v2053_v55 = vpop.f32.mrb[16].mxu0  ;;  %v2063_v56 = vpop.f32.mrb[26].mxu1 }
 0x863   : > { %v5878_v58 = vpop.f32.mrb[17].mxu0  ;;  %v5884_v61 = vpop.f32.mrb[27].mxu1  ;;  %v2077_v0 = vmul.f32 %v2053_v55, %v1784_v62  ;;  %v2079_v7 = vmul.f32 %v2063_v56, %v1786_v1  ;;  %v2205_v62 = vld [vmem:[%s8054_s0] sm:$0xff] }
 0x865   : > { %v2082_v15 = vsel %vm171_vm1, %v2077_v0, 0.0  ;;  %v2085_v9 = vsel %vm171_vm1, %v2079_v7, 0.0  ;;  %v2206_v0 = vld [vmem:[%s8054_s0 + $0x8] sm:$0xff] }
 0x866   : > { %v2058_v6 = vpop.f32.mrb[18].mxu0  ;;  %v2068_v3 = vpop.f32.mrb[28].mxu1  ;;  %v6359_v1 = vpack.c.bf16 %v2206_v0, %v2205_v62 }
 0x867   : > { %v2078_v4 = vmul.f32 %v2058_v6, %v1785_v2  ;;  %v5881_v5 = vpop.f32.mrb[19].mxu0  ;;  %v5887_v11 = vpop.f32.mrb[29].mxu1  ;;  %v2080_v18 = vmul.f32 %v2068_v3, %v1787_v8  ;;  %v2207_v2 = vld [vmem:[%s8054_s0 + $0x10] sm:$0xff]  ;;  %v2208_v6 = vld [vmem:[%s8054_s0 + $0x18] sm:$0xff]  ;;  %v5263_v8 = vld [vmem:[#allocation10] ss:$0 sm:$0xff] }
 0x868   : > { %6360 = vmatpush3.bf16.msra.mxu0 %v6359_v1  ;;  %v5262_v11 = vld [vmem:[#allocation8] ss:$0 sm:$0xff] }
 0x869   : > { %v2083_v17 = vsel %vm171_vm1, %v2078_v4, 0.0  ;;  %v2087_v30 = vsel %vm171_vm1, %v2080_v18, 0.0  ;;  %6361 = vmatprep.subr.bf16.mxu0 %v6791_v19 }
 0x86a   : > { %v2084_v22 = vadd.f32 %v2083_v17, %v2082_v15  ;;  %v2073_v25 = vpop.f32.mrb[30].mxu1 }
 0x86b   : > { %v2081_v26 = vmul.f32 %v2073_v25, %v1788_v24  ;;  %v5890_v27 = vpop.f32.mrb[31].mxu1  ;;  %v2283_v24 = vld [vmem:[#allocation4 + $0x8] sm:$0x1] }
 0x86c   : > { %v2086_v10 = vadd.f32 %v2085_v9, %v2084_v22  ;;  %v2282_v22 = vld [vmem:[#allocation4] sm:$0xff] }
 0x86d   : > { %v2089_v35 = vsel %vm229_vm3, %v2081_v26, 0.0 }
 0x86e   : > { %v2088_v33 = vadd.f32 %v2087_v30, %v2086_v10 }
 0x870   : > { %v2090_v37 = vadd.f32 %v2089_v35, %v2088_v33 }
 0x872   : > { %v2091_v38 = vrot.slane %v2090_v37, 4 }
 0x874   : > { %v2092_v39 = vadd.f32 %v2091_v38, %v2090_v37 }
 0x876   : > { %v2093_v40 = vrot.slane %v2092_v39, 2 }
 0x878   : > { %v2094_v42 = vadd.f32 %v2093_v40, %v2092_v39 }
 0x87a   : > { %v2095_v44 = vrot.slane %v2094_v42, 1 }
 0x87c   : > { %v2096_v46 = vadd.f32 %v2095_v44, %v2094_v42 }
 0x87e   : > { %v2097_v47 = vsel %vm389_vm4, %v1772_v45, %v2096_v46 }
 0x87f   : > { %5900 = vmatmul.mubr.msk.f32.vlgmr.msra.gmra.mrb[32].mxu1 %vm171_vm1, %v2097_v47 }
 0x880   : > { %6367 = vmatpush3.bf16.msra.mxu1 %v7307_v14 }
 0x881   : > { %6369 = vmatprep.subr.bf16.mxu1 %v7311_v16 }
 0x884   : > { %6371 = vmatpush3.bf16.msra.mxu1 %v7311_v16 }
 0x885   : > { %5940 = vmatprep.subr.msk.mxu1 %vm1659_vm8, %v7454_v43 }
 0x952   : > { %v2171_v13 = vpop.f32.mrb[32].mxu1 }
 0x953   : > { %v7535_v48 = vadd.f32 %v2171_v13, %v7230_v23  ;;  %v5901_v49 = vpop.f32.mrb[33].mxu1  ;;  %v6362_v23 = vpack.c.bf16 %v2208_v6, %v2207_v2  ;;  %v2494_v6 = vld [vmem:[#allocation4 + $0x10] sm:$0xff] }
 0x955   : > { %v2178_v50 = vsel %vm169_vm0, %v7535_v48, 0.0  ;;  %6363 = vmatpush3.bf16.msra.mxu0 %v6362_v23 }
 0x956   : > { %2179 = vadd.xlane.f32.xlu1 %v2178_v50  ;;  %5924 = vmatprep.subr.msk.mxu0 %vm1659_vm8, %v7454_v43 }
 0x9e3   : > { %v2180_v52 = vpop.xlane.xlu1 %2179 }
 0x9e4   : > { %v2181_v55 = vmul.f32 0.03125, %v2180_v52 }
 0x9e6   : > { %v2182_v56 = vsub.f32 %v7535_v48, %v2181_v55 }
 0x9e8   : > { %v2183_v58 = vmul.f32 %v2182_v56, %v2182_v56 }
 0x9ea   : > { %v2184_v61 = vsel %vm169_vm0, %v2183_v58, 0.0 }
 0x9eb   : > { %2185 = vadd.xlane.f32.xlu1 %v2184_v61 }
 0xa78   : > { %v2186_v3 = vpop.xlane.xlu1 %2185 }
 0xa79   : > { %v2187_v7 = vmul.f32 0.03125, %v2186_v3 }
 0xa7b   : > { %v2188_v4 = vadd.f32 1e-05, %v2187_v7 }
 0xa7d   : > { %6619 = vrsqrt.f32 %v2188_v4  ;;  %v2495_v4 = vld [vmem:[#allocation4 + $0x18] sm:$0x1] }
 0xa87   : > { %v6620_v5 = vpop.eup %6619 }
 0xa88   : > { %v2190_v12 = vmul.f32 %v6620_v5, %v2182_v56 }
 0xa8a   : > { %v2197_v15 = vmul.f32 %v5262_v11, %v2190_v12  ;;  %v2285_v11 = vld [vmem:[#allocation5 + $0x8] sm:$0x1]  ;;  %v2284_v12 = vld [vmem:[#allocation5] sm:$0xff] }
 0xa8c   : > { %v2204_v17 = vadd.f32 %v5263_v8, %v2197_v15 }
 0xa8e   : > { %5911 = vmatmul.mubr.msk.f32.vlgmr.msra.gmra.mrb[20].mxu0 %vm171_vm1, %v2204_v17 }
 0xa8f   : > { %5925 = vmatpush3.msk.msra.mxu0 %vm1659_vm8, %v7454_v43 }
 0xa90   : > { %6373 = vmatprep.subr.bf16.mxu0 %v7307_v14 }
 0xb61   : > { %v2278_v18 = vpop.f32.mrb[20].mxu0 }
 0xb62   : > { %v2289_v25 = vrot.slane %v2278_v18, %v7337_v34  ;;  %v5912_v9 = vpop.f32.mrb[21].mxu0  ;;  %v2501_v1 = vrot.slane %v2278_v18, %v7428_v29 }
 0xb64   : > { %v2290_v26 = vmul.f32 %v2289_v25, %v2282_v22  ;;  %v2291_v27 = vmul.f32 %v2289_v25, %v2283_v24  ;;  %v2502_v7 = vmul.f32 %v2501_v1, %v2494_v6  ;;  %v2503_v5 = vmul.f32 %v2501_v1, %v2495_v4  ;;  %v2710_v6 = vld [vmem:[%s8055_s23 + $0x18] sm:$0xff]  ;;  %v2496_v4 = vld [vmem:[#allocation5 + $0x10] sm:$0xff] }
 0xb66   : > { %5921 = vmatprep.mubr.msk.f32.mxu1 %vm171_vm1, %v2290_v26 }
 0xb67   : > { %5922 = vmatmul.mubr.msk.f32.vlgmr.msra.gmra.mrb[34].mxu1 %vm171_vm1, %v2291_v27 }
 0xb68   : > { %5941 = vmatpush3.msk.msra.mxu1 %vm1659_vm8, %v7454_v43 }
 0xb69   : > { %6380 = vmatprep.subr.bf16.mxu1 %v6791_v19 }
 0xc3a   : > { %v5923_v28 = vpop.f32.mrb[34].mxu1 }
 0xc3b   : > { %v2374_v10 = vmul.f32 0.25, %v5923_v28  ;;  %v2364_v30 = vpop.f32.mrb[35].mxu1 }
 0xc3c   : > { %v2373_v33 = vmul.f32 0.25, %v2364_v30 }
 0xc3d   : > { %v2376_v35 = vsel %vm1595_vm15, %v2374_v10, -inf }
 0xc3e   : > { %v2375_v36 = vsel %vm1590_vm12, %v2373_v33, -inf }
 0xc3f   : > { %v2377_v37 = vmax.f32 %v2375_v36, %v2376_v35 }
 0xc41   : > { %v2378_v38 = vrot.slane %v2377_v37, 4 }
 0xc43   : > { %v2379_v31 = vmax.f32 %v2377_v37, %v2378_v38 }
 0xc45   : > { %v2380_v39 = vrot.slane %v2379_v31, 2 }
 0xc47   : > { %v2381_v40 = vmax.f32 %v2379_v31, %v2380_v39 }
 0xc49   : > { %v2382_v41 = vrot.slane %v2381_v40, 1 }
 0xc4b   : > { %v2383_v42 = vmax.f32 %v2381_v40, %v2382_v41 }
 0xc4d   : > { %v2384_v44 = vsub.f32 %v2373_v33, %v2383_v42  ;;  %v2385_v45 = vsub.f32 %v2374_v10, %v2383_v42 }
 0xc4f   : > { %v2386_v43 = vmul.f32 1.442695, %v2384_v44  ;;  %v2388_v46 = vmul.f32 1.442695, %v2385_v45 }
 0xc51   : > { %6621 = vpow2.f32 %v2386_v43 }
 0xc52   : > { %6623 = vpow2.f32 %v2388_v46 }
 0xc5b   : > { %v6622_v47 = vpop.eup %6621 }
 0xc5c   : > { %v6624_v13 = vpop.eup %6623  ;;  %v2390_v49 = vsel %vm1590_vm12, %v6622_v47, 0.0 }
 0xc5d   : > { %v2391_v50 = vsel %vm1595_vm15, %v6624_v13, 0.0 }
 0xc5e   : > { %v2392_v52 = vadd.f32 %v2391_v50, %v2390_v49 }
 0xc60   : > { %v2393_v55 = vrot.slane %v2392_v52, 4 }
 0xc62   : > { %v2394_v56 = vadd.f32 %v2393_v55, %v2392_v52 }
 0xc64   : > { %v2395_v58 = vrot.slane %v2394_v56, 2 }
 0xc66   : > { %v2396_v61 = vadd.f32 %v2395_v58, %v2394_v56 }
 0xc68   : > { %v2397_v62 = vrot.slane %v2396_v61, 1 }
 0xc6a   : > { %v2398_v0 = vadd.f32 %v2397_v62, %v2396_v61  ;;  %v2707_v62 = vld [vmem:[%s8055_s23] sm:$0xff] }
 0xc6c   : > { %6625 = vrcp.f32 %v2398_v0  ;;  %v2708_v0 = vld [vmem:[%s8055_s23 + $0x8] sm:$0xff] }
 0xc6d   : > { %v6381_v1 = vpack.c.bf16 %v2708_v0, %v2707_v62  ;;  %v5277_v0 = vld [vmem:[%s8058_s1] ss:$0 sm:$0xff] }
 0xc76   : > { %v6626_v2 = vpop.eup %6625 }
 0xc77   : > { %v2400_v23 = vmul.f32 %v6626_v2, %v6622_v47  ;;  %v2401_v3 = vmul.f32 %v6626_v2, %v6624_v13  ;;  %v2709_v2 = vld [vmem:[%s8055_s23 + $0x10] sm:$0xff] }
 0xc79   : > { %5926 = vmatprep.mubr.msk.f32.mxu0 %vm1590_vm12, %v2400_v23  ;;  %v6384_v23 = vpack.c.bf16 %v2710_v6, %v2709_v2  ;;  %v2909_v6 = vld [vmem:[%s6962_s6 + $0x10] sm:$0xff] }
 0xc7a   : > { %5927 = vmatmul.mubr.msk.f32.vlgmr.msra.gmra.mrb[22].mxu0 %vm1590_vm12, %v2401_v3 }
 0xc7b   : > { %6375 = vmatpush3.bf16.msra.mxu0 %v7307_v14  ;;  %5937 = vmatprep.mubr.msk.f32.mxu0 %vm171_vm1, %v2502_v7  ;;  %v2497_v7 = vld [vmem:[#allocation5 + $0x18] sm:$0x1] }
 0xc7c   : > { %6377 = vmatprep.subr.bf16.mxu0 %v7311_v16 }
 0xc7f   : > { %6379 = vmatpush3.bf16.msra.mxu0 %v7311_v16 }
 0xc80   : > { %6386 = vmatprep.subr.bf16.mxu0 %v6791_v19 }
 0xc82   : > { %5938 = vmatmul.mubr.msk.f32.vlgmr.msra.gmra.mrb[24].mxu0 %vm171_vm1, %v2503_v5 }
 0xc83   : > { %5964 = vmatprep.mubr.msk.f32.mxu0 %vm6792_vm5, %v6793_v21 }
 0xd4d   : > { %v5928_v8 = vpop.f32.mrb[22].mxu0 }
 0xd4e   : > { %v2484_v15 = vmul.f32 %v5928_v8, %v2285_v11  ;;  %v2474_v14 = vpop.f32.mrb[23].mxu0 }
 0xd4f   : > { %v2483_v17 = vmul.f32 %v2474_v14, %v2284_v12 }
 0xd50   : > { %v2486_v18 = vsel %vm229_vm3, %v2484_v15, 0.0 }
 0xd51   : > { %v2485_v22 = vsel %vm171_vm1, %v2483_v17, 0.0 }
 0xd52   : > { %v2487_v24 = vadd.f32 %v2486_v18, %v2485_v22 }
 0xd54   : > { %v2488_v3 = vrot.slane %v2487_v24, 4 }
 0xd55   : > { %v5939_v16 = vpop.f32.mrb[24].mxu0 }
 0xd56   : > { %v2586_v25 = vmul.f32 0.25, %v5939_v16  ;;  %v2576_v9 = vpop.f32.mrb[25].mxu0  ;;  %v2489_v11 = vadd.f32 %v2488_v3, %v2487_v24 }
 0xd57   : > { %v2585_v26 = vmul.f32 0.25, %v2576_v9 }
 0xd58   : > { %v2588_v27 = vsel %vm1595_vm15, %v2586_v25, -inf  ;;  %v2490_v18 = vrot.slane %v2489_v11, 2 }
 0xd59   : > { %v2587_v28 = vsel %vm1590_vm12, %v2585_v26, -inf }
 0xd5a   : > { %v2589_v10 = vmax.f32 %v2587_v28, %v2588_v27 }
 0xd5c   : > { %v2590_v30 = vrot.slane %v2589_v10, 4 }
 0xd5e   : > { %v2591_v33 = vmax.f32 %v2589_v10, %v2590_v30 }
 0xd60   : > { %v2592_v35 = vrot.slane %v2591_v33, 2 }
 0xd62   : > { %v2593_v36 = vmax.f32 %v2591_v33, %v2592_v35 }
 0xd64   : > { %v2594_v37 = vrot.slane %v2593_v36, 1 }
 0xd66   : > { %v2595_v38 = vmax.f32 %v2593_v36, %v2594_v37 }
 0xd68   : > { %v2596_v31 = vsub.f32 %v2585_v26, %v2595_v38  ;;  %v2597_v39 = vsub.f32 %v2586_v25, %v2595_v38  ;;  %v2491_v25 = vadd.f32 %v2490_v18, %v2489_v11  ;;  %v2913_v11 = vld [vmem:[%s6962_s6 + $0x30] sm:$0xff] }
 0xd69   : > { %v2917_v18 = vld [vmem:[%s6962_s6 + $0x50] sm:$0xff] }
 0xd6a   : > { %v2598_v40 = vmul.f32 1.442695, %v2596_v31  ;;  %v2600_v41 = vmul.f32 1.442695, %v2597_v39  ;;  %v2492_v28 = vrot.slane %v2491_v25, 1 }
 0xd6c   : > { %6627 = vpow2.f32 %v2598_v40  ;;  %v2493_v30 = vadd.f32 %v2492_v28, %v2491_v25  ;;  %v2919_v25 = vld [vmem:[%s6962_s6 + $0x60] sm:$0xff]  ;;  %v2922_v28 = vld [vmem:[%s6962_s6 + $0x78] sm:$0xff] }
 0xd6d   : > { %6629 = vpow2.f32 %v2600_v41 }
 0xd76   : > { %v6628_v42 = vpop.eup %6627 }
 0xd77   : > { %v6630_v44 = vpop.eup %6629  ;;  %v2602_v45 = vsel %vm1590_vm12, %v6628_v42, 0.0 }
 0xd78   : > { %v2603_v43 = vsel %vm1595_vm15, %v6630_v44, 0.0 }
 0xd79   : > { %v2604_v46 = vadd.f32 %v2603_v43, %v2602_v45  ;;  %v2815_v45 = vld [vmem:[%s8056_s26 + $0x8] sm:$0xff]  ;;  %v2816_v43 = vld [vmem:[%s8056_s26 + $0x10] sm:$0xff] }
 0xd7b   : > { %v2605_v47 = vrot.slane %v2604_v46, 4 }
 0xd7d   : > { %v2606_v13 = vadd.f32 %v2605_v47, %v2604_v46  ;;  %v2817_v46 = vld [vmem:[%s8056_s26 + $0x18] sm:$0xff] }
 0xd7e   : > { %v6390_v47 = vpack.c.bf16 %v2817_v46, %v2816_v43 }
 0xd7f   : > { %v2607_v49 = vrot.slane %v2606_v13, 2 }
 0xd81   : > { %v2608_v50 = vadd.f32 %v2607_v49, %v2606_v13  ;;  %v2907_v13 = vld [vmem:[%s6962_s6] sm:$0xff]  ;;  %v2908_v49 = vld [vmem:[%s6962_s6 + $0x8] sm:$0xff] }
 0xd83   : > { %v2609_v52 = vrot.slane %v2608_v50, 1 }
 0xd85   : > { %v2610_v55 = vadd.f32 %v2609_v52, %v2608_v50  ;;  %v6393_v50 = vpack.c.bf16 %v2908_v49, %v2907_v13 }
 0xd87   : > { %6631 = vrcp.f32 %v2610_v55 }
 0xd91   : > { %v6632_v56 = vpop.eup %6631 }
 0xd92   : > { %v2612_v58 = vmul.f32 %v6632_v56, %v6628_v42  ;;  %v2613_v61 = vmul.f32 %v6632_v56, %v6630_v44  ;;  %v2814_v44 = vld [vmem:[%s8056_s26] sm:$0xff] }
 0xd94   : > { %5942 = vmatprep.mubr.msk.f32.mxu1 %vm1590_vm12, %v2612_v58 }
 0xd95   : > { %5943 = vmatmul.mubr.msk.f32.vlgmr.msra.gmra.mrb[36].mxu1 %vm1590_vm12, %v2613_v61  ;;  %v5276_v61 = vld [vmem:[%s8057_s28] ss:$0 sm:$0xff] }
 0xd96   : > { %5953 = vmatprep.mubr.msk.f32.mxu1 %vm6792_vm5, %v6793_v21  ;;  %6382 = vmatpush3.bf16.msra.mxu1 %v6381_v1 }
 0xd97   : > { %6383 = vmatprep.subr.bf16.mxu1 %v6791_v19 }
 0xd9a   : > { %6385 = vmatpush3.bf16.msra.mxu1 %v6384_v23  ;;  %v2910_v23 = vld [vmem:[%s6962_s6 + $0x18] sm:$0xff] }
 0xd9b   : > { %6392 = vmatprep.subr.bf16.mxu1 %v6791_v19  ;;  %v6396_v3 = vpack.c.bf16 %v2910_v23, %v2909_v6 }
 0xe68   : > { %v5944_v5 = vpop.f32.mrb[36].mxu1 }
 0xe69   : > { %v2696_v12 = vmul.f32 %v5944_v5, %v2497_v7  ;;  %v2686_v8 = vpop.f32.mrb[37].mxu1  ;;  %v2911_v7 = vld [vmem:[%s6962_s6 + $0x20] sm:$0xff] }
 0xe6a   : > { %v2695_v15 = vmul.f32 %v2686_v8, %v2496_v4  ;;  %v2912_v4 = vld [vmem:[%s6962_s6 + $0x28] sm:$0xff] }
 0xe6b   : > { %v2698_v14 = vsel %vm229_vm3, %v2696_v12, 0.0  ;;  %v6399_v5 = vpack.c.bf16 %v2912_v4, %v2911_v7  ;;  %v2914_v12 = vld [vmem:[%s6962_s6 + $0x38] sm:$0xff]  ;;  %v5283_v4 = vld [vmem:[%s8045_s21 + $0x1] ss:$0 sm:$0xff] }
 0xe6c   : > { %v2697_v17 = vsel %vm171_vm1, %v2695_v15, 0.0  ;;  %v6402_v8 = vpack.c.bf16 %v2914_v12, %v2913_v11  ;;  %v2915_v15 = vld [vmem:[%s6962_s6 + $0x40] sm:$0xff]  ;;  %v5291_v12 = vld [vmem:[%s6877_s20 + $0x28] sm:$0xff] }
 0xe6d   : > { %v2699_v22 = vadd.f32 %v2698_v14, %v2697_v17  ;;  %v2916_v14 = vld [vmem:[%s6962_s6 + $0x48] sm:$0xff]  ;;  %v5290_v11 = vld [vmem:[%s6877_s20 + $0x20] sm:$0xff] }
 0xe6e   : > { %v6405_v17 = vpack.c.bf16 %v2916_v14, %v2915_v15  ;;  %v6423_v14 = vpack.c.bf16 %v5291_v12, %v5290_v11 }
 0xe6f   : > { %v2700_v16 = vrot.slane %v2699_v22, 4 }
 0xe71   : > { %v2701_v9 = vadd.f32 %v2700_v16, %v2699_v22  ;;  %v2918_v22 = vld [vmem:[%s6962_s6 + $0x58] sm:$0xff] }
 0xe72   : > { %v6408_v16 = vpack.c.bf16 %v2918_v22, %v2917_v18  ;;  %v5292_v18 = vld [vmem:[%s6877_s20 + $0x30] sm:$0xff]  ;;  %v5293_v22 = vld [vmem:[%s6877_s20 + $0x38] sm:$0xff] }
 0xe73   : > { %v2702_v26 = vrot.slane %v2701_v9, 2 }
 0xe75   : > { %v2703_v27 = vadd.f32 %v2702_v26, %v2701_v9  ;;  %v2920_v9 = vld [vmem:[%s6962_s6 + $0x68] sm:$0xff] }
 0xe76   : > { %v6411_v26 = vpack.c.bf16 %v2920_v9, %v2919_v25  ;;  %v5295_v25 = vld [vmem:[%s8046_s29 + $0x20] sm:$0xff]  ;;  %v5296_v9 = vld [vmem:[%s8046_s29 + $0x28] sm:$0xff] }
 0xe77   : > { %v2704_v10 = vrot.slane %v2703_v27, 1 }
 0xe79   : > { %v2705_v33 = vadd.f32 %v2704_v10, %v2703_v27  ;;  %v2921_v27 = vld [vmem:[%s6962_s6 + $0x70] sm:$0xff] }
 0xe7a   : > { %v6414_v10 = vpack.c.bf16 %v2922_v28, %v2921_v27  ;;  %v5297_v27 = vld [vmem:[%s8046_s29 + $0x30] sm:$0xff]  ;;  %v5298_v28 = vld [vmem:[%s8046_s29 + $0x38] sm:$0xff] }
 0xe7b   : > { %v2706_v24 = vsel %vm389_vm4, %v2493_v30, %v2705_v33  ;;  %v5278_v30 = vld [vmem:[%s6957_s30] ss:$0 sm:$0xff] }
 0xe7c   : > { %5954 = vmatmul.mubr.msk.f32.vlgmr.msra.gmra.mrb[38].mxu1 %vm171_vm1, %v2706_v24 }
 0xe7d   : > { %5999 = vmatprep.mubr.msk.f32.mxu1 %vm6792_vm5, %v6793_v21  ;;  %6394 = vmatpush3.bf16.msra.mxu1 %v6393_v50 }
 0xe7e   : > { %6395 = vmatprep.subr.bf16.mxu1 %v6791_v19 }
 0xe81   : > { %6397 = vmatpush3.bf16.msra.mxu1 %v6396_v3 }
 0xe82   : > { %6398 = vmatprep.subr.bf16.mxu1 %v6791_v19 }
 0xe85   : > { %6400 = vmatpush3.bf16.msra.mxu1 %v6399_v5 }
 0xe86   : > { %6401 = vmatprep.subr.bf16.mxu1 %v6791_v19 }
 0xe89   : > { %6403 = vmatpush3.bf16.msra.mxu1 %v6402_v8  ;;  %v5284_v8 = vld [vmem:[%s8047_s3 + $0x1] ss:$0 sm:$0xff] }
 0xe8a   : > { %6404 = vmatprep.subr.bf16.mxu1 %v6791_v19 }
 0xe8d   : > { %6406 = vmatpush3.bf16.msra.mxu1 %v6405_v17 }
 0xe8e   : > { %6407 = vmatprep.subr.bf16.mxu1 %v6791_v19 }
 0xe91   : > { %6409 = vmatpush3.bf16.msra.mxu1 %v6408_v16  ;;  %v6426_v16 = vpack.c.bf16 %v5293_v22, %v5292_v18 }
 0xe92   : > { %6410 = vmatprep.subr.bf16.mxu1 %v6791_v19 }
 0xe95   : > { %6412 = vmatpush3.bf16.msra.mxu1 %v6411_v26  ;;  %v6429_v26 = vpack.c.bf16 %v5296_v9, %v5295_v25 }
 0xe96   : > { %6413 = vmatprep.subr.bf16.mxu1 %v6791_v19 }
 0xe99   : > { %6415 = vmatpush3.bf16.msra.mxu1 %v6414_v10  ;;  %v6432_v10 = vpack.c.bf16 %v5298_v28, %v5297_v27 }
 0xe9a   : > { %6440 = vmatprep.subr.bf16.mxu1 %v6791_v19 }
 0xf4f   : > { %v2780_v35 = vpop.f32.mrb[38].mxu1 }
 0xf50   : > { %v7596_v36 = vadd.f32 %v2780_v35, %v7535_v48  ;;  %v5955_v37 = vpop.f32.mrb[39].mxu1  ;;  %v6387_v48 = vpack.c.bf16 %v2815_v45, %v2814_v44 }
 0xf52   : > { %v2787_v38 = vsel %vm169_vm0, %v7596_v36, 0.0  ;;  %6388 = vmatpush3.bf16.msra.mxu0 %v6387_v48  ;;  %v5280_v48 = vld [vmem:[%s6967_s25] ss:$0 sm:$0xff] }
 0xf53   : > { %2788 = vadd.xlane.f32.xlu0 %v2787_v38  ;;  %6389 = vmatprep.subr.bf16.mxu0 %v6791_v19 }
 0xf56   : > { %6391 = vmatpush3.bf16.msra.mxu0 %v6390_v47 }
 0xf57   : > { %6416 = vmatprep.subr.bf16.mxu0 %v6791_v19 }
 0xfe0   : > { %v2789_v31 = vpop.xlane.xlu0 %2788 }
 0xfe1   : > { %v2790_v39 = vmul.f32 0.03125, %v2789_v31 }
 0xfe3   : > { %v2791_v40 = vsub.f32 %v7596_v36, %v2790_v39 }
 0xfe5   : > { %v2792_v41 = vmul.f32 %v2791_v40, %v2791_v40 }
 0xfe7   : > { %v2793_v42 = vsel %vm169_vm0, %v2792_v41, 0.0 }
 0xfe8   : > { %2794 = vadd.xlane.f32.xlu1 %v2793_v42 }
0x1075   : > { %v2795_v52 = vpop.xlane.xlu1 %2794 }
0x1076   : > { %v2796_v55 = vmul.f32 0.03125, %v2795_v52 }
0x1078   : > { %v2797_v56 = vadd.f32 1e-05, %v2796_v55 }
0x107a   : > { %6633 = vrsqrt.f32 %v2797_v56 }
0x1084   : > { %v6634_v58 = vpop.eup %6633 }
0x1085   : > { %v2799_v62 = vmul.f32 %v6634_v58, %v2791_v40 }
0x1087   : > { %v2806_v1 = vmul.f32 %v5276_v61, %v2799_v62  ;;  %v5285_v61 = vld [vmem:[%s6872_s12 + $0x20] sm:$0xff]  ;;  %v5286_v62 = vld [vmem:[%s6872_s12 + $0x28] sm:$0xff] }
0x1089   : > { %v2813_v2 = vadd.f32 %v5277_v0, %v2806_v1  ;;  %v6417_v0 = vpack.c.bf16 %v5286_v62, %v5285_v61  ;;  %v5288_v1 = vld [vmem:[%s6872_s12 + $0x38] sm:$0xff] }
0x108b   : > { %5965 = vmatmul.mubr.msk.f32.vlgmr.msra.gmra.mrb[26].mxu0 %vm171_vm1, %v2813_v2 }
0x108c   : > { %6010 = vmatprep.mubr.msk.f32.mxu0 %vm6792_vm5, %v6793_v21  ;;  %6418 = vmatpush3.bf16.msra.mxu0 %v6417_v0 }
0x108d   : > { %6419 = vmatprep.subr.bf16.mxu0 %v6791_v19 }
0x115e   : > { %v2894_v33 = vpop.f32.mrb[26].mxu0 }
0x115f   : > { %v2895_v24 = vadd.f32 %v5278_v30, %v2894_v33  ;;  %v5966_v35 = vpop.f32.mrb[27].mxu0 }
0x1161   : > { %v2898_v37 = vmul.f32 %v2895_v24, %v2895_v24 }
0x1163   : > { %v2899_v38 = vmul.f32 %v2898_v37, %v2895_v24 }
0x1165   : > { %v2900_v31 = vmul.f32 0.044715, %v2899_v38 }
0x1167   : > { %v2901_v39 = vadd.f32 %v2900_v31, %v2895_v24 }
0x1169   : > { %v2902_v40 = vmul.f32 0.7978846, %v2901_v39 }
0x116b   : > { %6635 = vtanh.f32 %v2902_v40 }
0x1175   : > { %v6636_v41 = vpop.eup %6635 }
0x1176   : > { %v2904_v42 = vadd.f32 1.0, %v6636_v41  ;;  %v3437_v41 = vld [vmem:[%s8049_s19] sm:$0xff] }
0x1178   : > { %v2905_v44 = vmul.f32 0.5, %v2904_v42  ;;  %v3438_v42 = vld [vmem:[%s8049_s19 + $0x8] sm:$0xff] }
0x117a   : > { %v2906_v45 = vmul.f32 %v2905_v44, %v2895_v24  ;;  %v3439_v44 = vld [vmem:[%s8049_s19 + $0x10] sm:$0xff] }
0x117c   : > { %6000 = vmatmul.mubr.f32.vlgmr.msra.gmra.mrb[40].mxu1 %v2906_v45  ;;  %v7708_v45 = vpack.c.bf16 %v3438_v42, %v3437_v41 }
0x117d   : > { %6442 = vmatpush3.bf16.msra.mxu1 %v7256_v59  ;;  %6054 = vmatprep.mubr.msk.f32.mxu1 %vm6792_vm5, %v6793_v21 }
0x117e   : > { %6443 = vmatprep.subr.bf16.mxu1 %v6791_v19 }
0x1181   : > { %6445 = vmatpush3.bf16.msra.mxu1 %v7266_v63 }
0x1182   : > { %6080 = vmatprep.subr.mxu1 %v6793_v21 }
0x124f   : > { %v2989_v43 = vpop.f32.mrb[40].mxu1 }
0x1250   : > { %v2993_v46 = vadd.f32 %v2989_v43, %v7596_v36  ;;  %v6001_v47 = vpop.f32.mrb[41].mxu1  ;;  %v5287_v36 = vld [vmem:[%s6872_s12 + $0x30] sm:$0xff]  ;;  %v3440_v43 = vld [vmem:[%s8049_s19 + $0x18] sm:$0xff] }
0x1251   : > { %v6420_v2 = vpack.c.bf16 %v5288_v1, %v5287_v36  ;;  %v6683_v47 = vld [vmem:[%s7318_s10] ss:$0 sm:$0xff]  ;;  %s5111_s10 = scalar_select %p5110_p3, 1, 0 }
0x1252   : > { %v7646_v13 = vadd.f32 %v5280_v48, %v2993_v46  ;;  %v7712_v48 = vpack.c.bf16 %v3440_v43, %v3439_v44 }
0x1253   : > { %6421 = vmatpush3.bf16.msra.mxu0 %v6420_v2 }
0x1254   : > { %v3006_v49 = vsel %vm169_vm0, %v7646_v13, 0.0  ;;  %6422 = vmatprep.subr.bf16.mxu0 %v6791_v19 }
0x1255   : > { %3007 = vadd.xlane.f32.xlu0 %v3006_v49 }
0x12e2   : > { %v3008_v50 = vpop.xlane.xlu0 %3007 }
0x12e3   : > { %v3009_v52 = vmul.f32 0.03125, %v3008_v50  ;;  %v6684_v50 = vld [vmem:[%s7322_s11] ss:$0 sm:$0xff]  ;;  %s5112_s11 = scvt.s32.f32 %s5111_s10 }
0x12e5   : > { %v3010_v55 = vsub.f32 %v7646_v13, %v3009_v52 }
0x12e7   : > { %v3011_v56 = vmul.f32 %v3010_v55, %v3010_v55 }
0x12e9   : > { %v3012_v58 = vsel %vm169_vm0, %v3011_v56, 0.0 }
0x12ea   : > { %3013 = vadd.xlane.f32.xlu1 %v3012_v58 }
0x1377   : > { %v3014_v6 = vpop.xlane.xlu1 %3013 }
0x1378   : > { %v3015_v23 = vmul.f32 0.03125, %v3014_v6 }
0x137a   : > { %v3016_v3 = vadd.f32 1e-05, %v3015_v23 }
0x137c   : > { %6637 = vrsqrt.f32 %v3016_v3 }
0x1386   : > { %v6638_v7 = vpop.eup %6637 }
0x1387   : > { %v3018_v5 = vmul.f32 %v6638_v7, %v3010_v55 }
0x1389   : > { %v3025_v15 = vmul.f32 %v5283_v4, %v3018_v5 }
0x138b   : > { %v3032_v17 = vadd.f32 %v5284_v8, %v3025_v15 }
0x138d   : > { %6011 = vmatmul.mubr.msk.f32.vlgmr.msra.gmra.mrb[28].mxu0 %vm171_vm1, %v3032_v17 }
0x138e   : > { %6424 = vmatpush3.bf16.msra.mxu0 %v6423_v14  ;;  %6021 = vmatprep.mubr.msk.f32.mxu0 %vm6792_vm5, %v6793_v21 }
0x138f   : > { %6425 = vmatprep.subr.bf16.mxu0 %v6791_v19 }
0x1392   : > { %6427 = vmatpush3.bf16.msra.mxu0 %v6426_v16 }
0x1393   : > { %6428 = vmatprep.subr.bf16.mxu0 %v6791_v19 }
0x1395   : > { %6022 = vmatmul.mubr.msk.f32.vlgmr.msra.gmra.mrb[30].mxu0 %vm171_vm1, %v3032_v17 }
0x1396   : > { %6430 = vmatpush3.bf16.msra.mxu0 %v6429_v26  ;;  %6032 = vmatprep.mubr.msk.f32.mxu0 %vm6792_vm5, %v6793_v21 }
0x1397   : > { %6431 = vmatprep.subr.bf16.mxu0 %v6791_v19 }
0x139a   : > { %6433 = vmatpush3.bf16.msra.mxu0 %v6432_v10  ;;  %v3607_v10 = vld [vmem:[%s8052_s16] sm:$0x3] }
0x139b   : > { %6434 = vmatprep.subr.bf16.mxu0 %v6791_v19 }
0x139d   : > { %6033 = vmatmul.mubr.msk.f32.vlgmr.msra.gmra.mrb[32].mxu0 %vm171_vm1, %v3032_v17 }
0x139e   : > { %6436 = vmatpush3.bf16.msra.mxu0 %v7256_v59  ;;  %6043 = vmatprep.mubr.msk.f32.mxu0 %vm6792_vm5, %v6793_v21 }
0x139f   : > { %6437 = vmatprep.subr.bf16.mxu0 %v6791_v19 }
0x13a2   : > { %6439 = vmatpush3.bf16.msra.mxu0 %v7266_v63 }
0x13a3   : > { %6446 = vmatprep.subr.bf16.mxu0 %v6791_v19 }
0x1460   : > { %v3107_v30 = vpop.f32.mrb[28].mxu0 }
0x1461   : > { %v6012_v33 = vpop.f32.mrb[29].mxu0  ;;  %6044 = vmatmul.mubr.msk.f32.vlgmr.msra.gmra.mrb[34].mxu0 %vm171_vm1, %v3107_v30  ;;  %v3261_v49 = vmul.f32 %v6683_v47, %v3107_v30 }
0x1462   : > { %6065 = vmatprep.mubr.msk.f32.mxu0 %vm6792_vm5, %v6793_v21  ;;  %6448 = vmatpush3.bf16.msra.mxu0 %v7708_v45 }
0x1463   : > { %6449 = vmatprep.subr.bf16.mxu0 %v6791_v19 }
0x1466   : > { %6451 = vmatpush3.bf16.msra.mxu0 %v7712_v48 }
0x1467   : > { %6452 = vmatprep.subr.bf16.mxu0 %v6791_v19 }
0x1468   : > { %v3182_v59 = vpop.f32.mrb[30].mxu0 }
0x1469   : > { %v6023_v24 = vpop.f32.mrb[31].mxu0  ;;  %6055 = vmatmul.mubr.msk.f32.vlgmr.msra.gmra.mrb[42].mxu1 %vm171_vm1, %v3182_v59  ;;  %v3337_v61 = vmul.f32 %v6683_v47, %v3182_v59 }
0x146a   : > { %6082 = vmatprep.mubr.msk.f32.mxu1 %vm6792_vm5, %v6793_v21  ;;  %6081 = vmatpush3.msk.msra.mxu1 %vm1659_vm8, %v3607_v10 }
0x146b   : > { %6120 = vmatprep.subr.mxu1 %v6793_v21 }
0x1470   : > { %v3257_v63 = vpop.f32.mrb[32].mxu0 }
0x1471   : > { %5303 = vst.msk [vmem:[%s7288_s24 + $0x51] sm:$0x1] %vm229_vm3, %v3257_v63  ;;  %v6034_v35 = vpop.f32.mrb[33].mxu0 }
0x1478   : > { %v7693_v37 = vld [vmem:[#allocation3 + $0x50] sm:$0xff]  ;;  %v7695_v38 = vld [vmem:[#allocation3 + $0x58] sm:$0xff]  ;;  %v7697_v31 = vld [vmem:[#allocation3 + $0x60] sm:$0xff] }
0x1479   : > { %v7699_v39 = vld [vmem:[#allocation3 + $0x68] sm:$0xff]  ;;  %v7701_v40 = vld [vmem:[#allocation3 + $0x70] sm:$0x1] }
0x147a   : > { %5316 = vst.msk [vmem:[%s7288_s24 + $0x78] sm:$0x2] %vm1775_vm7, %v3257_v63  ;;  %s8060_s24 = sld [smem:[#allocation19_spill]] }
0x1534   : > { %v3331_v46 = vpop.f32.mrb[34].mxu0 }
0x1535   : > { %v3335_v52 = vmul.f32 %v6684_v50, %v3331_v46  ;;  %v6045_v55 = vpop.f32.mrb[35].mxu0 }
0x1537   : > { %v3336_v56 = vadd.f32 %v3335_v52, %v3261_v49 }
0x1539   : > { %v3431_v1 = vrot.slane %v3336_v56, %v7337_v34  ;;  %v3754_v14 = vrot.slane %v3336_v56, %v7428_v29 }
0x153c   : > { %v3407_v58 = vpop.f32.mrb[42].mxu1 }
0x153d   : > { %v3411_v62 = vmul.f32 %v6684_v50, %v3407_v58  ;;  %v6056_v36 = vpop.f32.mrb[43].mxu1 }
0x153f   : > { %v3412_v0 = vadd.f32 %v3411_v62, %v3337_v61 }
0x1541   : > { %5302 = vst.msk [vmem:[%s7332_s15 + $0x51] sm:$0x1] %vm229_vm3, %v3412_v0 }
0x1548   : > { %v3418_v2 = vld [vmem:[#allocation2 + $0x50] sm:$0xff]  ;;  %v3419_v6 = vld [vmem:[#allocation2 + $0x58] sm:$0xff]  ;;  %v3420_v23 = vld [vmem:[#allocation2 + $0x60] sm:$0xff] }
0x1549   : > { %v3432_v3 = vmul.f32 %v3431_v1, %v3418_v2  ;;  %v3421_v7 = vld [vmem:[#allocation2 + $0x68] sm:$0xff]  ;;  %v3422_v4 = vld [vmem:[#allocation2 + $0x70] sm:$0x1]  ;;  %v3433_v5 = vmul.f32 %v3431_v1, %v3419_v6  ;;  %v3434_v11 = vmul.f32 %v3431_v1, %v3420_v23 }
0x154a   : > { %5315 = vst.msk [vmem:[%s7332_s15 + $0x78] sm:$0x2] %vm1775_vm7, %v3412_v0  ;;  %v3435_v12 = vmul.f32 %v3431_v1, %v3421_v7  ;;  %v3436_v8 = vmul.f32 %v3431_v1, %v3422_v4  ;;  %s5115_s15 = ssub.f32 1.0, %s5112_s11 }
0x154b   : > { %6066 = vmatmul.mubr.msk.f32.vlgmr.msra.gmra.mrb[36].mxu0 %vm171_vm1, %v3432_v3 }
0x154c   : > { %6454 = vmatpush3.bf16.msra.mxu0 %v7708_v45  ;;  %6068 = vmatprep.mubr.msk.f32.mxu0 %vm6792_vm5, %v6793_v21 }
0x154d   : > { %6455 = vmatprep.subr.bf16.mxu0 %v6791_v19 }
0x154f   : > { %6069 = vmatmul.mubr.msk.f32.gmra.mrb[38].mxu0 %vm171_vm1, %v3433_v5 }
0x1550   : > { %6071 = vmatprep.mubr.msk.f32.mxu0 %vm6792_vm5, %v6793_v21  ;;  %6457 = vmatpush3.bf16.msra.mxu0 %v7712_v48 }
0x1551   : > { %6458 = vmatprep.subr.bf16.mxu0 %v6791_v19  ;;  %v3741_v15 = vld [vmem:[#allocation2 + $0x78] sm:$0xff]  ;;  %v3742_v18 = vld [vmem:[#allocation2 + $0x80] sm:$0xff]  ;;  %v3743_v16 = vld [vmem:[#allocation2 + $0x88] sm:$0xff] }
0x1552   : > { %v3755_v17 = vmul.f32 %v3754_v14, %v3741_v15  ;;  %v3756_v22 = vmul.f32 %v3754_v14, %v3742_v18  ;;  %v3757_v25 = vmul.f32 %v3754_v14, %v3743_v16  ;;  %v3744_v9 = vld [vmem:[#allocation2 + $0x90] sm:$0xff]  ;;  %v3745_v27 = vld [vmem:[#allocation2 + $0x98] sm:$0x1] }
0x1553   : > { %6072 = vmatmul.mubr.msk.f32.gmra.mrb[40].mxu0 %vm171_vm1, %v3434_v11  ;;  %v3758_v26 = vmul.f32 %v3754_v14, %v3744_v9  ;;  %v3759_v28 = vmul.f32 %v3754_v14, %v3745_v27 }
0x1554   : > { %6074 = vmatprep.mubr.msk.f32.mxu0 %vm6792_vm5, %v6793_v21 }
0x1557   : > { %6075 = vmatmul.mubr.msk.f32.gmra.mrb[42].mxu0 %vm171_vm1, %v3435_v12 }
0x1558   : > { %6077 = vmatprep.mubr.msk.f32.mxu0 %vm6792_vm5, %v6793_v21 }
0x155b   : > { %6078 = vmatmul.mubr.msk.f32.gmra.mrb[44].mxu0 %vm171_vm1, %v3436_v8 }
0x155c   : > { %6105 = vmatprep.mubr.msk.f32.mxu0 %vm6792_vm5, %v6793_v21 }
0x155f   : > { %6106 = vmatmul.mubr.msk.f32.vlgmr.msra.gmra.mrb[46].mxu0 %vm171_vm1, %v3755_v17 }
0x1560   : > { %6108 = vmatprep.mubr.msk.f32.mxu0 %vm6792_vm5, %v6793_v21 }
0x1563   : > { %6109 = vmatmul.mubr.msk.f32.gmra.mrb[48].mxu0 %vm171_vm1, %v3756_v22 }
0x1564   : > { %6111 = vmatprep.mubr.msk.f32.mxu0 %vm6792_vm5, %v6793_v21 }
0x1567   : > { %6112 = vmatmul.mubr.msk.f32.gmra.mrb[50].mxu0 %vm171_vm1, %v3757_v25 }
0x1568   : > { %6114 = vmatprep.mubr.msk.f32.mxu0 %vm6792_vm5, %v6793_v21 }
0x156b   : > { %6115 = vmatmul.mubr.msk.f32.gmra.mrb[52].mxu0 %vm171_vm1, %v3758_v26 }
0x156c   : > { %6117 = vmatprep.mubr.msk.f32.mxu0 %vm6792_vm5, %v6793_v21 }
0x156f   : > { %6118 = vmatmul.mubr.msk.f32.gmra.mrb[54].mxu0 %vm171_vm1, %v3759_v28 }
0x1570   : > { %6145 = vmatprep.mubr.msk.f32.mxu0 %vm6792_vm5, %v6793_v21 }
0x161e   : > { %v3522_v30 = vpop.f32.mrb[36].mxu0 }
0x161f   : > { %v6067_v33 = vpop.f32.mrb[37].mxu0  ;;  %v3546_v44 = vmul.f32 0.25, %v3522_v30 }
0x1621   : > { %v3551_v58 = vsel %vm1580_vm11, %v3546_v44, -1e+30 }
0x1622   : > { %v3527_v59 = vpop.f32.mrb[38].mxu0  ;;  %v3556_v2 = vsel %vm1590_vm12, %v3551_v58, -inf }
0x1623   : > { %v6070_v24 = vpop.f32.mrb[39].mxu0  ;;  %v3547_v49 = vmul.f32 0.25, %v3527_v59 }
0x1625   : > { %v3552_v0 = vsel %vm1581_vm13, %v3547_v49, -1e+30 }
0x1626   : > { %v3532_v63 = vpop.f32.mrb[40].mxu0  ;;  %v3557_v4 = vsel %vm1590_vm12, %v3552_v0, -inf }
0x1627   : > { %v3548_v35 = vmul.f32 0.25, %v3532_v63  ;;  %v6073_v41 = vpop.f32.mrb[41].mxu0 }
0x1629   : > { %v3553_v43 = vsel %vm1582_vm9, %v3548_v35, -1e+30 }
0x162a   : > { %v3537_v42 = vpop.f32.mrb[42].mxu0  ;;  %v3558_v52 = vsel %vm1590_vm12, %v3553_v43, -inf }
0x162b   : > { %v3549_v46 = vmul.f32 0.25, %v3537_v42  ;;  %v6076_v47 = vpop.f32.mrb[43].mxu0 }
0x162d   : > { %v3554_v50 = vsel %vm1583_vm10, %v3549_v46, -1e+30 }
0x162e   : > { %v3559_v55 = vsel %vm1590_vm12, %v3554_v50, -inf  ;;  %v3542_v56 = vpop.f32.mrb[44].mxu0 }
0x162f   : > { %v3563_v61 = vmax.f32 %v3558_v52, %v3559_v55  ;;  %v3550_v62 = vmul.f32 0.25, %v3542_v56  ;;  %v6079_v36 = vpop.f32.mrb[45].mxu0 }
0x1631   : > { %v3555_v1 = vsel %vm1584_vm14, %v3550_v62, -1e+30 }
0x1632   : > { %v3560_v6 = vsel %vm1595_vm15, %v3555_v1, -inf  ;;  %v3845_v23 = vpop.f32.mrb[46].mxu0 }
0x1633   : > { %v3561_v3 = vmax.f32 %v3556_v2, %v3560_v6  ;;  %v6107_v7 = vpop.f32.mrb[47].mxu0  ;;  %v3869_v10 = vmul.f32 0.25, %v3845_v23 }
0x1635   : > { %v3562_v5 = vmax.f32 %v3561_v3, %v3557_v4  ;;  %v3874_v46 = vsel %vm1580_vm11, %v3869_v10, -1e+30 }
0x1636   : > { %v3850_v11 = vpop.f32.mrb[48].mxu0  ;;  %v3879_v32 = vsel %vm1590_vm12, %v3874_v46, -inf }
0x1637   : > { %v3564_v12 = vmax.f32 %v3562_v5, %v3563_v61  ;;  %v6110_v8 = vpop.f32.mrb[49].mxu0  ;;  %v3870_v59 = vmul.f32 0.25, %v3850_v11 }
0x1639   : > { %v3565_v15 = vrot.slane %v3564_v12, 4  ;;  %v3875_v56 = vsel %vm1581_vm13, %v3870_v59, -1e+30 }
0x163a   : > { %v3855_v14 = vpop.f32.mrb[50].mxu0 }
0x163b   : > { %v3566_v17 = vmax.f32 %v3564_v12, %v3565_v15  ;;  %v3871_v18 = vmul.f32 0.25, %v3855_v14  ;;  %v6113_v22 = vpop.f32.mrb[51].mxu0 }
0x163d   : > { %v3567_v16 = vrot.slane %v3566_v17, 2  ;;  %v7785_v26 = vsel %vm1582_vm9, %v3871_v18, -1e+30 }
0x163e   : > { %v3860_v25 = vpop.f32.mrb[52].mxu0  ;;  %v3881_v24 = vsel %vm1590_vm12, %v7785_v26, -inf }
0x163f   : > { %v3568_v9 = vmax.f32 %v3566_v17, %v3567_v16  ;;  %v3872_v27 = vmul.f32 0.25, %v3860_v25  ;;  %v6116_v28 = vpop.f32.mrb[53].mxu0 }
0x1641   : > { %v3569_v30 = vrot.slane %v3568_v9, 1  ;;  %v3877_v33 = vsel %vm1583_vm10, %v3872_v27, -1e+30 }
0x1642   : > { %v3882_v63 = vsel %vm1590_vm12, %v3877_v33, -inf  ;;  %v3865_v35 = vpop.f32.mrb[54].mxu0 }
0x1643   : > { %v3570_v41 = vmax.f32 %v3568_v9, %v3569_v30  ;;  %v3886_v42 = vmax.f32 %v3881_v24, %v3882_v63  ;;  %v3873_v51 = vmul.f32 0.25, %v3865_v35  ;;  %v6119_v44 = vpop.f32.mrb[55].mxu0 }
0x1645   : > { %v3571_v47 = vsub.f32 %v3551_v58, %v3570_v41  ;;  %v3572_v49 = vsub.f32 %v3552_v0, %v3570_v41  ;;  %v3573_v52 = vsub.f32 %v3553_v43, %v3570_v41  ;;  %v3574_v53 = vsub.f32 %v3554_v50, %v3570_v41 }
0x1646   : > { %v3575_v55 = vsub.f32 %v3555_v1, %v3570_v41  ;;  %v3878_v61 = vsel %vm1584_vm14, %v3873_v51, -1e+30  ;;  %v3880_v0 = vsel %vm1590_vm12, %v3875_v56, -inf }
0x1647   : > { %v3576_v62 = vmul.f32 1.442695, %v3571_v47  ;;  %v3578_v36 = vmul.f32 1.442695, %v3572_v49  ;;  %v3580_v2 = vmul.f32 1.442695, %v3573_v52 }
0x1648   : > { %v3582_v6 = vmul.f32 1.442695, %v3574_v53  ;;  %v3883_v58 = vsel %vm1595_vm15, %v3878_v61, -inf  ;;  %v3584_v43 = vmul.f32 1.442695, %v3575_v55 }
0x1649   : > { %6639 = vpow2.f32 %v3576_v62  ;;  %v3884_v50 = vmax.f32 %v3879_v32, %v3883_v58 }
0x164a   : > { %6641 = vpow2.f32 %v3578_v36 }
0x164b   : > { %6643 = vpow2.f32 %v3580_v2  ;;  %v3885_v57 = vmax.f32 %v3884_v50, %v3880_v0 }
0x164c   : > { %6645 = vpow2.f32 %v3582_v6 }
0x164d   : > { %6647 = vpow2.f32 %v3584_v43  ;;  %v3887_v60 = vmax.f32 %v3885_v57, %v3886_v42 }
0x164f   : > { %v3888_v1 = vrot.slane %v3887_v60, 4 }
0x1651   : > { %v3889_v23 = vmax.f32 %v3887_v60, %v3888_v1 }
0x1653   : > { %v6640_v3 = vpop.eup %6639  ;;  %v3890_v7 = vrot.slane %v3889_v23, 2 }
0x1654   : > { %v6642_v4 = vpop.eup %6641  ;;  %v3586_v5 = vsel %vm1590_vm12, %v6640_v3, 0.0 }
0x1655   : > { %v6644_v11 = vpop.eup %6643  ;;  %v3587_v12 = vsel %vm1590_vm12, %v6642_v4, 0.0  ;;  %v3891_v8 = vmax.f32 %v3889_v23, %v3890_v7 }
0x1656   : > { %v6646_v15 = vpop.eup %6645  ;;  %v3588_v14 = vadd.f32 %v3587_v12, %v3586_v5  ;;  %v3589_v18 = vsel %vm1590_vm12, %v6644_v11, 0.0  ;;  %v7817_v5 = vld [vmem:[%s8052_s16] sm:$0x3] }
0x1657   : > { %v6648_v17 = vpop.eup %6647  ;;  %v3892_v22 = vrot.slane %v3891_v8, 1  ;;  %v3591_v25 = vsel %vm1590_vm12, %v6646_v15, 0.0 }
0x1658   : > { %v3590_v16 = vadd.f32 %v3589_v18, %v3588_v14  ;;  %v3593_v28 = vsel %vm1595_vm15, %v6648_v17, 0.0 }
0x1659   : > { %v3893_v9 = vmax.f32 %v3891_v8, %v3892_v22 }
0x165a   : > { %v3592_v27 = vadd.f32 %v3591_v25, %v3590_v16 }
0x165b   : > { %v3894_v10 = vsub.f32 %v3874_v46, %v3893_v9  ;;  %v3895_v30 = vsub.f32 %v3875_v56, %v3893_v9  ;;  %v3896_v59 = vsub.f32 %v7785_v26, %v3893_v9  ;;  %v3897_v24 = vsub.f32 %v3877_v33, %v3893_v9 }
0x165c   : > { %v3594_v63 = vadd.f32 %v3593_v28, %v3592_v27  ;;  %v3898_v35 = vsub.f32 %v3878_v61, %v3893_v9 }
0x165d   : > { %v3899_v41 = vmul.f32 1.442695, %v3894_v10  ;;  %v3901_v42 = vmul.f32 1.442695, %v3895_v30  ;;  %v3903_v51 = vmul.f32 1.442695, %v3896_v59 }
0x165e   : > { %v3595_v44 = vrot.slane %v3594_v63, 4  ;;  %v3905_v47 = vmul.f32 1.442695, %v3897_v24  ;;  %v3907_v52 = vmul.f32 1.442695, %v3898_v35  ;;  %v5328_v10 = vld [vmem:[%s8053_s22 + $0x20] sm:$0xff] }
0x165f   : > { %6649 = vpow2.f32 %v3899_v41  ;;  %v5329_v30 = vld [vmem:[%s8053_s22 + $0x28] sm:$0xff]  ;;  %v5330_v24 = vld [vmem:[%s8053_s22 + $0x30] sm:$0xff] }
0x1660   : > { %v3596_v49 = vadd.f32 %v3595_v44, %v3594_v63  ;;  %6651 = vpow2.f32 %v3901_v42  ;;  %v6459_v59 = vpack.c.bf16 %v5329_v30, %v5328_v10  ;;  %v5331_v63 = vld [vmem:[%s8053_s22 + $0x38] sm:$0xff] }
0x1661   : > { %6653 = vpow2.f32 %v3903_v51  ;;  %v6462_v35 = vpack.c.bf16 %v5331_v63, %v5330_v24  ;;  %v3750_v30 = vld [vmem:[#allocation3 + $0x98] sm:$0x1] }
0x1662   : > { %v3597_v53 = vrot.slane %v3596_v49, 2  ;;  %6655 = vpow2.f32 %v3905_v47  ;;  %6460 = vmatpush3.bf16.msra.mxu0 %v6459_v59 }
0x1663   : > { %6657 = vpow2.f32 %v3907_v52  ;;  %6461 = vmatprep.subr.bf16.mxu0 %v6791_v19 }
0x1664   : > { %v3598_v55 = vadd.f32 %v3597_v53, %v3596_v49 }
0x1666   : > { %v3599_v46 = vrot.slane %v3598_v55, 1  ;;  %6463 = vmatpush3.bf16.msra.mxu0 %v6462_v35 }
0x1667   : > { %6471 = vmatprep.subr.bf16.mxu0 %v7708_v45 }
0x1668   : > { %v3600_v56 = vadd.f32 %v3599_v46, %v3598_v55 }
0x1669   : > { %v6650_v26 = vpop.eup %6649 }
0x166a   : > { %v6652_v33 = vpop.eup %6651  ;;  %6659 = vrcp.f32 %v3600_v56  ;;  %v3909_v61 = vsel %vm1590_vm12, %v6650_v26, 0.0 }
0x166b   : > { %v6654_v62 = vpop.eup %6653  ;;  %v3910_v36 = vsel %vm1590_vm12, %v6652_v33, 0.0 }
0x166c   : > { %v6656_v2 = vpop.eup %6655  ;;  %v3911_v6 = vadd.f32 %v3910_v36, %v3909_v61  ;;  %v3912_v32 = vsel %vm1590_vm12, %v6654_v62, 0.0 }
0x166d   : > { %v6658_v58 = vpop.eup %6657  ;;  %v3914_v50 = vsel %vm1590_vm12, %v6656_v2, 0.0 }
0x166e   : > { %v3913_v43 = vadd.f32 %v3912_v32, %v3911_v6  ;;  %v3916_v57 = vsel %vm1595_vm15, %v6658_v58, 0.0 }
0x1670   : > { %v3915_v0 = vadd.f32 %v3914_v50, %v3913_v43 }
0x1672   : > { %v3917_v60 = vadd.f32 %v3916_v57, %v3915_v0  ;;  %v3746_v57 = vld [vmem:[#allocation3 + $0x78] sm:$0xff] }
0x1674   : > { %v6660_v1 = vpop.eup %6659  ;;  %v3918_v23 = vrot.slane %v3917_v60, 4 }
0x1675   : > { %v3602_v7 = vmul.f32 %v6660_v1, %v6640_v3  ;;  %v3603_v12 = vmul.f32 %v6660_v1, %v6642_v4  ;;  %v3604_v8 = vmul.f32 %v6660_v1, %v6644_v11  ;;  %v3605_v14 = vmul.f32 %v6660_v1, %v6646_v15 }
0x1676   : > { %v3919_v18 = vadd.f32 %v3918_v23, %v3917_v60  ;;  %v3606_v22 = vmul.f32 %v6660_v1, %v6648_v17  ;;  %v3747_v1 = vld [vmem:[#allocation3 + $0x80] sm:$0xff] }
0x1677   : > { %6083 = vmatmul.mubr.msk.f32.vlgmr.msra.gmra.mrb[44].mxu1 %vm1590_vm12, %v3602_v7 }
0x1678   : > { %v3920_v16 = vrot.slane %v3919_v18, 2  ;;  %6121 = vmatpush3.msk.msra.mxu1 %vm1659_vm8, %v7817_v5  ;;  %6085 = vmatprep.mubr.msk.f32.mxu1 %vm6792_vm5, %v6793_v21 }
0x1679   : > { %6464 = vmatprep.subr.bf16.mxu1 %v6791_v19 }
0x167a   : > { %v3921_v25 = vadd.f32 %v3920_v16, %v3919_v18  ;;  %v3748_v18 = vld [vmem:[#allocation3 + $0x88] sm:$0xff] }
0x167b   : > { %6086 = vmatmul.mubr.msk.f32.gmra.mrb[46].mxu1 %vm1590_vm12, %v3603_v12 }
0x167c   : > { %v3922_v3 = vrot.slane %v3921_v25, 1  ;;  %6088 = vmatprep.mubr.msk.f32.mxu1 %vm6792_vm5, %v6793_v21 }
0x167e   : > { %v3923_v4 = vadd.f32 %v3922_v3, %v3921_v25 }
0x167f   : > { %6089 = vmatmul.mubr.msk.f32.gmra.mrb[48].mxu1 %vm1590_vm12, %v3604_v8 }
0x1680   : > { %6661 = vrcp.f32 %v3923_v4  ;;  %6091 = vmatprep.mubr.msk.f32.mxu1 %vm6792_vm5, %v6793_v21 }
0x1683   : > { %6092 = vmatmul.mubr.msk.f32.gmra.mrb[50].mxu1 %vm1590_vm12, %v3605_v14 }
0x1684   : > { %6094 = vmatprep.mubr.msk.f32.mxu1 %vm6792_vm5, %v6793_v21 }
0x1687   : > { %6095 = vmatmul.mubr.msk.f32.gmra.mrb[52].mxu1 %vm1590_vm12, %v3606_v22 }
0x1688   : > { %6122 = vmatprep.mubr.msk.f32.mxu1 %vm6792_vm5, %v6793_v21 }
0x168a   : > { %v6662_v11 = vpop.eup %6661 }
0x168b   : > { %v3925_v15 = vmul.f32 %v6662_v11, %v6650_v26  ;;  %v3926_v17 = vmul.f32 %v6662_v11, %v6652_v33  ;;  %v3927_v9 = vmul.f32 %v6662_v11, %v6654_v62  ;;  %v3928_v27 = vmul.f32 %v6662_v11, %v6656_v2 }
0x168c   : > { %v3929_v28 = vmul.f32 %v6662_v11, %v6658_v58  ;;  %v3749_v11 = vld [vmem:[#allocation3 + $0x90] sm:$0xff] }
0x168d   : > { %6123 = vmatmul.mubr.msk.f32.vlgmr.msra.gmra.mrb[54].mxu1 %vm1590_vm12, %v3925_v15 }
0x168e   : > { %6125 = vmatprep.mubr.msk.f32.mxu1 %vm6792_vm5, %v6793_v21 }
0x1691   : > { %6126 = vmatmul.mubr.msk.f32.gmra.mrb[56].mxu1 %vm1590_vm12, %v3926_v17 }
0x1692   : > { %6128 = vmatprep.mubr.msk.f32.mxu1 %vm6792_vm5, %v6793_v21 }
0x1695   : > { %6129 = vmatmul.mubr.msk.f32.gmra.mrb[58].mxu1 %vm1590_vm12, %v3927_v9 }
0x1696   : > { %6131 = vmatprep.mubr.msk.f32.mxu1 %vm6792_vm5, %v6793_v21 }
0x1699   : > { %6132 = vmatmul.mubr.msk.f32.gmra.mrb[60].mxu1 %vm1590_vm12, %v3928_v27 }
0x169a   : > { %6134 = vmatprep.mubr.msk.f32.mxu1 %vm6792_vm5, %v6793_v21 }
0x169d   : > { %6135 = vmatmul.mubr.msk.f32.gmra.mrb[62].mxu1 %vm1590_vm12, %v3929_v28 }
0x169e   : > { %6156 = vmatprep.mubr.msk.f32.mxu1 %vm6792_vm5, %v6793_v21 }
0x174a   : > { %v3692_v41 = vpop.f32.mrb[44].mxu1 }
0x174b   : > { %v6084_v42 = vpop.f32.mrb[45].mxu1  ;;  %v3716_v51 = vmul.f32 %v3692_v41, %v7693_v37 }
0x174d   : > { %v3721_v52 = vsel %vm171_vm1, %v3716_v51, 0.0 }
0x174e   : > { %v3697_v44 = vpop.f32.mrb[46].mxu1 }
0x174f   : > { %v3717_v47 = vmul.f32 %v3697_v44, %v7695_v38  ;;  %v6087_v49 = vpop.f32.mrb[47].mxu1 }
0x1751   : > { %v3722_v53 = vsel %vm171_vm1, %v3717_v47, 0.0 }
0x1752   : > { %v3723_v55 = vadd.f32 %v3722_v53, %v3721_v52  ;;  %v3702_v46 = vpop.f32.mrb[48].mxu1 }
0x1753   : > { %v3718_v56 = vmul.f32 %v3702_v46, %v7697_v31  ;;  %v6090_v26 = vpop.f32.mrb[49].mxu1 }
0x1755   : > { %v3724_v33 = vsel %vm171_vm1, %v3718_v56, 0.0 }
0x1756   : > { %v3725_v61 = vadd.f32 %v3724_v33, %v3723_v55  ;;  %v3707_v62 = vpop.f32.mrb[50].mxu1 }
0x1757   : > { %v3719_v36 = vmul.f32 %v3707_v62, %v7699_v39  ;;  %v6093_v37 = vpop.f32.mrb[51].mxu1 }
0x1759   : > { %v3726_v2 = vsel %vm171_vm1, %v3719_v36, 0.0 }
0x175a   : > { %v3727_v38 = vadd.f32 %v3726_v2, %v3725_v61  ;;  %v3712_v6 = vpop.f32.mrb[52].mxu1 }
0x175b   : > { %v3720_v32 = vmul.f32 %v3712_v6, %v7701_v40  ;;  %v6096_v58 = vpop.f32.mrb[53].mxu1 }
0x175c   : > { %v5335_v58 = vld [vmem:[%s8054_s0 + $0x20] sm:$0xff] }
0x175d   : > { %v3728_v43 = vsel %vm229_vm3, %v3720_v32, 0.0 }
0x175e   : > { %v3729_v50 = vadd.f32 %v3728_v43, %v3727_v38  ;;  %v5336_v43 = vld [vmem:[%s8054_s0 + $0x28] sm:$0xff] }
0x1760   : > { %v4015_v0 = vpop.f32.mrb[54].mxu1  ;;  %v3730_v3 = vrot.slane %v3729_v50, 4 }
0x1761   : > { %v6124_v31 = vpop.f32.mrb[55].mxu1  ;;  %v4039_v60 = vmul.f32 %v4015_v0, %v3746_v57  ;;  %v5337_v0 = vld [vmem:[%s8054_s0 + $0x30] sm:$0xff] }
0x1762   : > { %v3731_v28 = vadd.f32 %v3730_v3, %v3729_v50  ;;  %v6465_v50 = vpack.c.bf16 %v5336_v43, %v5335_v58  ;;  %v5338_v31 = vld [vmem:[%s8054_s0 + $0x38] sm:$0xff] }
0x1763   : > { %v4044_v39 = vsel %vm171_vm1, %v4039_v60, 0.0  ;;  %v4461_v58 = vld [vmem:[#allocation4 + $0x38] sm:$0x1] }
0x1764   : > { %v4020_v23 = vpop.f32.mrb[56].mxu1  ;;  %v3732_v41 = vrot.slane %v3731_v28, 2  ;;  %6466 = vmatpush3.bf16.msra.mxu1 %v6465_v50  ;;  %v4250_v50 = vld [vmem:[#allocation5 + $0x20] sm:$0xff] }
0x1765   : > { %v4040_v7 = vmul.f32 %v4020_v23, %v3747_v1  ;;  %v6127_v12 = vpop.f32.mrb[57].mxu1  ;;  %6467 = vmatprep.subr.bf16.mxu1 %v6791_v19 }
0x1766   : > { %v3733_v44 = vadd.f32 %v3732_v41, %v3731_v28 }
0x1767   : > { %v4045_v8 = vsel %vm171_vm1, %v4040_v7, 0.0  ;;  %v5333_v7 = vld [vmem:[#allocation8 + $0x1] ss:$0 sm:$0xff] }
0x1768   : > { %v4046_v14 = vadd.f32 %v4045_v8, %v4044_v39  ;;  %v4025_v22 = vpop.f32.mrb[58].mxu1  ;;  %v3734_v52 = vrot.slane %v3733_v44, 1  ;;  %v5334_v39 = vld [vmem:[#allocation10 + $0x1] ss:$0 sm:$0xff] }
0x1769   : > { %v4041_v40 = vmul.f32 %v4025_v22, %v3748_v18  ;;  %v6130_v16 = vpop.f32.mrb[59].mxu1  ;;  %v4248_v22 = vld [vmem:[#allocation4 + $0x20] sm:$0xff] }
0x176a   : > { %v3735_v46 = vadd.f32 %v3734_v52, %v3733_v44 }
0x176b   : > { %v4047_v25 = vsel %vm171_vm1, %v4041_v40, 0.0  ;;  %v4249_v40 = vld [vmem:[#allocation4 + $0x28] sm:$0x1] }
0x176c   : > { %v4048_v4 = vadd.f32 %v4047_v25, %v4046_v14  ;;  %v4030_v15 = vpop.f32.mrb[60].mxu1 }
0x176d   : > { %v4042_v17 = vmul.f32 %v4030_v15, %v3749_v11  ;;  %v6133_v9 = vpop.f32.mrb[61].mxu1 }
0x176f   : > { %v4049_v27 = vsel %vm171_vm1, %v4042_v17, 0.0 }
0x1770   : > { %v4050_v10 = vadd.f32 %v4049_v27, %v4048_v4  ;;  %v4035_v59 = vpop.f32.mrb[62].mxu1 }
0x1771   : > { %v4043_v24 = vmul.f32 %v4035_v59, %v3750_v30  ;;  %v6136_v63 = vpop.f32.mrb[63].mxu1 }
0x1773   : > { %v4051_v35 = vsel %vm229_vm3, %v4043_v24, 0.0 }
0x1774   : > { %v4052_v42 = vadd.f32 %v4051_v35, %v4050_v10 }
0x1776   : > { %v4053_v51 = vrot.slane %v4052_v42, 4 }
0x1778   : > { %v4054_v47 = vadd.f32 %v4053_v51, %v4052_v42 }
0x177a   : > { %v4055_v49 = vrot.slane %v4054_v47, 2 }
0x177c   : > { %v4056_v53 = vadd.f32 %v4055_v49, %v4054_v47 }
0x177e   : > { %v4057_v55 = vrot.slane %v4056_v53, 1 }
0x1780   : > { %v4058_v56 = vadd.f32 %v4057_v55, %v4056_v53 }
0x1782   : > { %v4059_v26 = vsel %vm389_vm4, %v3735_v46, %v4058_v56 }
0x1783   : > { %6146 = vmatmul.mubr.msk.f32.vlgmr.msra.gmra.mrb[56].mxu0 %vm171_vm1, %v4059_v26 }
0x1784   : > { %6473 = vmatpush3.bf16.msra.mxu0 %v7708_v45 }
0x1785   : > { %6475 = vmatprep.subr.bf16.mxu0 %v7712_v48 }
0x1788   : > { %6477 = vmatpush3.bf16.msra.mxu0 %v7712_v48 }
0x1789   : > { %6186 = vmatprep.subr.msk.mxu0 %vm1659_vm8, %v7817_v5 }
0x1856   : > { %v4134_v33 = vpop.f32.mrb[56].mxu0 }
0x1857   : > { %v7881_v61 = vadd.f32 %v4134_v33, %v7646_v13  ;;  %v6147_v62 = vpop.f32.mrb[57].mxu0  ;;  %v6468_v13 = vpack.c.bf16 %v5338_v31, %v5337_v0 }
0x1859   : > { %v4143_v36 = vsel %vm169_vm0, %v7881_v61, 0.0  ;;  %6469 = vmatpush3.bf16.msra.mxu1 %v6468_v13 }
0x185a   : > { %4144 = vadd.xlane.f32.xlu0 %v4143_v36  ;;  %6170 = vmatprep.subr.msk.mxu1 %vm1659_vm8, %v7817_v5 }
0x18e7   : > { %v4145_v37 = vpop.xlane.xlu0 %4144 }
0x18e8   : > { %v4146_v2 = vmul.f32 0.03125, %v4145_v37 }
0x18ea   : > { %v4147_v38 = vsub.f32 %v7881_v61, %v4146_v2  ;;  %v4460_v2 = vld [vmem:[#allocation4 + $0x30] sm:$0xff] }
0x18ec   : > { %v4148_v6 = vmul.f32 %v4147_v38, %v4147_v38 }
0x18ee   : > { %v4149_v32 = vsel %vm169_vm0, %v4148_v6, 0.0 }
0x18ef   : > { %4150 = vadd.xlane.f32.xlu1 %v4149_v32 }
0x197c   : > { %v4151_v57 = vpop.xlane.xlu1 %4150 }
0x197d   : > { %v4152_v60 = vmul.f32 0.03125, %v4151_v57 }
0x197f   : > { %v4153_v1 = vadd.f32 1e-05, %v4152_v60 }
0x1981   : > { %6663 = vrsqrt.f32 %v4153_v1 }
0x198b   : > { %v6664_v23 = vpop.eup %6663 }
0x198c   : > { %v4155_v12 = vmul.f32 %v6664_v23, %v4147_v38 }
0x198e   : > { %v4162_v8 = vmul.f32 %v5333_v7, %v4155_v12 }
0x1990   : > { %v4169_v14 = vadd.f32 %v5334_v39, %v4162_v8 }
0x1992   : > { %6157 = vmatmul.mubr.msk.f32.vlgmr.msra.gmra.mrb[64].mxu1 %vm171_vm1, %v4169_v14 }
0x1993   : > { %6171 = vmatpush3.msk.msra.mxu1 %vm1659_vm8, %v7817_v5 }
0x1994   : > { %6479 = vmatprep.subr.bf16.mxu1 %v7708_v45 }
0x1a65   : > { %v4244_v18 = vpop.f32.mrb[64].mxu1 }
0x1a66   : > { %v4255_v16 = vrot.slane %v4244_v18, %v7337_v34  ;;  %v6158_v25 = vpop.f32.mrb[65].mxu1  ;;  %v4467_v36 = vrot.slane %v4244_v18, %v7428_v29  ;;  %v4251_v29 = vld [vmem:[#allocation5 + $0x28] sm:$0x1] }
0x1a68   : > { %v4256_v3 = vmul.f32 %v4255_v16, %v4248_v22  ;;  %v4257_v4 = vmul.f32 %v4255_v16, %v4249_v40  ;;  %v4468_v32 = vmul.f32 %v4467_v36, %v4460_v2  ;;  %v4469_v43 = vmul.f32 %v4467_v36, %v4461_v58 }
0x1a6a   : > { %6167 = vmatprep.mubr.msk.f32.mxu0 %vm171_vm1, %v4256_v3 }
0x1a6b   : > { %6168 = vmatmul.mubr.msk.f32.vlgmr.msra.gmra.mrb[58].mxu0 %vm171_vm1, %v4257_v4 }
0x1a6c   : > { %6187 = vmatpush3.msk.msra.mxu0 %vm1659_vm8, %v7817_v5 }
0x1a6d   : > { %6486 = vmatprep.subr.bf16.mxu0 %v6791_v19 }
0x1b3e   : > { %v6169_v11 = vpop.f32.mrb[58].mxu0 }
0x1b3f   : > { %v4340_v15 = vmul.f32 0.25, %v6169_v11  ;;  %v4330_v17 = vpop.f32.mrb[59].mxu0 }
0x1b40   : > { %v4339_v9 = vmul.f32 0.25, %v4330_v17 }
0x1b41   : > { %v4342_v27 = vsel %vm1595_vm15, %v4340_v15, -inf }
0x1b42   : > { %v4341_v34 = vsel %vm1590_vm12, %v4339_v9, -inf }
0x1b43   : > { %v4343_v28 = vmax.f32 %v4341_v34, %v4342_v27 }
0x1b45   : > { %v4344_v10 = vrot.slane %v4343_v28, 4 }
0x1b47   : > { %v4345_v30 = vmax.f32 %v4343_v28, %v4344_v10 }
0x1b49   : > { %v4346_v59 = vrot.slane %v4345_v30, 2 }
0x1b4b   : > { %v4347_v24 = vmax.f32 %v4345_v30, %v4346_v59 }
0x1b4d   : > { %v4348_v63 = vrot.slane %v4347_v24, 1 }
0x1b4f   : > { %v4349_v35 = vmax.f32 %v4347_v24, %v4348_v63 }
0x1b51   : > { %v4350_v41 = vsub.f32 %v4339_v9, %v4349_v35  ;;  %v4351_v42 = vsub.f32 %v4340_v15, %v4349_v35 }
0x1b53   : > { %v4352_v5 = vmul.f32 1.442695, %v4350_v41  ;;  %v4354_v51 = vmul.f32 1.442695, %v4351_v42 }
0x1b55   : > { %6665 = vpow2.f32 %v4352_v5 }
0x1b56   : > { %6667 = vpow2.f32 %v4354_v51 }
0x1b5f   : > { %v6666_v44 = vpop.eup %6665 }
0x1b60   : > { %v6668_v47 = vpop.eup %6667  ;;  %v4356_v49 = vsel %vm1590_vm12, %v6666_v44, 0.0 }
0x1b61   : > { %v4357_v52 = vsel %vm1595_vm15, %v6668_v47, 0.0 }
0x1b62   : > { %v4358_v53 = vadd.f32 %v4357_v52, %v4356_v49  ;;  %v5352_v52 = vld [vmem:[%s8055_s23 + $0x30] sm:$0xff] }
0x1b64   : > { %v4359_v55 = vrot.slane %v4358_v53, 4 }
0x1b66   : > { %v4360_v46 = vadd.f32 %v4359_v55, %v4358_v53  ;;  %v5353_v53 = vld [vmem:[%s8055_s23 + $0x38] sm:$0xff] }
0x1b67   : > { %v6490_v55 = vpack.c.bf16 %v5353_v53, %v5352_v52  ;;  %v5374_v53 = vld [vmem:[%s6962_s6 + $0xc0] sm:$0xff] }
0x1b68   : > { %v4361_v56 = vrot.slane %v4360_v46, 2 }
0x1b6a   : > { %v4362_v26 = vadd.f32 %v4361_v56, %v4360_v46  ;;  %v4463_v56 = vld [vmem:[#allocation5 + $0x38] sm:$0x1] }
0x1b6c   : > { %v4363_v33 = vrot.slane %v4362_v26, 1 }
0x1b6e   : > { %v4364_v62 = vadd.f32 %v4363_v33, %v4362_v26  ;;  %v4462_v26 = vld [vmem:[#allocation5 + $0x30] sm:$0xff] }
0x1b70   : > { %6669 = vrcp.f32 %v4364_v62 }
0x1b7a   : > { %v6670_v37 = vpop.eup %6669 }
0x1b7b   : > { %v4366_v38 = vmul.f32 %v6670_v37, %v6666_v44  ;;  %v4367_v6 = vmul.f32 %v6670_v37, %v6668_v47  ;;  %v5350_v44 = vld [vmem:[%s8055_s23 + $0x20] sm:$0xff]  ;;  %v5351_v47 = vld [vmem:[%s8055_s23 + $0x28] sm:$0xff] }
0x1b7c   : > { %v6487_v49 = vpack.c.bf16 %v5351_v47, %v5350_v44  ;;  %v5372_v47 = vld [vmem:[%s6962_s6 + $0xb0] sm:$0xff] }
0x1b7d   : > { %6172 = vmatprep.mubr.msk.f32.mxu1 %vm1590_vm12, %v4366_v38 }
0x1b7e   : > { %6173 = vmatmul.mubr.msk.f32.vlgmr.msra.gmra.mrb[66].mxu1 %vm1590_vm12, %v4367_v6 }
0x1b7f   : > { %6481 = vmatpush3.bf16.msra.mxu1 %v7708_v45  ;;  %6183 = vmatprep.mubr.msk.f32.mxu1 %vm171_vm1, %v4468_v32 }
0x1b80   : > { %6483 = vmatprep.subr.bf16.mxu1 %v7712_v48 }
0x1b83   : > { %6485 = vmatpush3.bf16.msra.mxu1 %v7712_v48 }
0x1b84   : > { %6492 = vmatprep.subr.bf16.mxu1 %v6791_v19 }
0x1b86   : > { %6184 = vmatmul.mubr.msk.f32.vlgmr.msra.gmra.mrb[68].mxu1 %vm171_vm1, %v4469_v43 }
0x1b87   : > { %6210 = vmatprep.mubr.msk.f32.mxu1 %vm6792_vm5, %v6793_v21 }
0x1c51   : > { %v6174_v0 = vpop.f32.mrb[66].mxu1 }
0x1c52   : > { %v4450_v31 = vmul.f32 %v6174_v0, %v4251_v29  ;;  %v4440_v45 = vpop.f32.mrb[67].mxu1 }
0x1c53   : > { %v4449_v13 = vmul.f32 %v4440_v45, %v4250_v50 }
0x1c54   : > { %v4452_v57 = vsel %vm229_vm3, %v4450_v31, 0.0 }
0x1c55   : > { %v4451_v60 = vsel %vm171_vm1, %v4449_v13, 0.0 }
0x1c56   : > { %v4453_v1 = vadd.f32 %v4452_v57, %v4451_v60 }
0x1c58   : > { %v4454_v46 = vrot.slane %v4453_v1, 4 }
0x1c59   : > { %v6185_v48 = vpop.f32.mrb[68].mxu1 }
0x1c5a   : > { %v4552_v23 = vmul.f32 0.25, %v6185_v48  ;;  %v4542_v7 = vpop.f32.mrb[69].mxu1  ;;  %v4455_v62 = vadd.f32 %v4454_v46, %v4453_v1 }
0x1c5b   : > { %v4551_v12 = vmul.f32 0.25, %v4542_v7 }
0x1c5c   : > { %v4554_v39 = vsel %vm1595_vm15, %v4552_v23, -inf  ;;  %v4456_v32 = vrot.slane %v4455_v62, 2 }
0x1c5d   : > { %v4553_v8 = vsel %vm1590_vm12, %v4551_v12, -inf }
0x1c5e   : > { %v4555_v14 = vmax.f32 %v4553_v8, %v4554_v39  ;;  %v4457_v29 = vadd.f32 %v4456_v32, %v4455_v62  ;;  %v5378_v62 = vld [vmem:[%s6962_s6 + $0xe0] sm:$0xff] }
0x1c5f   : > { %v5364_v32 = vld [vmem:[%s6957_s30 + $0x1] ss:$0 sm:$0xff] }
0x1c60   : > { %v4556_v18 = vrot.slane %v4555_v14, 4  ;;  %v4458_v45 = vrot.slane %v4457_v29, 1 }
0x1c62   : > { %v4557_v22 = vmax.f32 %v4555_v14, %v4556_v18  ;;  %v4459_v57 = vadd.f32 %v4458_v45, %v4457_v29 }
0x1c64   : > { %v4558_v40 = vrot.slane %v4557_v22, 2 }
0x1c66   : > { %v4559_v16 = vmax.f32 %v4557_v22, %v4558_v40  ;;  %v5359_v40 = vld [vmem:[%s8056_s26 + $0x20] sm:$0xff] }
0x1c68   : > { %v4560_v25 = vrot.slane %v4559_v16, 1 }
0x1c6a   : > { %v4561_v3 = vmax.f32 %v4559_v16, %v4560_v25  ;;  %v5360_v16 = vld [vmem:[%s8056_s26 + $0x28] sm:$0xff]  ;;  %v5361_v25 = vld [vmem:[%s8056_s26 + $0x30] sm:$0xff] }
0x1c6c   : > { %v4562_v4 = vsub.f32 %v4551_v12, %v4561_v3  ;;  %v4563_v11 = vsub.f32 %v4552_v23, %v4561_v3  ;;  %v5362_v3 = vld [vmem:[%s8056_s26 + $0x38] sm:$0xff] }
0x1c6e   : > { %v4564_v15 = vmul.f32 1.442695, %v4562_v4  ;;  %v4566_v17 = vmul.f32 1.442695, %v4563_v11  ;;  %v6496_v4 = vpack.c.bf16 %v5362_v3, %v5361_v25  ;;  %v5366_v11 = vld [vmem:[%s6962_s6 + $0x80] sm:$0xff] }
0x1c6f   : > { %v5004_v3 = vld [vmem:[%s8059_s2] sm:$0xff] }
0x1c70   : > { %6671 = vpow2.f32 %v4564_v15  ;;  %v5367_v15 = vld [vmem:[%s6962_s6 + $0x88] sm:$0xff] }
0x1c71   : > { %6673 = vpow2.f32 %v4566_v17  ;;  %v6499_v17 = vpack.c.bf16 %v5367_v15, %v5366_v11  ;;  %v5006_v11 = vld [vmem:[%s8059_s2 + $0x10] sm:$0xff] }
0x1c7a   : > { %v6672_v9 = vpop.eup %6671 }
0x1c7b   : > { %v6674_v27 = vpop.eup %6673  ;;  %v4568_v34 = vsel %vm1590_vm12, %v6672_v9, 0.0 }
0x1c7c   : > { %v4569_v28 = vsel %vm1595_vm15, %v6674_v27, 0.0 }
0x1c7d   : > { %v4570_v10 = vadd.f32 %v4569_v28, %v4568_v34 }
0x1c7f   : > { %v4571_v30 = vrot.slane %v4570_v10, 4 }
0x1c81   : > { %v4572_v59 = vadd.f32 %v4571_v30, %v4570_v10  ;;  %v5357_v10 = vld [vmem:[%s8057_s28 + $0x1] ss:$0 sm:$0xff] }
0x1c83   : > { %v4573_v24 = vrot.slane %v4572_v59, 2 }
0x1c85   : > { %v4574_v63 = vadd.f32 %v4573_v24, %v4572_v59  ;;  %v5358_v59 = vld [vmem:[%s8058_s1 + $0x1] ss:$0 sm:$0xff] }
0x1c87   : > { %v4575_v35 = vrot.slane %v4574_v63, 1 }
0x1c89   : > { %v4576_v41 = vadd.f32 %v4575_v35, %v4574_v63  ;;  %v5368_v35 = vld [vmem:[%s6962_s6 + $0x90] sm:$0xff] }
0x1c8b   : > { %6675 = vrcp.f32 %v4576_v41  ;;  %v5369_v41 = vld [vmem:[%s6962_s6 + $0x98] sm:$0xff] }
0x1c95   : > { %v6676_v42 = vpop.eup %6675 }
0x1c96   : > { %v4578_v5 = vmul.f32 %v6676_v42, %v6672_v9  ;;  %v4579_v51 = vmul.f32 %v6676_v42, %v6674_v27  ;;  %v6502_v42 = vpack.c.bf16 %v5369_v41, %v5368_v35 }
0x1c98   : > { %6188 = vmatprep.mubr.msk.f32.mxu0 %vm1590_vm12, %v4578_v5  ;;  %v5370_v5 = vld [vmem:[%s6962_s6 + $0xa0] sm:$0xff] }
0x1c99   : > { %6189 = vmatmul.mubr.msk.f32.vlgmr.msra.gmra.mrb[60].mxu0 %vm1590_vm12, %v4579_v51  ;;  %v5371_v51 = vld [vmem:[%s6962_s6 + $0xa8] sm:$0xff] }
0x1c9a   : > { %6199 = vmatprep.mubr.msk.f32.mxu0 %vm6792_vm5, %v6793_v21  ;;  %6488 = vmatpush3.bf16.msra.mxu0 %v6487_v49  ;;  %v6505_v44 = vpack.c.bf16 %v5371_v51, %v5370_v5  ;;  %v5373_v49 = vld [vmem:[%s6962_s6 + $0xb8] sm:$0xff] }
0x1c9b   : > { %6489 = vmatprep.subr.bf16.mxu0 %v6791_v19  ;;  %v6508_v52 = vpack.c.bf16 %v5373_v49, %v5372_v47  ;;  %v5389_v49 = vld [vmem:[%s5143_s7 + $0x21] sm:$0x1] }
0x1c9e   : > { %6491 = vmatpush3.bf16.msra.mxu0 %v6490_v55  ;;  %v5375_v55 = vld [vmem:[%s6962_s6 + $0xc8] sm:$0xff] }
0x1c9f   : > { %6498 = vmatprep.subr.bf16.mxu0 %v6791_v19  ;;  %v6511_v46 = vpack.c.bf16 %v5375_v55, %v5374_v53  ;;  %v5388_v53 = vld [vmem:[%s5143_s7 + $0x1] sm:$0x1] }
0x1d6c   : > { %v6190_v33 = vpop.f32.mrb[60].mxu0 }
0x1d6d   : > { %v4662_v36 = vmul.f32 %v6190_v33, %v4463_v56  ;;  %v4652_v37 = vpop.f32.mrb[61].mxu0  ;;  %v5376_v56 = vld [vmem:[%s6962_s6 + $0xd0] sm:$0xff] }
0x1d6e   : > { %v4661_v2 = vmul.f32 %v4652_v37, %v4462_v26  ;;  %v5377_v26 = vld [vmem:[%s6962_s6 + $0xd8] sm:$0xff] }
0x1d6f   : > { %v4664_v38 = vsel %vm229_vm3, %v4662_v36, 0.0  ;;  %v6514_v33 = vpack.c.bf16 %v5377_v26, %v5376_v56  ;;  %v5379_v36 = vld [vmem:[%s6962_s6 + $0xe8] sm:$0xff]  ;;  %v5113_v26 = vstv %s5112_s11 }
0x1d70   : > { %v4663_v6 = vsel %vm171_vm1, %v4661_v2, 0.0  ;;  %v6517_v37 = vpack.c.bf16 %v5379_v36, %v5378_v62  ;;  %v5380_v2 = vld [vmem:[%s6962_s6 + $0xf0] sm:$0xff]  ;;  %v5116_v62 = vstv %s5115_s15 }
0x1d71   : > { %v4665_v58 = vadd.f32 %v4664_v38, %v4663_v6  ;;  %v5381_v38 = vld [vmem:[%s6962_s6 + $0xf8] sm:$0xff] }
0x1d72   : > { %v6520_v6 = vpack.c.bf16 %v5381_v38, %v5380_v2 }
0x1d73   : > { %v4666_v43 = vrot.slane %v4665_v58, 4 }
0x1d75   : > { %v4667_v50 = vadd.f32 %v4666_v43, %v4665_v58 }
0x1d77   : > { %v4668_v0 = vrot.slane %v4667_v50, 2 }
0x1d79   : > { %v4669_v31 = vadd.f32 %v4668_v0, %v4667_v50 }
0x1d7b   : > { %v4670_v13 = vrot.slane %v4669_v31, 1 }
0x1d7d   : > { %v4671_v60 = vadd.f32 %v4670_v13, %v4669_v31 }
0x1d7f   : > { %v4672_v1 = vsel %vm389_vm4, %v4459_v57, %v4671_v60 }
0x1d80   : > { %6200 = vmatmul.mubr.msk.f32.vlgmr.msra.gmra.mrb[62].mxu0 %vm171_vm1, %v4672_v1 }
0x1d81   : > { %6245 = vmatprep.mubr.msk.f32.mxu0 %vm6792_vm5, %v6793_v21  ;;  %6500 = vmatpush3.bf16.msra.mxu0 %v6499_v17  ;;  %v5007_v17 = vld [vmem:[%s8059_s2 + $0x18] sm:$0xff] }
0x1d82   : > { %6501 = vmatprep.subr.bf16.mxu0 %v6791_v19 }
0x1d85   : > { %6503 = vmatpush3.bf16.msra.mxu0 %v6502_v42  ;;  %v5086_v42 = vand.u32 127, %v1450_v20  ;;  %v5098_v20 = vld [vmem:[%s6972_s27] sm:$0x3] }
0x1d86   : > { %6504 = vmatprep.subr.bf16.mxu0 %v6791_v19 }
0x1d87   : > { %v5088_v5 = vcvt.s32.f32 %v5086_v42  ;;  %vm5097_vm6 = vcmp.eq.s32.totalorder %v5086_v42, %v7371_v54 }
0x1d89   : > { %6506 = vmatpush3.bf16.msra.mxu0 %v6505_v44 }
0x1d8a   : > { %6507 = vmatprep.subr.bf16.mxu0 %v6791_v19 }
0x1d8d   : > { %6509 = vmatpush3.bf16.msra.mxu0 %v6508_v52  ;;  %v5107_v52 = vrot.slane %v5389_v49, 7 }
0x1d8e   : > { %6510 = vmatprep.subr.bf16.mxu0 %v6791_v19 }
0x1d8f   : > { %v5109_v56 = vsel %vm389_vm4, %v5388_v53, %v5107_v52 }
0x1d90   : > { %v5114_v36 = vmul.f32 %v5113_v26, %v5109_v56 }
0x1d91   : > { %6512 = vmatpush3.bf16.msra.mxu0 %v6511_v46 }
0x1d92   : > { %6513 = vmatprep.subr.bf16.mxu0 %v6791_v19 }
0x1d95   : > { %6515 = vmatpush3.bf16.msra.mxu0 %v6514_v33 }
0x1d96   : > { %6516 = vmatprep.subr.bf16.mxu0 %v6791_v19 }
0x1d99   : > { %6518 = vmatpush3.bf16.msra.mxu0 %v6517_v37 }
0x1d9a   : > { %6519 = vmatprep.subr.bf16.mxu0 %v6791_v19 }
0x1d9d   : > { %6521 = vmatpush3.bf16.msra.mxu0 %v6520_v6 }
0x1e53   : > { %v4747_v48 = vpop.f32.mrb[62].mxu0 }
0x1e54   : > { %v7942_v23 = vadd.f32 %v4747_v48, %v7881_v61  ;;  %v6201_v7 = vpop.f32.mrb[63].mxu0  ;;  %v6493_v61 = vpack.c.bf16 %v5360_v16, %v5359_v40 }
0x1e56   : > { %v4756_v12 = vsel %vm169_vm0, %v7942_v23, 0.0  ;;  %6494 = vmatpush3.bf16.msra.mxu1 %v6493_v61 }
0x1e57   : > { %4757 = vadd.xlane.f32.xlu0 %v4756_v12  ;;  %6495 = vmatprep.subr.bf16.mxu1 %v6791_v19  ;;  %v5383_v12 = vld [vmem:[%s6967_s25 + $0x1] ss:$0 sm:$0xff] }
0x1e5a   : > { %6497 = vmatpush3.bf16.msra.mxu1 %v6496_v4  ;;  %v5005_v4 = vld [vmem:[%s8059_s2 + $0x8] sm:$0xff] }
0x1e5b   : > { %6522 = vmatprep.subr.bf16.mxu1 %v6791_v19  ;;  %v6523_v15 = vpack.c.bf16 %v5005_v4, %v5004_v3 }
0x1ee4   : > { %v4758_v39 = vpop.xlane.xlu0 %4757 }
0x1ee5   : > { %v4759_v8 = vmul.f32 0.03125, %v4758_v39 }
0x1ee7   : > { %v4760_v14 = vsub.f32 %v7942_v23, %v4759_v8 }
0x1ee9   : > { %v4761_v18 = vmul.f32 %v4760_v14, %v4760_v14 }
0x1eeb   : > { %v4762_v22 = vsel %vm169_vm0, %v4761_v18, 0.0 }
0x1eec   : > { %4763 = vadd.xlane.f32.xlu1 %v4762_v22 }
0x1f79   : > { %v4764_v9 = vpop.xlane.xlu1 %4763 }
0x1f7a   : > { %v4765_v27 = vmul.f32 0.03125, %v4764_v9 }
0x1f7c   : > { %v4766_v34 = vadd.f32 1e-05, %v4765_v27 }
0x1f7e   : > { %6677 = vrsqrt.f32 %v4766_v34 }
0x1f88   : > { %v6678_v28 = vpop.eup %6677 }
0x1f89   : > { %v4768_v30 = vmul.f32 %v6678_v28, %v4760_v14 }
0x1f8b   : > { %v4775_v24 = vmul.f32 %v5357_v10, %v4768_v30  ;;  %v5384_v10 = vld [vmem:[%s8060_s24] ss:$0 sm:$0xff] }
0x1f8d   : > { %v4782_v63 = vadd.f32 %v5358_v59, %v4775_v24  ;;  %v5385_v59 = vld [vmem:[%s8061_s4] ss:$0 sm:$0xff] }
0x1f8f   : > { %6211 = vmatmul.mubr.msk.f32.vlgmr.msra.gmra.mrb[70].mxu1 %vm171_vm1, %v4782_v63 }
0x1f90   : > { %6256 = vmatprep.mubr.msk.f32.mxu1 %vm6792_vm5, %v6793_v21  ;;  %6524 = vmatpush3.bf16.msra.mxu1 %v6523_v15 }
0x1f91   : > { %6525 = vmatprep.subr.bf16.mxu1 %v6791_v19 }
0x2062   : > { %v4865_v58 = vpop.f32.mrb[70].mxu1 }
0x2063   : > { %v4866_v43 = vadd.f32 %v5364_v32, %v4865_v58  ;;  %v6212_v29 = vpop.f32.mrb[71].mxu1 }
0x2065   : > { %v4869_v50 = vmul.f32 %v4866_v43, %v4866_v43 }
0x2067   : > { %v4870_v0 = vmul.f32 %v4869_v50, %v4866_v43 }
0x2069   : > { %v4871_v31 = vmul.f32 0.044715, %v4870_v0 }
0x206b   : > { %v4872_v45 = vadd.f32 %v4871_v31, %v4866_v43 }
0x206d   : > { %v4873_v13 = vmul.f32 0.7978846, %v4872_v45 }
0x206f   : > { %6679 = vtanh.f32 %v4873_v13 }
0x2079   : > { %v6680_v57 = vpop.eup %6679 }
0x207a   : > { %v4875_v60 = vadd.f32 1.0, %v6680_v57 }
0x207c   : > { %v4876_v1 = vmul.f32 0.5, %v4875_v60 }
0x207e   : > { %v4877_v48 = vmul.f32 %v4876_v1, %v4866_v43 }
0x2080   : > { %6246 = vmatmul.mubr.f32.vlgmr.msra.gmra.mrb[64].mxu0 %v4877_v48 }
0x2153   : > { %v4961_v7 = vpop.f32.mrb[64].mxu0 }
0x2154   : > { %v4965_v39 = vadd.f32 %v4961_v7, %v7942_v23  ;;  %v6247_v8 = vpop.f32.mrb[65].mxu0  ;;  %v6526_v23 = vpack.c.bf16 %v5007_v17, %v5006_v11 }
0x2156   : > { %v4974_v14 = vadd.f32 %v5383_v12, %v4965_v39  ;;  %6527 = vmatpush3.bf16.msra.mxu1 %v6526_v23 }
0x2158   : > { %v4977_v18 = vsel %vm169_vm0, %v4974_v14, 0.0 }
0x2159   : > { %4978 = vadd.xlane.f32.xlu0 %v4977_v18 }
0x21e6   : > { %v4979_v22 = vpop.xlane.xlu0 %4978 }
0x21e7   : > { %v4980_v40 = vmul.f32 0.03125, %v4979_v22 }
0x21e9   : > { %v4981_v16 = vsub.f32 %v4974_v14, %v4980_v40 }
0x21eb   : > { %v4982_v25 = vmul.f32 %v4981_v16, %v4981_v16 }
0x21ed   : > { %v4983_v61 = vsel %vm169_vm0, %v4982_v25, 0.0 }
0x21ee   : > { %4984 = vadd.xlane.f32.xlu1 %v4983_v61 }
0x227b   : > { %v4985_v9 = vpop.xlane.xlu1 %4984 }
0x227c   : > { %v4986_v27 = vmul.f32 0.03125, %v4985_v9 }
0x227e   : > { %v4987_v34 = vadd.f32 1e-05, %v4986_v27 }
0x2280   : > { %6681 = vrsqrt.f32 %v4987_v34 }
0x228a   : > { %v6682_v28 = vpop.eup %6681 }
0x228b   : > { %v4989_v30 = vmul.f32 %v6682_v28, %v4981_v16 }
0x228d   : > { %v4996_v24 = vmul.f32 %v5384_v10, %v4989_v30 }
0x228f   : > { %v5003_v63 = vadd.f32 %v5385_v59, %v4996_v24 }
0x2291   : > { %6257 = vmatmul.mubr.msk.f32.vlgmr.msra.gmra.mrb[72].mxu1 %vm171_vm1, %v5003_v63 }
0x2364   : > { %v5077_v35 = vpop.f32.mrb[72].mxu1 }
0x2365   : > { %v6258_v19 = vpop.f32.mrb[73].mxu1  ;;  %v5082_v41 = vsel %vm5081_vm2, %v5077_v35, -inf }
0x2366   : > { %5083 = vmax.xlane.f32.xlu0 %v5082_v41 }
0x23f3   : > { %v5084_v51 = vpop.xlane.xlu0 %5083 }
0x23f4   : > { %vm5087_vm5 = vcmp.ge.f32.partialorder %v5077_v35, %v5084_v51 }
0x23f5   : > { %v5089_v44 = vsel %vm5087_vm5, %v5088_v5, 17.0 }
0x23f6   : > { %v5090_v47 = vsel %vm5081_vm2, %v5089_v44, inf }
0x23f7   : > { %5091 = vmin.xlane.f32.xlu1 %v5090_v47 }
0x2484   : > { %v5092_v55 = vpop.xlane.xlu1 %5091 }
0x2485   : > { %v6530_v46 = vtrunc.f32 %v5092_v55 }
0x2487   : > { %v6531_v33 = vcvt.f32.s32 %v6530_v46  ;;  %930 = sbr.rel (!%p927_p4) target bundleno = 344 (0x158), region = 236 }
0x2489   : > { %vm5094_vm7 = vcmp.eq.s32.totalorder %v5086_v42, %v6531_v33  ;;  %v5099_v37 = vsel %vm5097_vm6, %v6531_v33, %v5098_v20 }
0x248a   : > { %v5387_v2 = vsel %vm5094_vm7, 1.0, %v6793_v21  ;;  %5100 = vst.msk [vmem:[%s6972_s27] sm:$0x3] %vm169_vm0, %v5099_v37 }
0x248b   : > { %v5117_v38 = vmul.f32 %v5387_v2, %v5116_v62 }
0x248d   : > { %v5118_v40 = vadd.f32 %v5117_v38, %v5114_v36  }
0x248e PF:  { %5123 = vsyncpa [#allocation9], 1 }
0x248f   :  { %5124 = vsyncpa [#allocation11], 1 }

</bundles_post_ra>
